<compile_context>
chip_gen: v5e
topology: v5e:2x2
jax: 0.10.0
libtpu: 0.0.40
codegen_flags: <defaults>
</compile_context>

<pallas_src>
import functools

import jax
import jax.numpy as jnp
from jax.experimental import pallas as pl
from jax.experimental.pallas import tpu as pltpu

NUM_CLASSES = 11          # fc takes 11 inputs => base_model num_classes must be 11
BN_EPS = 1e-3             # efficientnet-pytorch batch-norm eps
LANE = 128
_DW_OFFSETS = tuple((dh, dw) for dh in (-1, 0, 1) for dw in (-1, 0, 1))


# ----------------------------------------------------------------------------
# Tiling / VMEM helpers
# ----------------------------------------------------------------------------
@functools.lru_cache(maxsize=None)
def _vmem_limit_bytes():
    """Generation-aware scoped-VMEM limit (v5e/v6e 128MiB -> 96MiB, v7x 64MiB -> 48MiB)."""
    try:
        cap = int(pltpu.get_tpu_info().vmem_capacity_bytes)
    except Exception:
        cap = 64 * 1024 * 1024
    return min((cap * 3) // 4, 96 * 1024 * 1024)


def _cparams(dims):
    return pltpu.CompilerParams(dimension_semantics=dims,
                                vmem_limit_bytes=_vmem_limit_bytes())


def _pad_spatial(s):
    """Pad flattened spatial size up to a multiple of 128 (lane-dense)."""
    return ((s + LANE - 1) // LANE) * LANE


def _spatial_tile(s_pad):
    """Largest lane-dense tile dividing the padded spatial size."""
    for cand in (1024, 512, 256, 128):
        if s_pad % cand == 0:
            return cand
    return LANE


def _silu(y):
    # y * sigmoid(y); the divide rides the EUP (approx reciprocal), not the VALU.
    return y * pl.reciprocal(1.0 + jnp.exp(-y), approx=True)


def _sigmoid(y):
    return pl.reciprocal(1.0 + jnp.exp(-y), approx=True)


# ----------------------------------------------------------------------------
# Kernel 1: channel-major 1x1-conv / matmul (used for the stem)
# ----------------------------------------------------------------------------
def _matmul_cm_kernel(x_ref, w_ref, b_ref, o_ref, *, act):
    y = jnp.dot(w_ref[...], x_ref[...], preferred_element_type=jnp.float32)
    y = y + b_ref[...]
    if act == "silu":
        y = _silu(y)
    o_ref[...] = y.astype(o_ref.dtype)


def matmul_cm(x, w_t, b, act="none", out_dtype=jnp.bfloat16):
    """Channel-major matmul: x (B, K, S) -> (B, N, S), lane-dense output."""
    bsz, k, s = x.shape
    n = w_t.shape[0]
    ts = _spatial_tile(s)
    return pl.pallas_call(
        functools.partial(_matmul_cm_kernel, act=act),
        out_shape=jax.ShapeDtypeStruct((bsz, n, s), out_dtype),
        grid=(bsz, s // ts),
        in_specs=[
            pl.BlockSpec((None, k, ts), lambda bi, si: (bi, 0, si)),
            pl.BlockSpec((n, k), lambda bi, si: (0, 0)),
            pl.BlockSpec((n, 1), lambda bi, si: (0, 0)),
        ],
        out_specs=pl.BlockSpec((None, n, ts), lambda bi, si: (bi, 0, si)),
        compiler_params=_cparams(("parallel", "parallel")),
    )(x, w_t, b)


# ----------------------------------------------------------------------------
# Kernel 2: expand 1x1 + BN + SiLU  ->  depthwise 3x3 + BN + SiLU  ->  SE squeeze
#           (single fused kernel; the expand activation never touches HBM)
# ----------------------------------------------------------------------------
def _expand_dw_se_kernel(h_ref, we_ref, be_ref, taps_ref, bd_ref, m_ref,
                         d_ref, g_ref, *, width, s_pad):
    # expand 1x1 (32 -> c_tile channels), computed entirely in VMEM
    e = jnp.dot(we_ref[...], h_ref[...], preferred_element_type=jnp.float32)
    e = _silu(e + be_ref[...])                         # (c_tile, S_pad) f32
    taps = taps_ref[...]                               # (c_tile, 9) f32 (BN folded)
    masks = m_ref[...]                                 # (9, S_pad) f32 halo masks
    # depthwise 3x3: 9 masked lane-rolls (XLU) + MACs (VPU), no shifted copies
    acc = jnp.zeros_like(e)
    for k, (dh, dw) in enumerate(_DW_OFFSETS):
        off = dh * width + dw
        src = e if off == 0 else pltpu.roll(e, (-off) % s_pad, 1)
        acc = acc + src * masks[k:k + 1, :] * taps[:, k:k + 1]
    y = _silu(acc + bd_ref[...])                       # folded BN bias + SiLU
    d_ref[...] = y.astype(d_ref.dtype)
    # SE squeeze: spatial sum over *valid* positions only (center mask = validity)
    g_ref[...] = jnp.sum(y * masks[4:5, :], axis=1, keepdims=True)


def expand_dwconv_se(h, exp_wt, exp_b, dw_taps, dw_b, masks, *, width):
    bsz, c_in, s_pad = h.shape
    c_exp = exp_wt.shape[0]
    c_tile = 16 if c_exp % 16 == 0 else c_exp          # channel tiling bounds VMEM
    return pl.pallas_call(
        functools.partial(_expand_dw_se_kernel, width=width, s_pad=s_pad),
        out_shape=(jax.ShapeDtypeStruct((bsz, c_exp, s_pad), jnp.bfloat16),
                   jax.ShapeDtypeStruct((bsz, c_exp, 1), jnp.float32)),
        grid=(bsz, c_exp // c_tile),
        in_specs=[
            pl.BlockSpec((None, c_in, s_pad), lambda bi, ci: (bi, 0, 0)),
            pl.BlockSpec((c_tile, c_in), lambda bi, ci: (ci, 0)),
            pl.BlockSpec((c_tile, 1), lambda bi, ci: (ci, 0)),
            pl.BlockSpec((c_tile, 9), lambda bi, ci: (ci, 0)),
            pl.BlockSpec((c_tile, 1), lambda bi, ci: (ci, 0)),
            pl.BlockSpec((9, s_pad), lambda bi, ci: (0, 0)),
        ],
        out_specs=(
            pl.BlockSpec((None, c_tile, s_pad), lambda bi, ci: (bi, ci, 0)),
            pl.BlockSpec((None, c_tile, 1), lambda bi, ci: (bi, ci, 0)),
        ),
        compiler_params=_cparams(("parallel", "parallel")),
    )(h, exp_wt, exp_b, dw_taps, dw_b, masks)


# ----------------------------------------------------------------------------
# Kernel 3: SE MLP + projection 1x1 + BN + residual add (fused, in place on h)
# ----------------------------------------------------------------------------
def _se_proj_res_kernel(d_ref, g_ref, wr_ref, br_ref, wx_ref, bx_ref,
                        wp_ref, bp_ref, r_ref, o_ref, *, inv_hw):
    # SE MLP recomputed per tile (tiny) -> no extra launch, no cross-step scratch,
    # so both grid axes stay megacore-parallel.
    gap = g_ref[...] * inv_hw                                          # (64, 1)
    z = jnp.dot(wr_ref[...], gap, preferred_element_type=jnp.float32) + br_ref[...]
    z = _silu(z)
    se = _sigmoid(jnp.dot(wx_ref[...], z,
                          preferred_element_type=jnp.float32) + bx_ref[...])
    xs = (d_ref[...].astype(jnp.float32) * se).astype(jnp.bfloat16)    # (64, ts)
    y = jnp.dot(wp_ref[...], xs, preferred_element_type=jnp.float32)   # (32, ts)
    y = y + bp_ref[...] + r_ref[...].astype(jnp.float32)
    o_ref[...] = y.astype(o_ref.dtype)


def se_proj_residual(d, gap_sum, se_r_wt, se_r_b, se_e_wt, se_e_b,
                     proj_wt, proj_b, residual, *, inv_hw):
    bsz, c_exp, s_pad = d.shape
    n = proj_wt.shape[0]
    ts = _spatial_tile(s_pad)
    return pl.pallas_call(
        functools.partial(_se_proj_res_kernel, inv_hw=inv_hw),
        out_shape=jax.ShapeDtypeStruct((bsz, n, s_pad), residual.dtype),
        grid=(bsz, s_pad // ts),
        in_specs=[
            pl.BlockSpec((None, c_exp, ts), lambda bi, si: (bi, 0, si)),
            pl.BlockSpec((None, c_exp, 1), lambda bi, si: (bi, 0, 0)),
            pl.BlockSpec(se_r_wt.shape, lambda bi, si: (0, 0)),
            pl.BlockSpec(se_r_b.shape, lambda bi, si: (0, 0)),
            pl.BlockSpec(se_e_wt.shape, lambda bi, si: (0, 0)),
            pl.BlockSpec(se_e_b.shape, lambda bi, si: (0, 0)),
            pl.BlockSpec(proj_wt.shape, lambda bi, si: (0, 0)),
            pl.BlockSpec(proj_b.shape, lambda bi, si: (0, 0)),
            pl.BlockSpec((None, n, ts), lambda bi, si: (bi, 0, si)),
        ],
        out_specs=pl.BlockSpec((None, n, ts), lambda bi, si: (bi, 0, si)),
        input_output_aliases={8: 0},          # write in place on the residual
        compiler_params=_cparams(("parallel", "parallel")),
    )(d, gap_sum, se_r_wt, se_r_b, se_e_wt, se_e_b, proj_wt, proj_b, residual)


# ----------------------------------------------------------------------------
# Kernel 4: head 1x1 conv + BN + SiLU + masked GAP accumulator, then
#           classifier(128->11) + fc1(11->64)+ReLU + fc2(64->11)+Softmax finalize
# ----------------------------------------------------------------------------
def _head_gap_tail_kernel(x_ref, vm_ref, wh_ref, bh_ref, cw_ref, cb_ref,
                          w1_ref, b1_ref, w2_ref, b2_ref, o_ref, acc_ref,
                          *, inv_hw):
    @pl.when(pl.program_id(1) == 0)
    def _():
        acc_ref[...] = jnp.zeros_like(acc_ref)

    y = jnp.dot(wh_ref[...], x_ref[...], preferred_element_type=jnp.float32)
    y = _silu(y + bh_ref[...])                                         # (128, ts)
    acc_ref[...] += jnp.sum(y * vm_ref[...], axis=1, keepdims=True)    # masked GAP

    @pl.when(pl.program_id(1) == pl.num_programs(1) - 1)
    def _():
        pooled = acc_ref[...] * inv_hw                                 # (128, 1)
        feats = jnp.dot(cw_ref[...], pooled,
                        preferred_element_type=jnp.float32) + cb_ref[...]
        z = jnp.dot(w1_ref[...], feats,
                    preferred_element_type=jnp.float32) + b1_ref[...]
        z = jnp.maximum(z, 0.0)                                        # ReLU
        # TODO(synk): nn.Dropout(0.45) training-mode masking omitted (eval identity).
        logits = jnp.dot(w2_ref[...], z,
                         preferred_element_type=jnp.float32) + b2_ref[...]
        m = jnp.max(logits, axis=0, keepdims=True)
        e = jnp.exp(logits - m)
        o_ref[...] = (e / jnp.sum(e, axis=0, keepdims=True)).astype(o_ref.dtype)


def head_gap_tail(x, valid_mask, head_wt, head_b, cls_wt, cls_b,
                  fc1_wt, fc1_b, fc2_wt, fc2_b, *, inv_hw):
    bsz, c_in, s_pad = x.shape
    nc = cls_wt.shape[0]
    ch = head_wt.shape[0]
    ts = _spatial_tile(s_pad)
    out = pl.pallas_call(
        functools.partial(_head_gap_tail_kernel, inv_hw=inv_hw),
        out_shape=jax.ShapeDtypeStruct((bsz, nc, 1), jnp.float32),
        grid=(bsz, s_pad // ts),
        in_specs=[
            pl.BlockSpec((None, c_in, ts), lambda bi, si: (bi, 0, si)),
            pl.BlockSpec((1, ts), lambda bi, si: (0, si)),
            pl.BlockSpec((ch, c_in), lambda bi, si: (0, 0)),
            pl.BlockSpec((ch, 1), lambda bi, si: (0, 0)),
            pl.BlockSpec(cls_wt.shape, lambda bi, si: (0, 0)),
            pl.BlockSpec(cls_b.shape, lambda bi, si: (0, 0)),
            pl.BlockSpec(fc1_wt.shape, lambda bi, si: (0, 0)),
            pl.BlockSpec(fc1_b.shape, lambda bi, si: (0, 0)),
            pl.BlockSpec(fc2_wt.shape, lambda bi, si: (0, 0)),
            pl.BlockSpec(fc2_b.shape, lambda bi, si: (0, 0)),
        ],
        out_specs=pl.BlockSpec((None, nc, 1), lambda bi, si: (bi, 0, 0)),
        scratch_shapes=[pltpu.VMEM((ch, 1), jnp.float32)],
        compiler_params=_cparams(("parallel", "arbitrary")),
    )(x, valid_mask, head_wt, head_b, cls_wt, cls_b, fc1_wt, fc1_b, fc2_wt, fc2_b)
    return out[:, :, 0]


# ----------------------------------------------------------------------------
# JAX glue: im2col (stem), depthwise halo masks, BN folding, parameter init
# ----------------------------------------------------------------------------
def _im2col_cm(x_nchw, ksize, stride, pad):
    """Channel-major im2col: (B, C, H, W) -> (B, k*k*C, Ho*Wo)."""
    b, c, hgt, wid = x_nchw.shape
    lo, hi = pad
    xp = jnp.pad(x_nchw, ((0, 0), (0, 0), (lo, hi), (lo, hi)))
    ho = (hgt + lo + hi - ksize) // stride + 1
    wo = (wid + lo + hi - ksize) // stride + 1
    taps = []
    for kh in range(ksize):
        for kw in range(ksize):
            taps.append(xp[:, :, kh:kh + stride * ho:stride,
                           kw:kw + stride * wo:stride])
    pat = jnp.stack(taps, axis=1)                       # (B, k*k, C, Ho, Wo)
    return pat.reshape(b, ksize * ksize * c, ho * wo), ho, wo


def _dw_masks(hgt, wid, s_pad):
    """(9, S_pad) validity masks for the 3x3 taps over the flattened spatial axis."""
    pos = jnp.arange(s_pad, dtype=jnp.int32)
    hi, wi = pos // wid, pos % wid
    rows = []
    for dh, dw in _DW_OFFSETS:
        ok = ((hi + dh >= 0) & (hi + dh < hgt) &
              (wi + dw >= 0) & (wi + dw < wid) & (pos < hgt * wid))
        rows.append(ok)
    return jnp.stack(rows).astype(jnp.float32)


def _fold_bn_t(w_io, gamma, beta, mean, var):
    """Fold inference BatchNorm into the conv and transpose to (out, in) bf16."""
    scale = gamma / jnp.sqrt(var + BN_EPS)
    w_t = (w_io * scale[None, :]).T.astype(jnp.bfloat16)
    b = (beta - mean * scale).reshape(-1, 1).astype(jnp.float32)
    return w_t, b


def init_params(key):
    ks = iter(jax.random.split(key, 12))

    def w(shape, scale=0.05):
        return (scale * jax.random.normal(next(ks), shape)).astype(jnp.float32)

    def bn(c):  # (gamma, beta, running_mean, running_var)
        return (jnp.ones((c,), jnp.float32), jnp.zeros((c,), jnp.float32),
                jnp.zeros((c,), jnp.float32), jnp.ones((c,), jnp.float32))

    c_stem, c_exp, c_se, c_head = 32, 64, 16, 128
    return {
        # stem: 3x3 s2 conv 3 -> 32, BN, SiLU   (rows ordered (tap, cin))
        "stem_w": w((9 * 3, c_stem)), "stem_bn": bn(c_stem),
        # MBConv: expand 1x1 32 -> 64
        "exp_w": w((c_stem, c_exp)), "exp_bn": bn(c_exp),
        # depthwise 3x3 taps (9, C)
        "dw_w": w((9, c_exp)), "dw_bn": bn(c_exp),
        # squeeze-excite 64 -> 16 -> 64 (convs with bias)
        "se_r_w": w((c_exp, c_se)), "se_r_b": jnp.zeros((c_se, 1), jnp.float32),
        "se_e_w": w((c_se, c_exp)), "se_e_b": jnp.zeros((c_exp, 1), jnp.float32),
        # project 1x1 64 -> 32
        "proj_w": w((c_exp, c_stem)), "proj_bn": bn(c_stem),
        # head conv 1x1 32 -> 128, BN, SiLU
        "head_w": w((c_stem, c_head)), "head_bn": bn(c_head),
        # backbone classifier 128 -> num_classes (has bias)
        "cls_w": w((c_head, NUM_CLASSES)),
        "cls_b": jnp.zeros((NUM_CLASSES, 1), jnp.float32),
        # fc head: Linear(11, 64) -> ReLU -> Dropout -> Linear(64, 11) -> Softmax
        "fc1_w": w((NUM_CLASSES, 64), 0.2),
        "fc1_b": jnp.zeros((64, 1), jnp.float32),
        "fc2_w": w((64, NUM_CLASSES), 0.2),
        "fc2_b": jnp.zeros((NUM_CLASSES, 1), jnp.float32),
    }


# ----------------------------------------------------------------------------
# Forward pass
# ----------------------------------------------------------------------------
def custom_efficientnet_forward(params, x_nchw):
    x = x_nchw.astype(jnp.bfloat16)            # channel-major is PyTorch-native

    # ---- stem: conv3x3 s2 "same" + BN + SiLU (im2col glue, lane-dense matmul) ----
    patches, ho, wo = _im2col_cm(x, ksize=3, stride=2, pad=(0, 1))
    s_valid = ho * wo
    s_pad = _pad_spatial(s_valid)
    if s_pad != s_valid:
        patches = jnp.pad(patches, ((0, 0), (0, 0), (0, s_pad - s_valid)))
    masks = _dw_masks(ho, wo, s_pad)            # (9, S_pad) depthwise halo masks
    valid = masks[4:5]                          # (1, S_pad) real-pixel mask

    stem_wt, stem_b = _fold_bn_t(params["stem_w"], *params["stem_bn"])
    h = matmul_cm(patches, stem_wt, stem_b, act="silu")        # (B, 32, S_pad)

    # ---- MBConv: expand 1x1 + depthwise 3x3 + SE squeeze (one fused kernel) ----
    exp_wt, exp_b = _fold_bn_t(params["exp_w"], *params["exp_bn"])
    dw_scale = params["dw_bn"][0] / jnp.sqrt(params["dw_bn"][3] + BN_EPS)
    dw_taps = (params["dw_w"] * dw_scale[None, :]).T.astype(jnp.float32)   # (64, 9)
    dw_b = (params["dw_bn"][1] - params["dw_bn"][2] * dw_scale
            ).reshape(-1, 1).astype(jnp.float32)
    d, gap_sum = expand_dwconv_se(h, exp_wt, exp_b, dw_taps, dw_b, masks,
                                  width=wo)     # d (B,64,S_pad), gap (B,64,1)

    # ---- SE MLP + project 1x1 + BN + residual (fused, in place on h) ----
    proj_wt, proj_b = _fold_bn_t(params["proj_w"], *params["proj_bn"])
    h = se_proj_residual(d, gap_sum,
                         params["se_r_w"].T, params["se_r_b"],
                         params["se_e_w"].T, params["se_e_b"],
                         proj_wt, proj_b, h, inv_hw=1.0 / s_valid)  # (B,32,S_pad)

    # ---- head conv + BN + SiLU + GAP + classifier + fc head + softmax ----
    head_wt, head_b = _fold_bn_t(params["head_w"], *params["head_bn"])
    out = head_gap_tail(h, valid, head_wt, head_b,
                        params["cls_w"].T, params["cls_b"],
                        params["fc1_w"].T, params["fc1_b"],
                        params["fc2_w"].T, params["fc2_b"],
                        inv_hw=1.0 / s_valid)                      # (B, 11)
    return out


# ----------------------------------------------------------------------------
if __name__ == "__main__":
    key = jax.random.PRNGKey(0)
    k_x, k_p = jax.random.split(key)

    x = jax.random.normal(k_x, (2, 3, 32, 32), dtype=jnp.float32)   # NCHW input
    params = init_params(k_p)

    fwd = jax.jit(custom_efficientnet_forward)
    y = jax.block_until_ready(fwd(params, x))

    assert y.shape == (2, NUM_CLASSES), y.shape
    row_sums = jnp.sum(y, axis=1)
    assert bool(jnp.all(jnp.abs(row_sums - 1.0) < 1e-3)), row_sums
    assert bool(jnp.all(jnp.isfinite(y)))

    print("KERNEL_OK")
</pallas_src>

<mosaic_0001>
module attributes {stable_mosaic.version = 11 : i64} {
  func.func @_matmul_cm_kernel(%arg0: i32, %arg1: i32, %arg2: memref<1x27x256xbf16, #tpu.memory_space<vmem>>, %arg3: memref<32x27xbf16, #tpu.memory_space<vmem>>, %arg4: memref<32x1xf32, #tpu.memory_space<vmem>>, %arg5: memref<1x32x256xbf16, #tpu.memory_space<vmem>>) attributes {dimension_semantics = [#tpu.dimension_semantics<parallel>, #tpu.dimension_semantics<parallel>], iteration_bounds = array<i64: 2, 1>, scalar_prefetch = 0 : i64, scratch_operands = 0 : i64, tpu.core_type = #tpu.core_type<tc>, window_params = [{transform_indices = @transform_0, window_bounds = array<i64: 1, 27, 256>}, {pipeline_mode = #tpu.pipeline_mode<synchronous>, transform_indices = @transform_1, window_bounds = array<i64: 32, 27>}, {pipeline_mode = #tpu.pipeline_mode<synchronous>, transform_indices = @transform_2, window_bounds = array<i64: 32, 1>}, {transform_indices = @transform_3, window_bounds = array<i64: 1, 32, 256>}]} {
    %c0 = arith.constant 0 : index
    %c0_0 = arith.constant 0 : index
    %0 = vector.load %arg3[%c0, %c0_0] : memref<32x27xbf16, #tpu.memory_space<vmem>>, vector<32x27xbf16>
    %c0_1 = arith.constant 0 : index
    %c0_2 = arith.constant 0 : index
    %c0_3 = arith.constant 0 : index
    %1 = vector.load %arg2[%c0_1, %c0_2, %c0_3] : memref<1x27x256xbf16, #tpu.memory_space<vmem>>, vector<1x27x256xbf16>
    %2 = vector.shape_cast %1 : vector<1x27x256xbf16> to vector<27x256xbf16>
    %cst = arith.constant dense<0.000000e+00> : vector<32x256xf32>
    %3 = tpu.matmul %0, %2, %cst {dimension_numbers = #tpu.dot_dimension_numbers<[1], [0], [0], [1], [0, 0, 1, 1], [], []>} : vector<32x27xbf16>, vector<27x256xbf16>, vector<32x256xf32> -> vector<32x256xf32>
    %c0_4 = arith.constant 0 : index
    %c0_5 = arith.constant 0 : index
    %4 = vector.load %arg4[%c0_4, %c0_5] : memref<32x1xf32, #tpu.memory_space<vmem>>, vector<32x1xf32>
    %5 = vector.broadcast %4 : vector<32x1xf32> to vector<32x256xf32>
    %6 = arith.addf %3, %5 : vector<32x256xf32>
    %cst_6 = arith.constant 0.000000e+00 : f32
    %7 = vector.broadcast %cst_6 : f32 to vector<32x256xf32>
    %8 = arith.subf %7, %6 : vector<32x256xf32>
    %9 = math.exp %8 : vector<32x256xf32>
    %cst_7 = arith.constant 1.000000e+00 : f32
    %10 = vector.broadcast %cst_7 : f32 to vector<32x256xf32>
    %11 = arith.addf %10, %9 : vector<32x256xf32>
    %12 = tpu.reciprocal %11 {approx = true} : vector<32x256xf32> -> vector<32x256xf32>
    %13 = arith.mulf %6, %12 : vector<32x256xf32>
    %14 = arith.truncf %13 : vector<32x256xf32> to vector<32x256xbf16>
    %c0_8 = arith.constant 0 : index
    %c0_9 = arith.constant 0 : index
    %c0_10 = arith.constant 0 : index
    %15 = vector.load %arg5[%c0_8, %c0_9, %c0_10] : memref<1x32x256xbf16, #tpu.memory_space<vmem>>, vector<1x32x256xbf16>
    %16 = vector.shape_cast %15 : vector<1x32x256xbf16> to vector<32x256xbf16>
    %17 = vector.shape_cast %14 : vector<32x256xbf16> to vector<1x32x256xbf16>
    tpu.vector_store %arg5[%c0_8, %c0_9, %c0_10], %17 {strides = array<i32>} : memref<1x32x256xbf16, #tpu.memory_space<vmem>>, vector<1x32x256xbf16>,
    return
  }
  func.func @transform_0(%arg0: i32, %arg1: i32) -> (i32, i32, i32) {
    %c0_i32 = arith.constant 0 : i32
    %c0_i32_0 = arith.constant 0 : i32
    return %arg0, %c0_i32, %arg1 : i32, i32, i32
  }
  func.func @transform_1(%arg0: i32, %arg1: i32) -> (i32, i32) {
    %c0_i32 = arith.constant 0 : i32
    %c0_i32_0 = arith.constant 0 : i32
    %c0_i32_1 = arith.constant 0 : i32
    return %c0_i32, %c0_i32_0 : i32, i32
  }
  func.func @transform_2(%arg0: i32, %arg1: i32) -> (i32, i32) {
    %c0_i32 = arith.constant 0 : i32
    %c0_i32_0 = arith.constant 0 : i32
    %c0_i32_1 = arith.constant 0 : i32
    return %c0_i32, %c0_i32_0 : i32, i32
  }
  func.func @transform_3(%arg0: i32, %arg1: i32) -> (i32, i32, i32) {
    %c0_i32 = arith.constant 0 : i32
    %c0_i32_0 = arith.constant 0 : i32
    return %arg0, %c0_i32, %arg1 : i32, i32, i32
  }
}

module attributes {stable_mosaic.version = 11 : i64} {
  func.func @_expand_dw_se_kernel(%arg0: i32, %arg1: i32, %arg2: memref<1x32x256xbf16, #tpu.memory_space<vmem>>, %arg3: memref<16x32xbf16, #tpu.memory_space<vmem>>, %arg4: memref<16x1xf32, #tpu.memory_space<vmem>>, %arg5: memref<16x9xf32, #tpu.memory_space<vmem>>, %arg6: memref<16x1xf32, #tpu.memory_space<vmem>>, %arg7: memref<9x256xf32, #tpu.memory_space<vmem>>, %arg8: memref<1x16x256xbf16, #tpu.memory_space<vmem>>, %arg9: memref<1x16x1xf32, #tpu.memory_space<vmem>>) attributes {dimension_semantics = [#tpu.dimension_semantics<parallel>, #tpu.dimension_semantics<parallel>], iteration_bounds = array<i64: 2, 4>, scalar_prefetch = 0 : i64, scratch_operands = 0 : i64, tpu.core_type = #tpu.core_type<tc>, window_params = [{transform_indices = @transform_0, window_bounds = array<i64: 1, 32, 256>}, {transform_indices = @transform_1, window_bounds = array<i64: 16, 32>}, {transform_indices = @transform_2, window_bounds = array<i64: 16, 1>}, {transform_indices = @transform_3, window_bounds = array<i64: 16, 9>}, {transform_indices = @transform_4, window_bounds = array<i64: 16, 1>}, {pipeline_mode = #tpu.pipeline_mode<synchronous>, transform_indices = @transform_5, window_bounds = array<i64: 9, 256>}, {transform_indices = @transform_6, window_bounds = array<i64: 1, 16, 256>}, {transform_indices = @transform_7, window_bounds = array<i64: 1, 16, 1>}]} {
    %c0 = arith.constant 0 : index
    %c0_0 = arith.constant 0 : index
    %0 = vector.load %arg3[%c0, %c0_0] : memref<16x32xbf16, #tpu.memory_space<vmem>>, vector<16x32xbf16>
    %c0_1 = arith.constant 0 : index
    %c0_2 = arith.constant 0 : index
    %c0_3 = arith.constant 0 : index
    %1 = vector.load %arg2[%c0_1, %c0_2, %c0_3] : memref<1x32x256xbf16, #tpu.memory_space<vmem>>, vector<1x32x256xbf16>
    %2 = vector.shape_cast %1 : vector<1x32x256xbf16> to vector<32x256xbf16>
    %cst = arith.constant dense<0.000000e+00> : vector<16x256xf32>
    %3 = tpu.matmul %0, %2, %cst {dimension_numbers = #tpu.dot_dimension_numbers<[1], [0], [0], [1], [0, 0, 1, 1], [], []>} : vector<16x32xbf16>, vector<32x256xbf16>, vector<16x256xf32> -> vector<16x256xf32>
    %c0_4 = arith.constant 0 : index
    %c0_5 = arith.constant 0 : index
    %4 = vector.load %arg4[%c0_4, %c0_5] : memref<16x1xf32, #tpu.memory_space<vmem>>, vector<16x1xf32>
    %5 = vector.broadcast %4 : vector<16x1xf32> to vector<16x256xf32>
    %6 = arith.addf %3, %5 : vector<16x256xf32>
    %cst_6 = arith.constant 0.000000e+00 : f32
    %7 = vector.broadcast %cst_6 : f32 to vector<16x256xf32>
    %8 = arith.subf %7, %6 : vector<16x256xf32>
    %9 = math.exp %8 : vector<16x256xf32>
    %cst_7 = arith.constant 1.000000e+00 : f32
    %10 = vector.broadcast %cst_7 : f32 to vector<16x256xf32>
    %11 = arith.addf %10, %9 : vector<16x256xf32>
    %12 = tpu.reciprocal %11 {approx = true} : vector<16x256xf32> -> vector<16x256xf32>
    %13 = arith.mulf %6, %12 : vector<16x256xf32>
    %c0_8 = arith.constant 0 : index
    %c0_9 = arith.constant 0 : index
    %14 = vector.load %arg5[%c0_8, %c0_9] : memref<16x9xf32, #tpu.memory_space<vmem>>, vector<16x9xf32>
    %c0_10 = arith.constant 0 : index
    %c0_11 = arith.constant 0 : index
    %15 = vector.load %arg7[%c0_10, %c0_11] : memref<9x256xf32, #tpu.memory_space<vmem>>, vector<9x256xf32>
    %cst_12 = arith.constant 0.000000e+00 : f32
    %16 = vector.broadcast %cst_12 : f32 to vector<16x256xf32>
    %c17_i32 = arith.constant 17 : i32
    %17 = tpu.dynamic_rotate %13 by %c17_i32 dim 1 : vector<16x256xf32>, i32 -> vector<16x256xf32>
    %18 = vector.extract_strided_slice %15 {offsets = [0, 0], sizes = [1, 256], strides = [1, 1]} : vector<9x256xf32> to vector<1x256xf32>
    %19 = vector.broadcast %18 : vector<1x256xf32> to vector<16x256xf32>
    %20 = arith.mulf %17, %19 : vector<16x256xf32>
    %21 = vector.extract_strided_slice %14 {offsets = [0, 0], sizes = [16, 1], strides = [1, 1]} : vector<16x9xf32> to vector<16x1xf32>
    %22 = vector.broadcast %21 : vector<16x1xf32> to vector<16x256xf32>
    %23 = arith.mulf %20, %22 : vector<16x256xf32>
    %24 = arith.addf %16, %23 : vector<16x256xf32>
    %c16_i32 = arith.constant 16 : i32
    %25 = tpu.dynamic_rotate %13 by %c16_i32 dim 1 : vector<16x256xf32>, i32 -> vector<16x256xf32>
    %26 = vector.extract_strided_slice %15 {offsets = [1, 0], sizes = [1, 256], strides = [1, 1]} : vector<9x256xf32> to vector<1x256xf32>
    %27 = vector.broadcast %26 : vector<1x256xf32> to vector<16x256xf32>
    %28 = arith.mulf %25, %27 : vector<16x256xf32>
    %29 = vector.extract_strided_slice %14 {offsets = [0, 1], sizes = [16, 1], strides = [1, 1]} : vector<16x9xf32> to vector<16x1xf32>
    %30 = vector.broadcast %29 : vector<16x1xf32> to vector<16x256xf32>
    %31 = arith.mulf %28, %30 : vector<16x256xf32>
    %32 = arith.addf %24, %31 : vector<16x256xf32>
    %c15_i32 = arith.constant 15 : i32
    %33 = tpu.dynamic_rotate %13 by %c15_i32 dim 1 : vector<16x256xf32>, i32 -> vector<16x256xf32>
    %34 = vector.extract_strided_slice %15 {offsets = [2, 0], sizes = [1, 256], strides = [1, 1]} : vector<9x256xf32> to vector<1x256xf32>
    %35 = vector.broadcast %34 : vector<1x256xf32> to vector<16x256xf32>
    %36 = arith.mulf %33, %35 : vector<16x256xf32>
    %37 = vector.extract_strided_slice %14 {offsets = [0, 2], sizes = [16, 1], strides = [1, 1]} : vector<16x9xf32> to vector<16x1xf32>
    %38 = vector.broadcast %37 : vector<16x1xf32> to vector<16x256xf32>
    %39 = arith.mulf %36, %38 : vector<16x256xf32>
    %40 = arith.addf %32, %39 : vector<16x256xf32>
    %c1_i32 = arith.constant 1 : i32
    %41 = tpu.dynamic_rotate %13 by %c1_i32 dim 1 : vector<16x256xf32>, i32 -> vector<16x256xf32>
    %42 = vector.extract_strided_slice %15 {offsets = [3, 0], sizes = [1, 256], strides = [1, 1]} : vector<9x256xf32> to vector<1x256xf32>
    %43 = vector.broadcast %42 : vector<1x256xf32> to vector<16x256xf32>
    %44 = arith.mulf %41, %43 : vector<16x256xf32>
    %45 = vector.extract_strided_slice %14 {offsets = [0, 3], sizes = [16, 1], strides = [1, 1]} : vector<16x9xf32> to vector<16x1xf32>
    %46 = vector.broadcast %45 : vector<16x1xf32> to vector<16x256xf32>
    %47 = arith.mulf %44, %46 : vector<16x256xf32>
    %48 = arith.addf %40, %47 : vector<16x256xf32>
    %49 = vector.extract_strided_slice %15 {offsets = [4, 0], sizes = [1, 256], strides = [1, 1]} : vector<9x256xf32> to vector<1x256xf32>
    %50 = vector.broadcast %49 : vector<1x256xf32> to vector<16x256xf32>
    %51 = arith.mulf %13, %50 : vector<16x256xf32>
    %52 = vector.extract_strided_slice %14 {offsets = [0, 4], sizes = [16, 1], strides = [1, 1]} : vector<16x9xf32> to vector<16x1xf32>
    %53 = vector.broadcast %52 : vector<16x1xf32> to vector<16x256xf32>
    %54 = arith.mulf %51, %53 : vector<16x256xf32>
    %55 = arith.addf %48, %54 : vector<16x256xf32>
    %c255_i32 = arith.constant 255 : i32
    %56 = tpu.dynamic_rotate %13 by %c255_i32 dim 1 : vector<16x256xf32>, i32 -> vector<16x256xf32>
    %57 = vector.extract_strided_slice %15 {offsets = [5, 0], sizes = [1, 256], strides = [1, 1]} : vector<9x256xf32> to vector<1x256xf32>
    %58 = vector.broadcast %57 : vector<1x256xf32> to vector<16x256xf32>
    %59 = arith.mulf %56, %58 : vector<16x256xf32>
    %60 = vector.extract_strided_slice %14 {offsets = [0, 5], sizes = [16, 1], strides = [1, 1]} : vector<16x9xf32> to vector<16x1xf32>
    %61 = vector.broadcast %60 : vector<16x1xf32> to vector<16x256xf32>
    %62 = arith.mulf %59, %61 : vector<16x256xf32>
    %63 = arith.addf %55, %62 : vector<16x256xf32>
    %c241_i32 = arith.constant 241 : i32
    %64 = tpu.dynamic_rotate %13 by %c241_i32 dim 1 : vector<16x256xf32>, i32 -> vector<16x256xf32>
    %65 = vector.extract_strided_slice %15 {offsets = [6, 0], sizes = [1, 256], strides = [1, 1]} : vector<9x256xf32> to vector<1x256xf32>
    %66 = vector.broadcast %65 : vector<1x256xf32> to vector<16x256xf32>
    %67 = arith.mulf %64, %66 : vector<16x256xf32>
    %68 = vector.extract_strided_slice %14 {offsets = [0, 6], sizes = [16, 1], strides = [1, 1]} : vector<16x9xf32> to vector<16x1xf32>
    %69 = vector.broadcast %68 : vector<16x1xf32> to vector<16x256xf32>
    %70 = arith.mulf %67, %69 : vector<16x256xf32>
    %71 = arith.addf %63, %70 : vector<16x256xf32>
    %c240_i32 = arith.constant 240 : i32
    %72 = tpu.dynamic_rotate %13 by %c240_i32 dim 1 : vector<16x256xf32>, i32 -> vector<16x256xf32>
    %73 = vector.extract_strided_slice %15 {offsets = [7, 0], sizes = [1, 256], strides = [1, 1]} : vector<9x256xf32> to vector<1x256xf32>
    %74 = vector.broadcast %73 : vector<1x256xf32> to vector<16x256xf32>
    %75 = arith.mulf %72, %74 : vector<16x256xf32>
    %76 = vector.extract_strided_slice %14 {offsets = [0, 7], sizes = [16, 1], strides = [1, 1]} : vector<16x9xf32> to vector<16x1xf32>
    %77 = vector.broadcast %76 : vector<16x1xf32> to vector<16x256xf32>
    %78 = arith.mulf %75, %77 : vector<16x256xf32>
    %79 = arith.addf %71, %78 : vector<16x256xf32>
    %c239_i32 = arith.constant 239 : i32
    %80 = tpu.dynamic_rotate %13 by %c239_i32 dim 1 : vector<16x256xf32>, i32 -> vector<16x256xf32>
    %81 = vector.extract_strided_slice %15 {offsets = [8, 0], sizes = [1, 256], strides = [1, 1]} : vector<9x256xf32> to vector<1x256xf32>
    %82 = vector.broadcast %81 : vector<1x256xf32> to vector<16x256xf32>
    %83 = arith.mulf %80, %82 : vector<16x256xf32>
    %84 = vector.extract_strided_slice %14 {offsets = [0, 8], sizes = [16, 1], strides = [1, 1]} : vector<16x9xf32> to vector<16x1xf32>
    %85 = vector.broadcast %84 : vector<16x1xf32> to vector<16x256xf32>
    %86 = arith.mulf %83, %85 : vector<16x256xf32>
    %87 = arith.addf %79, %86 : vector<16x256xf32>
    %c0_13 = arith.constant 0 : index
    %c0_14 = arith.constant 0 : index
    %88 = vector.load %arg6[%c0_13, %c0_14] : memref<16x1xf32, #tpu.memory_space<vmem>>, vector<16x1xf32>
    %89 = vector.broadcast %88 : vector<16x1xf32> to vector<16x256xf32>
    %90 = arith.addf %87, %89 : vector<16x256xf32>
    %cst_15 = arith.constant 0.000000e+00 : f32
    %91 = vector.broadcast %cst_15 : f32 to vector<16x256xf32>
    %92 = arith.subf %91, %90 : vector<16x256xf32>
    %93 = math.exp %92 : vector<16x256xf32>
    %cst_16 = arith.constant 1.000000e+00 : f32
    %94 = vector.broadcast %cst_16 : f32 to vector<16x256xf32>
    %95 = arith.addf %94, %93 : vector<16x256xf32>
    %96 = tpu.reciprocal %95 {approx = true} : vector<16x256xf32> -> vector<16x256xf32>
    %97 = arith.mulf %90, %96 : vector<16x256xf32>
    %98 = arith.truncf %97 : vector<16x256xf32> to vector<16x256xbf16>
    %c0_17 = arith.constant 0 : index
    %c0_18 = arith.constant 0 : index
    %c0_19 = arith.constant 0 : index
    %99 = vector.load %arg8[%c0_17, %c0_18, %c0_19] : memref<1x16x256xbf16, #tpu.memory_space<vmem>>, vector<1x16x256xbf16>
    %100 = vector.shape_cast %99 : vector<1x16x256xbf16> to vector<16x256xbf16>
    %101 = vector.shape_cast %98 : vector<16x256xbf16> to vector<1x16x256xbf16>
    tpu.vector_store %arg8[%c0_17, %c0_18, %c0_19], %101 {strides = array<i32>} : memref<1x16x256xbf16, #tpu.memory_space<vmem>>, vector<1x16x256xbf16>,
    %102 = vector.extract_strided_slice %15 {offsets = [4, 0], sizes = [1, 256], strides = [1, 1]} : vector<9x256xf32> to vector<1x256xf32>
    %103 = vector.broadcast %102 : vector<1x256xf32> to vector<16x256xf32>
    %104 = arith.mulf %97, %103 : vector<16x256xf32>
    %cst_20 = arith.constant dense<0.000000e+00> : vector<16xf32>
    %105 = vector.multi_reduction <add>, %104, %cst_20 [1] : vector<16x256xf32> to vector<16xf32>
    %106 = vector.shape_cast %105 : vector<16xf32> to vector<16x1xf32>
    %c0_21 = arith.constant 0 : index
    %c0_22 = arith.constant 0 : index
    %c0_23 = arith.constant 0 : index
    %107 = vector.load %arg9[%c0_21, %c0_22, %c0_23] : memref<1x16x1xf32, #tpu.memory_space<vmem>>, vector<1x16x1xf32>
    %108 = vector.shape_cast %107 : vector<1x16x1xf32> to vector<16x1xf32>
    %109 = vector.shape_cast %106 : vector<16x1xf32> to vector<1x16x1xf32>
    tpu.vector_store %arg9[%c0_21, %c0_22, %c0_23], %109 {strides = array<i32>} : memref<1x16x1xf32, #tpu.memory_space<vmem>>, vector<1x16x1xf32>,
    return
  }
  func.func @transform_0(%arg0: i32, %arg1: i32) -> (i32, i32, i32) {
    %c0_i32 = arith.constant 0 : i32
    %c0_i32_0 = arith.constant 0 : i32
    %c0_i32_1 = arith.constant 0 : i32
    return %arg0, %c0_i32, %c0_i32_0 : i32, i32, i32
  }
  func.func @transform_1(%arg0: i32, %arg1: i32) -> (i32, i32) {
    %c0_i32 = arith.constant 0 : i32
    %c0_i32_0 = arith.constant 0 : i32
    return %arg1, %c0_i32 : i32, i32
  }
  func.func @transform_2(%arg0: i32, %arg1: i32) -> (i32, i32) {
    %c0_i32 = arith.constant 0 : i32
    %c0_i32_0 = arith.constant 0 : i32
    return %arg1, %c0_i32 : i32, i32
  }
  func.func @transform_3(%arg0: i32, %arg1: i32) -> (i32, i32) {
    %c0_i32 = arith.constant 0 : i32
    %c0_i32_0 = arith.constant 0 : i32
    return %arg1, %c0_i32 : i32, i32
  }
  func.func @transform_4(%arg0: i32, %arg1: i32) -> (i32, i32) {
    %c0_i32 = arith.constant 0 : i32
    %c0_i32_0 = arith.constant 0 : i32
    return %arg1, %c0_i32 : i32, i32
  }
  func.func @transform_5(%arg0: i32, %arg1: i32) -> (i32, i32) {
    %c0_i32 = arith.constant 0 : i32
    %c0_i32_0 = arith.constant 0 : i32
    %c0_i32_1 = arith.constant 0 : i32
    return %c0_i32, %c0_i32_0 : i32, i32
  }
  func.func @transform_6(%arg0: i32, %arg1: i32) -> (i32, i32, i32) {
    %c0_i32 = arith.constant 0 : i32
    %c0_i32_0 = arith.constant 0 : i32
    return %arg0, %arg1, %c0_i32 : i32, i32, i32
  }
  func.func @transform_7(%arg0: i32, %arg1: i32) -> (i32, i32, i32) {
    %c0_i32 = arith.constant 0 : i32
    %c0_i32_0 = arith.constant 0 : i32
    return %arg0, %arg1, %c0_i32 : i32, i32, i32
  }
}

module attributes {stable_mosaic.version = 11 : i64} {
  func.func @_se_proj_res_kernel(%arg0: i32, %arg1: i32, %arg2: memref<1x64x256xbf16, #tpu.memory_space<vmem>>, %arg3: memref<1x64x1xf32, #tpu.memory_space<vmem>>, %arg4: memref<16x64xf32, #tpu.memory_space<vmem>>, %arg5: memref<16x1xf32, #tpu.memory_space<vmem>>, %arg6: memref<64x16xf32, #tpu.memory_space<vmem>>, %arg7: memref<64x1xf32, #tpu.memory_space<vmem>>, %arg8: memref<32x64xbf16, #tpu.memory_space<vmem>>, %arg9: memref<32x1xf32, #tpu.memory_space<vmem>>, %arg10: memref<1x32x256xbf16, #tpu.memory_space<vmem>>, %arg11: memref<1x32x256xbf16, #tpu.memory_space<vmem>>) attributes {dimension_semantics = [#tpu.dimension_semantics<parallel>, #tpu.dimension_semantics<parallel>], iteration_bounds = array<i64: 2, 1>, scalar_prefetch = 0 : i64, scratch_operands = 0 : i64, tpu.core_type = #tpu.core_type<tc>, window_params = [{transform_indices = @transform_0, window_bounds = array<i64: 1, 64, 256>}, {transform_indices = @transform_1, window_bounds = array<i64: 1, 64, 1>}, {pipeline_mode = #tpu.pipeline_mode<synchronous>, transform_indices = @transform_2, window_bounds = array<i64: 16, 64>}, {pipeline_mode = #tpu.pipeline_mode<synchronous>, transform_indices = @transform_3, window_bounds = array<i64: 16, 1>}, {pipeline_mode = #tpu.pipeline_mode<synchronous>, transform_indices = @transform_4, window_bounds = array<i64: 64, 16>}, {pipeline_mode = #tpu.pipeline_mode<synchronous>, transform_indices = @transform_5, window_bounds = array<i64: 64, 1>}, {pipeline_mode = #tpu.pipeline_mode<synchronous>, transform_indices = @transform_6, window_bounds = array<i64: 32, 64>}, {pipeline_mode = #tpu.pipeline_mode<synchronous>, transform_indices = @transform_7, window_bounds = array<i64: 32, 1>}, {transform_indices = @transform_8, window_bounds = array<i64: 1, 32, 256>}, {transform_indices = @transform_9, window_bounds = array<i64: 1, 32, 256>}]} {
    %c0 = arith.constant 0 : index
    %c0_0 = arith.constant 0 : index
    %c0_1 = arith.constant 0 : index
    %0 = vector.load %arg3[%c0, %c0_0, %c0_1] : memref<1x64x1xf32, #tpu.memory_space<vmem>>, vector<1x64x1xf32>
    %1 = vector.shape_cast %0 : vector<1x64x1xf32> to vector<64x1xf32>
    %cst = arith.constant 3.906250e-03 : f32
    %2 = vector.broadcast %cst : f32 to vector<64x1xf32>
    %3 = arith.mulf %1, %2 : vector<64x1xf32>
    %c0_2 = arith.constant 0 : index
    %c0_3 = arith.constant 0 : index
    %4 = vector.load %arg4[%c0_2, %c0_3] : memref<16x64xf32, #tpu.memory_space<vmem>>, vector<16x64xf32>
    %cst_4 = arith.constant dense<0.000000e+00> : vector<16x1xf32>
    %5 = tpu.matmul %4, %3, %cst_4 {dimension_numbers = #tpu.dot_dimension_numbers<[1], [0], [0], [1], [0, 0, 1, 1], [], []>} : vector<16x64xf32>, vector<64x1xf32>, vector<16x1xf32> -> vector<16x1xf32>
    %c0_5 = arith.constant 0 : index
    %c0_6 = arith.constant 0 : index
    %6 = vector.load %arg5[%c0_5, %c0_6] : memref<16x1xf32, #tpu.memory_space<vmem>>, vector<16x1xf32>
    %7 = arith.addf %5, %6 : vector<16x1xf32>
    %cst_7 = arith.constant 0.000000e+00 : f32
    %8 = vector.broadcast %cst_7 : f32 to vector<16x1xf32>
    %9 = arith.subf %8, %7 : vector<16x1xf32>
    %10 = math.exp %9 : vector<16x1xf32>
    %cst_8 = arith.constant 1.000000e+00 : f32
    %11 = vector.broadcast %cst_8 : f32 to vector<16x1xf32>
    %12 = arith.addf %11, %10 : vector<16x1xf32>
    %13 = tpu.reciprocal %12 {approx = true} : vector<16x1xf32> -> vector<16x1xf32>
    %14 = arith.mulf %7, %13 : vector<16x1xf32>
    %c0_9 = arith.constant 0 : index
    %c0_10 = arith.constant 0 : index
    %15 = vector.load %arg6[%c0_9, %c0_10] : memref<64x16xf32, #tpu.memory_space<vmem>>, vector<64x16xf32>
    %cst_11 = arith.constant dense<0.000000e+00> : vector<64x1xf32>
    %16 = tpu.matmul %15, %14, %cst_11 {dimension_numbers = #tpu.dot_dimension_numbers<[1], [0], [0], [1], [0, 0, 1, 1], [], []>} : vector<64x16xf32>, vector<16x1xf32>, vector<64x1xf32> -> vector<64x1xf32>
    %c0_12 = arith.constant 0 : index
    %c0_13 = arith.constant 0 : index
    %17 = vector.load %arg7[%c0_12, %c0_13] : memref<64x1xf32, #tpu.memory_space<vmem>>, vector<64x1xf32>
    %18 = arith.addf %16, %17 : vector<64x1xf32>
    %cst_14 = arith.constant 0.000000e+00 : f32
    %19 = vector.broadcast %cst_14 : f32 to vector<64x1xf32>
    %20 = arith.subf %19, %18 : vector<64x1xf32>
    %21 = math.exp %20 : vector<64x1xf32>
    %cst_15 = arith.constant 1.000000e+00 : f32
    %22 = vector.broadcast %cst_15 : f32 to vector<64x1xf32>
    %23 = arith.addf %22, %21 : vector<64x1xf32>
    %24 = tpu.reciprocal %23 {approx = true} : vector<64x1xf32> -> vector<64x1xf32>
    %c0_16 = arith.constant 0 : index
    %c0_17 = arith.constant 0 : index
    %c0_18 = arith.constant 0 : index
    %25 = vector.load %arg2[%c0_16, %c0_17, %c0_18] : memref<1x64x256xbf16, #tpu.memory_space<vmem>>, vector<1x64x256xbf16>
    %26 = vector.shape_cast %25 : vector<1x64x256xbf16> to vector<64x256xbf16>
    %27 = arith.extf %26 : vector<64x256xbf16> to vector<64x256xf32>
    %28 = vector.broadcast %24 : vector<64x1xf32> to vector<64x256xf32>
    %29 = arith.mulf %27, %28 : vector<64x256xf32>
    %30 = arith.truncf %29 : vector<64x256xf32> to vector<64x256xbf16>
    %c0_19 = arith.constant 0 : index
    %c0_20 = arith.constant 0 : index
    %31 = vector.load %arg8[%c0_19, %c0_20] : memref<32x64xbf16, #tpu.memory_space<vmem>>, vector<32x64xbf16>
    %cst_21 = arith.constant dense<0.000000e+00> : vector<32x256xf32>
    %32 = tpu.matmul %31, %30, %cst_21 {dimension_numbers = #tpu.dot_dimension_numbers<[1], [0], [0], [1], [0, 0, 1, 1], [], []>} : vector<32x64xbf16>, vector<64x256xbf16>, vector<32x256xf32> -> vector<32x256xf32>
    %c0_22 = arith.constant 0 : index
    %c0_23 = arith.constant 0 : index
    %33 = vector.load %arg9[%c0_22, %c0_23] : memref<32x1xf32, #tpu.memory_space<vmem>>, vector<32x1xf32>
    %34 = vector.broadcast %33 : vector<32x1xf32> to vector<32x256xf32>
    %35 = arith.addf %32, %34 : vector<32x256xf32>
    %c0_24 = arith.constant 0 : index
    %c0_25 = arith.constant 0 : index
    %c0_26 = arith.constant 0 : index
    %36 = vector.load %arg10[%c0_24, %c0_25, %c0_26] : memref<1x32x256xbf16, #tpu.memory_space<vmem>>, vector<1x32x256xbf16>
    %37 = vector.shape_cast %36 : vector<1x32x256xbf16> to vector<32x256xbf16>
    %38 = arith.extf %37 : vector<32x256xbf16> to vector<32x256xf32>
    %39 = arith.addf %35, %38 : vector<32x256xf32>
    %40 = arith.truncf %39 : vector<32x256xf32> to vector<32x256xbf16>
    %c0_27 = arith.constant 0 : index
    %c0_28 = arith.constant 0 : index
    %c0_29 = arith.constant 0 : index
    %41 = vector.load %arg11[%c0_27, %c0_28, %c0_29] : memref<1x32x256xbf16, #tpu.memory_space<vmem>>, vector<1x32x256xbf16>
    %42 = vector.shape_cast %41 : vector<1x32x256xbf16> to vector<32x256xbf16>
    %43 = vector.shape_cast %40 : vector<32x256xbf16> to vector<1x32x256xbf16>
    tpu.vector_store %arg11[%c0_27, %c0_28, %c0_29], %43 {strides = array<i32>} : memref<1x32x256xbf16, #tpu.memory_space<vmem>>, vector<1x32x256xbf16>,
    return
  }
  func.func @transform_0(%arg0: i32, %arg1: i32) -> (i32, i32, i32) {
    %c0_i32 = arith.constant 0 : i32
    %c0_i32_0 = arith.constant 0 : i32
    return %arg0, %c0_i32, %arg1 : i32, i32, i32
  }
  func.func @transform_1(%arg0: i32, %arg1: i32) -> (i32, i32, i32) {
    %c0_i32 = arith.constant 0 : i32
    %c0_i32_0 = arith.constant 0 : i32
    %c0_i32_1 = arith.constant 0 : i32
    return %arg0, %c0_i32, %c0_i32_0 : i32, i32, i32
  }
  func.func @transform_2(%arg0: i32, %arg1: i32) -> (i32, i32) {
    %c0_i32 = arith.constant 0 : i32
    %c0_i32_0 = arith.constant 0 : i32
    %c0_i32_1 = arith.constant 0 : i32
    return %c0_i32, %c0_i32_0 : i32, i32
  }
  func.func @transform_3(%arg0: i32, %arg1: i32) -> (i32, i32) {
    %c0_i32 = arith.constant 0 : i32
    %c0_i32_0 = arith.constant 0 : i32
    %c0_i32_1 = arith.constant 0 : i32
    return %c0_i32, %c0_i32_0 : i32, i32
  }
  func.func @transform_4(%arg0: i32, %arg1: i32) -> (i32, i32) {
    %c0_i32 = arith.constant 0 : i32
    %c0_i32_0 = arith.constant 0 : i32
    %c0_i32_1 = arith.constant 0 : i32
    return %c0_i32, %c0_i32_0 : i32, i32
  }
  func.func @transform_5(%arg0: i32, %arg1: i32) -> (i32, i32) {
    %c0_i32 = arith.constant 0 : i32
    %c0_i32_0 = arith.constant 0 : i32
    %c0_i32_1 = arith.constant 0 : i32
    return %c0_i32, %c0_i32_0 : i32, i32
  }
  func.func @transform_6(%arg0: i32, %arg1: i32) -> (i32, i32) {
    %c0_i32 = arith.constant 0 : i32
    %c0_i32_0 = arith.constant 0 : i32
    %c0_i32_1 = arith.constant 0 : i32
    return %c0_i32, %c0_i32_0 : i32, i32
  }
  func.func @transform_7(%arg0: i32, %arg1: i32) -> (i32, i32) {
    %c0_i32 = arith.constant 0 : i32
    %c0_i32_0 = arith.constant 0 : i32
    %c0_i32_1 = arith.constant 0 : i32
    return %c0_i32, %c0_i32_0 : i32, i32
  }
  func.func @transform_8(%arg0: i32, %arg1: i32) -> (i32, i32, i32) {
    %c0_i32 = arith.constant 0 : i32
    %c0_i32_0 = arith.constant 0 : i32
    return %arg0, %c0_i32, %arg1 : i32, i32, i32
  }
  func.func @transform_9(%arg0: i32, %arg1: i32) -> (i32, i32, i32) {
    %c0_i32 = arith.constant 0 : i32
    %c0_i32_0 = arith.constant 0 : i32
    return %arg0, %c0_i32, %arg1 : i32, i32, i32
  }
}

module attributes {stable_mosaic.version = 11 : i64} {
  func.func @_head_gap_tail_kernel(%arg0: i32, %arg1: i32, %arg2: memref<1x32x256xbf16, #tpu.memory_space<vmem>>, %arg3: memref<1x256xf32, #tpu.memory_space<vmem>>, %arg4: memref<128x32xbf16, #tpu.memory_space<vmem>>, %arg5: memref<128x1xf32, #tpu.memory_space<vmem>>, %arg6: memref<11x128xf32, #tpu.memory_space<vmem>>, %arg7: memref<11x1xf32, #tpu.memory_space<vmem>>, %arg8: memref<64x11xf32, #tpu.memory_space<vmem>>, %arg9: memref<64x1xf32, #tpu.memory_space<vmem>>, %arg10: memref<11x64xf32, #tpu.memory_space<vmem>>, %arg11: memref<11x1xf32, #tpu.memory_space<vmem>>, %arg12: memref<1x11x1xf32, #tpu.memory_space<vmem>>, %arg13: memref<128x1xf32, #tpu.memory_space<vmem>>) attributes {dimension_semantics = [#tpu.dimension_semantics<parallel>, #tpu.dimension_semantics<arbitrary>], iteration_bounds = array<i64: 2, 1>, scalar_prefetch = 0 : i64, scratch_operands = 1 : i64, tpu.core_type = #tpu.core_type<tc>, window_params = [{transform_indices = @transform_0, window_bounds = array<i64: 1, 32, 256>}, {transform_indices = @transform_1, window_bounds = array<i64: 1, 256>}, {pipeline_mode = #tpu.pipeline_mode<synchronous>, transform_indices = @transform_2, window_bounds = array<i64: 128, 32>}, {pipeline_mode = #tpu.pipeline_mode<synchronous>, transform_indices = @transform_3, window_bounds = array<i64: 128, 1>}, {pipeline_mode = #tpu.pipeline_mode<synchronous>, transform_indices = @transform_4, window_bounds = array<i64: 11, 128>}, {pipeline_mode = #tpu.pipeline_mode<synchronous>, transform_indices = @transform_5, window_bounds = array<i64: 11, 1>}, {pipeline_mode = #tpu.pipeline_mode<synchronous>, transform_indices = @transform_6, window_bounds = array<i64: 64, 11>}, {pipeline_mode = #tpu.pipeline_mode<synchronous>, transform_indices = @transform_7, window_bounds = array<i64: 64, 1>}, {pipeline_mode = #tpu.pipeline_mode<synchronous>, transform_indices = @transform_8, window_bounds = array<i64: 11, 64>}, {pipeline_mode = #tpu.pipeline_mode<synchronous>, transform_indices = @transform_9, window_bounds = array<i64: 11, 1>}, {transform_indices = @transform_10, window_bounds = array<i64: 1, 11, 1>}]} {
    %c0_i32 = arith.constant 0 : i32
    %0 = arith.cmpi eq, %arg1, %c0_i32 : i32
    %1 = arith.extui %0 : i1 to i32
    %c0_i32_0 = arith.constant 0 : i32
    %2 = arith.cmpi ne, %1, %c0_i32_0 : i32
    scf.if %2 {
      %cst_18 = arith.constant 0.000000e+00 : f32
      %28 = vector.broadcast %cst_18 : f32 to vector<128x1xf32>
      %c0_19 = arith.constant 0 : index
      %c0_20 = arith.constant 0 : index
      %29 = vector.load %arg13[%c0_19, %c0_20] : memref<128x1xf32, #tpu.memory_space<vmem>>, vector<128x1xf32>
      tpu.vector_store %arg13[%c0_19, %c0_20], %28 {strides = array<i32>} : memref<128x1xf32, #tpu.memory_space<vmem>>, vector<128x1xf32>,
    } else {
    }
    %c0 = arith.constant 0 : index
    %c0_1 = arith.constant 0 : index
    %3 = vector.load %arg4[%c0, %c0_1] : memref<128x32xbf16, #tpu.memory_space<vmem>>, vector<128x32xbf16>
    %c0_2 = arith.constant 0 : index
    %c0_3 = arith.constant 0 : index
    %c0_4 = arith.constant 0 : index
    %4 = vector.load %arg2[%c0_2, %c0_3, %c0_4] : memref<1x32x256xbf16, #tpu.memory_space<vmem>>, vector<1x32x256xbf16>
    %5 = vector.shape_cast %4 : vector<1x32x256xbf16> to vector<32x256xbf16>
    %cst = arith.constant dense<0.000000e+00> : vector<128x256xf32>
    %6 = tpu.matmul %3, %5, %cst {dimension_numbers = #tpu.dot_dimension_numbers<[1], [0], [0], [1], [0, 0, 1, 1], [], []>} : vector<128x32xbf16>, vector<32x256xbf16>, vector<128x256xf32> -> vector<128x256xf32>
    %c0_5 = arith.constant 0 : index
    %c0_6 = arith.constant 0 : index
    %7 = vector.load %arg5[%c0_5, %c0_6] : memref<128x1xf32, #tpu.memory_space<vmem>>, vector<128x1xf32>
    %8 = vector.broadcast %7 : vector<128x1xf32> to vector<128x256xf32>
    %9 = arith.addf %6, %8 : vector<128x256xf32>
    %cst_7 = arith.constant 0.000000e+00 : f32
    %10 = vector.broadcast %cst_7 : f32 to vector<128x256xf32>
    %11 = arith.subf %10, %9 : vector<128x256xf32>
    %12 = math.exp %11 : vector<128x256xf32>
    %cst_8 = arith.constant 1.000000e+00 : f32
    %13 = vector.broadcast %cst_8 : f32 to vector<128x256xf32>
    %14 = arith.addf %13, %12 : vector<128x256xf32>
    %15 = tpu.reciprocal %14 {approx = true} : vector<128x256xf32> -> vector<128x256xf32>
    %16 = arith.mulf %9, %15 : vector<128x256xf32>
    %c0_9 = arith.constant 0 : index
    %c0_10 = arith.constant 0 : index
    %17 = vector.load %arg13[%c0_9, %c0_10] : memref<128x1xf32, #tpu.memory_space<vmem>>, vector<128x1xf32>
    %c0_11 = arith.constant 0 : index
    %c0_12 = arith.constant 0 : index
    %18 = vector.load %arg3[%c0_11, %c0_12] : memref<1x256xf32, #tpu.memory_space<vmem>>, vector<1x256xf32>
    %19 = vector.broadcast %18 : vector<1x256xf32> to vector<128x256xf32>
    %20 = arith.mulf %16, %19 : vector<128x256xf32>
    %cst_13 = arith.constant dense<0.000000e+00> : vector<128xf32>
    %21 = vector.multi_reduction <add>, %20, %cst_13 [1] : vector<128x256xf32> to vector<128xf32>
    %22 = vector.shape_cast %21 : vector<128xf32> to vector<128x1xf32>
    %23 = arith.addf %17, %22 : vector<128x1xf32>
    %c0_14 = arith.constant 0 : index
    %c0_15 = arith.constant 0 : index
    %24 = vector.load %arg13[%c0_14, %c0_15] : memref<128x1xf32, #tpu.memory_space<vmem>>, vector<128x1xf32>
    tpu.vector_store %arg13[%c0_14, %c0_15], %23 {strides = array<i32>} : memref<128x1xf32, #tpu.memory_space<vmem>>, vector<128x1xf32>,
    %c0_i32_16 = arith.constant 0 : i32
    %25 = arith.cmpi eq, %arg1, %c0_i32_16 : i32
    %26 = arith.extui %25 : i1 to i32
    %c0_i32_17 = arith.constant 0 : i32
    %27 = arith.cmpi ne, %26, %c0_i32_17 : i32
    scf.if %27 {
      %c0_18 = arith.constant 0 : index
      %c0_19 = arith.constant 0 : index
      %28 = vector.load %arg13[%c0_18, %c0_19] : memref<128x1xf32, #tpu.memory_space<vmem>>, vector<128x1xf32>
      %cst_20 = arith.constant 3.906250e-03 : f32
      %29 = vector.broadcast %cst_20 : f32 to vector<128x1xf32>
      %30 = arith.mulf %28, %29 : vector<128x1xf32>
      %c0_21 = arith.constant 0 : index
      %c0_22 = arith.constant 0 : index
      %31 = vector.load %arg6[%c0_21, %c0_22] : memref<11x128xf32, #tpu.memory_space<vmem>>, vector<11x128xf32>
      %cst_23 = arith.constant dense<0.000000e+00> : vector<11x1xf32>
      %32 = tpu.matmul %31, %30, %cst_23 {dimension_numbers = #tpu.dot_dimension_numbers<[1], [0], [0], [1], [0, 0, 1, 1], [], []>} : vector<11x128xf32>, vector<128x1xf32>, vector<11x1xf32> -> vector<11x1xf32>
      %c0_24 = arith.constant 0 : index
      %c0_25 = arith.constant 0 : index
      %33 = vector.load %arg7[%c0_24, %c0_25] : memref<11x1xf32, #tpu.memory_space<vmem>>, vector<11x1xf32>
      %34 = arith.addf %32, %33 : vector<11x1xf32>
      %c0_26 = arith.constant 0 : index
      %c0_27 = arith.constant 0 : index
      %35 = vector.load %arg8[%c0_26, %c0_27] : memref<64x11xf32, #tpu.memory_space<vmem>>, vector<64x11xf32>
      %cst_28 = arith.constant dense<0.000000e+00> : vector<64x1xf32>
      %36 = tpu.matmul %35, %34, %cst_28 {dimension_numbers = #tpu.dot_dimension_numbers<[1], [0], [0], [1], [0, 0, 1, 1], [], []>} : vector<64x11xf32>, vector<11x1xf32>, vector<64x1xf32> -> vector<64x1xf32>
      %c0_29 = arith.constant 0 : index
      %c0_30 = arith.constant 0 : index
      %37 = vector.load %arg9[%c0_29, %c0_30] : memref<64x1xf32, #tpu.memory_space<vmem>>, vector<64x1xf32>
      %38 = arith.addf %36, %37 : vector<64x1xf32>
      %cst_31 = arith.constant 0.000000e+00 : f32
      %39 = vector.broadcast %cst_31 : f32 to vector<64x1xf32>
      %40 = arith.maximumf %38, %39 : vector<64x1xf32>
      %c0_32 = arith.constant 0 : index
      %c0_33 = arith.constant 0 : index
      %41 = vector.load %arg10[%c0_32, %c0_33] : memref<11x64xf32, #tpu.memory_space<vmem>>, vector<11x64xf32>
      %cst_34 = arith.constant dense<0.000000e+00> : vector<11x1xf32>
      %42 = tpu.matmul %41, %40, %cst_34 {dimension_numbers = #tpu.dot_dimension_numbers<[1], [0], [0], [1], [0, 0, 1, 1], [], []>} : vector<11x64xf32>, vector<64x1xf32>, vector<11x1xf32> -> vector<11x1xf32>
      %c0_35 = arith.constant 0 : index
      %c0_36 = arith.constant 0 : index
      %43 = vector.load %arg11[%c0_35, %c0_36] : memref<11x1xf32, #tpu.memory_space<vmem>>, vector<11x1xf32>
      %44 = arith.addf %42, %43 : vector<11x1xf32>
      %cst_37 = arith.constant dense<0xFF800000> : vector<1xf32>
      %45 = vector.multi_reduction <maximumf>, %44, %cst_37 [0] : vector<11x1xf32> to vector<1xf32>
      %46 = vector.shape_cast %45 : vector<1xf32> to vector<1x1xf32>
      %47 = vector.broadcast %46 : vector<1x1xf32> to vector<11x1xf32>
      %48 = arith.subf %44, %47 : vector<11x1xf32>
      %49 = math.exp %48 : vector<11x1xf32>
      %cst_38 = arith.constant dense<0.000000e+00> : vector<1xf32>
      %50 = vector.multi_reduction <add>, %49, %cst_38 [0] : vector<11x1xf32> to vector<1xf32>
      %51 = vector.shape_cast %50 : vector<1xf32> to vector<1x1xf32>
      %52 = vector.broadcast %51 : vector<1x1xf32> to vector<11x1xf32>
      %53 = arith.divf %49, %52 : vector<11x1xf32>
      %c0_39 = arith.constant 0 : index
      %c0_40 = arith.constant 0 : index
      %c0_41 = arith.constant 0 : index
      %54 = vector.load %arg12[%c0_39, %c0_40, %c0_41] : memref<1x11x1xf32, #tpu.memory_space<vmem>>, vector<1x11x1xf32>
      %55 = vector.shape_cast %54 : vector<1x11x1xf32> to vector<11x1xf32>
      %56 = vector.shape_cast %53 : vector<11x1xf32> to vector<1x11x1xf32>
      tpu.vector_store %arg12[%c0_39, %c0_40, %c0_41], %56 {strides = array<i32>} : memref<1x11x1xf32, #tpu.memory_space<vmem>>, vector<1x11x1xf32>,
    } else {
    }
    return
  }
  func.func @transform_0(%arg0: i32, %arg1: i32) -> (i32, i32, i32) {
    %c0_i32 = arith.constant 0 : i32
    %c0_i32_0 = arith.constant 0 : i32
    return %arg0, %c0_i32, %arg1 : i32, i32, i32
  }
  func.func @transform_1(%arg0: i32, %arg1: i32) -> (i32, i32) {
    %c0_i32 = arith.constant 0 : i32
    %c0_i32_0 = arith.constant 0 : i32
    return %c0_i32, %arg1 : i32, i32
  }
  func.func @transform_2(%arg0: i32, %arg1: i32) -> (i32, i32) {
    %c0_i32 = arith.constant 0 : i32
    %c0_i32_0 = arith.constant 0 : i32
    %c0_i32_1 = arith.constant 0 : i32
    return %c0_i32, %c0_i32_0 : i32, i32
  }
  func.func @transform_3(%arg0: i32, %arg1: i32) -> (i32, i32) {
    %c0_i32 = arith.constant 0 : i32
    %c0_i32_0 = arith.constant 0 : i32
    %c0_i32_1 = arith.constant 0 : i32
    return %c0_i32, %c0_i32_0 : i32, i32
  }
  func.func @transform_4(%arg0: i32, %arg1: i32) -> (i32, i32) {
    %c0_i32 = arith.constant 0 : i32
    %c0_i32_0 = arith.constant 0 : i32
    %c0_i32_1 = arith.constant 0 : i32
    return %c0_i32, %c0_i32_0 : i32, i32
  }
  func.func @transform_5(%arg0: i32, %arg1: i32) -> (i32, i32) {
    %c0_i32 = arith.constant 0 : i32
    %c0_i32_0 = arith.constant 0 : i32
    %c0_i32_1 = arith.constant 0 : i32
    return %c0_i32, %c0_i32_0 : i32, i32
  }
  func.func @transform_6(%arg0: i32, %arg1: i32) -> (i32, i32) {
    %c0_i32 = arith.constant 0 : i32
    %c0_i32_0 = arith.constant 0 : i32
    %c0_i32_1 = arith.constant 0 : i32
    return %c0_i32, %c0_i32_0 : i32, i32
  }
  func.func @transform_7(%arg0: i32, %arg1: i32) -> (i32, i32) {
    %c0_i32 = arith.constant 0 : i32
    %c0_i32_0 = arith.constant 0 : i32
    %c0_i32_1 = arith.constant 0 : i32
    return %c0_i32, %c0_i32_0 : i32, i32
  }
  func.func @transform_8(%arg0: i32, %arg1: i32) -> (i32, i32) {
    %c0_i32 = arith.constant 0 : i32
    %c0_i32_0 = arith.constant 0 : i32
    %c0_i32_1 = arith.constant 0 : i32
    return %c0_i32, %c0_i32_0 : i32, i32
  }
  func.func @transform_9(%arg0: i32, %arg1: i32) -> (i32, i32) {
    %c0_i32 = arith.constant 0 : i32
    %c0_i32_0 = arith.constant 0 : i32
    %c0_i32_1 = arith.constant 0 : i32
    return %c0_i32, %c0_i32_0 : i32, i32
  }
  func.func @transform_10(%arg0: i32, %arg1: i32) -> (i32, i32, i32) {
    %c0_i32 = arith.constant 0 : i32
    %c0_i32_0 = arith.constant 0 : i32
    %c0_i32_1 = arith.constant 0 : i32
    return %arg0, %c0_i32, %c0_i32_0 : i32, i32, i32
  }
}

</mosaic_0001>

<bundles_post_ra>
// kernel: custom_efficientnet_forward.4
= control target key start
LH: loop header
LB: loop body
LE: loop exit
PB: predicated region body
PF: predicated region fallthrough
CT: control target
= control target key end

     0   :  { %s626_s12 = smov 0   ;;  %s628_s13 = smov 0   ;;  %s684_s0 = inlined_call_operand.vmem [shape: bf16[2,27,256], index: 0, kind: input, shape index: {}]   ;;  %s685_s1 = inlined_call_operand.vmem [shape: bf16[32,27], index: 1, kind: input, shape index: {}]   ;;  %s686_s2 = inlined_call_operand.vmem [shape: f32[32,1], index: 2, kind: input, shape index: {}]   ;;  %s687_s3 = inlined_call_operand.vmem [shape: bf16[2,32,256], index: 3, kind: output, shape index: {}]  }
   0x1   :  { %s630_s14 = smov 0  }
   0x2 LB: > { %s25_s15 = sadd.s32 1, %s598_s13  ;;  %p473_p0 = scmp.ge.s32.totalorder %s602_s14, 1  ;;  %s602_s14 = sphi %s630_s14, %s13_s14   ;;  %s598_s13 = sphi %s628_s13, %s689_s13   ;;  %s594_s12 = sphi %s626_s12, %s688_s12  }
   0x3   : > { %p27_p1 = scmp.ge.s32.totalorder %s25_s15, 2  ;;  %p158_p2 = scmp.lt.s32.totalorder %s602_s14, 3 }
   0x5   : > { %s691_s15 = smov (%p27_p1, %s25_s15), 0  ;;  %p159_p3 = pnand %p473_p0, %p158_p2 }
   0x6   : > { %p191_p4 = scmp.lt.s32.totalorder (!%p159_p3), %s594_s12, 1 }
   0x7   : > { %162 = sbr.rel (%p159_p3) target bundleno = 198 (0xc6), region = 32 }
   0xc   : > { %vm278_vm0 = vcmask 1044480   ;;  %v221_v0 = vld [vmem:[%s686_s2 + $0x10] sm:$0xff]  ;;  %v219_v1 = vld [vmem:[%s686_s2] sm:$0xff]  ;;  %s693_s12 = smov (!%p191_p4, %s594_s12), 1  ;;  %vm279_vm1 = vcmask 1045504   ;;  %v604_v2 = vmov 65535  }
   0xd   : > { %v280_v3 = vsel %vm278_vm0, 4294967295, %v604_v2  ;;  %v605_v4 = vmov 0   ;;  %s508_s20 = sshll.u32 %s693_s12, 5  ;;  %v222_v18 = vld [vmem:[%s686_s2 + $0x18] sm:$0xff]  ;;  %v220_v19 = vld [vmem:[%s686_s2 + $0x8] sm:$0xff]  ;;  %v510_v22 = vld [vmem:[%s685_s1] sm:$0xff] }
   0xe   : > { %547 = vset.pattern.permute.xlu1 %v605_v4  ;;  %546 = vset.pattern.permute.xlu0 %v605_v4  ;;  %s198_s23 = scalar_lea.vmem %s684_s0, %s508_s20  ;;  %v281_v5 = vsel %vm279_vm1, %v280_v3, 0  ;;  %v511_v23 = vld [vmem:[%s685_s1 + $0x8] sm:$0xff]  ;;  %vm271_vm2 = vcmask 220160   ;;  %s208_s7 = scalar_lea.vmem %s687_s3, %s508_s20 }
   0xf   : > { %235 = vperm.xlu1 %547, %v221_v0   ;;  %225 = vperm.xlu0 %546, %v219_v1   ;;  %v496_v6 = vld [vmem:[%s198_s23 + $0x10] sm:$0xf]  ;;  %v515_v7 = vld [vmem:[%s198_s23 + $0x14] sm:$0x30]  ;;  %v514_v8 = vld [vmem:[%s198_s23 + $0x14] sm:$0xf] }
  0x10   : > { %v497_v9 = vor.u32 %v515_v7, %v496_v6  ;;  %v498_v10 = vld [vmem:[%s198_s23 + $0x18] sm:$0x30]  ;;  %v488_v12 = vld [vmem:[%s198_s23] sm:$0xf]  ;;  %v513_v13 = vld [vmem:[%s198_s23 + $0x4] sm:$0xf0] }
  0x11   : > { %v501_v11 = vor.u32 %v514_v8, %v498_v10  ;;  %v512_v15 = vld [vmem:[%s198_s23 + $0x4] sm:$0xf]  ;;  %v490_v16 = vld [vmem:[%s198_s23 + $0x8] sm:$0xf0]  ;;  %v489_v20 = vor.u32 %v513_v13, %v488_v12 }
  0x12   : > { %v283_v14 = vand.u32 %v497_v9, %v281_v5  ;;  %v493_v21 = vor.u32 %v512_v15, %v490_v16 }
  0x13   : > { %v286_v17 = vand.u32 %v501_v11, %v281_v5 }
  0x14   : > { %294 = vmatpush.bf16.msra.mxu0 %v283_v14  ;;  %516 = vmatpush.bf16.msra.mxu2 %v283_v14 }
  0x15   : > { %313 = vmatpush.bf16.msra.mxu1 %v286_v17  ;;  %518 = vmatpush.bf16.msra.mxu3 %v286_v17 }
  0x17   : > { %240 = vperm.xlu1 %547, %v222_v18   ;;  %230 = vperm.xlu0 %546, %v220_v19  }
  0x18   : > { %295 = vmatpush.bf16.msra.mxu0 %v489_v20  ;;  %517 = vmatpush.bf16.msra.mxu2 %v489_v20 }
  0x19   : > { %314 = vmatpush.bf16.msra.mxu1 %v493_v21  ;;  %519 = vmatpush.bf16.msra.mxu3 %v493_v21 }
  0x1b   : > { %502 = vmatmul.msk.bf16.vlgmr.msra.gmra.mxu0 %vm271_vm2, %v510_v22  ;;  %503 = vmatmul.msk.bf16.vlgmr.msra.gmra.mxu2 %vm271_vm2, %v511_v23 }
  0x1c   : > { %504 = vmatmul.msk.bf16.vlgmr.msra.gmra.mxu1 %vm271_vm2, %v510_v22  ;;  %505 = vmatmul.msk.bf16.vlgmr.msra.gmra.mxu3 %vm271_vm2, %v511_v23 }
  0x81   : > { %v226_v24 = vpop.permute.xlu0 %225  ;;  %v236_v30 = vpop.permute.xlu1 %235 }
  0x89   : > { %v231_v37 = vpop.permute.xlu0 %230  ;;  %v241_v53 = vpop.permute.xlu1 %240 }
  0x98   : > { %v297_v25 = vpop.f32.mrf.mxu0 }
  0x99   : > { %v298_v26 = vadd.f32 %v297_v25, %v226_v24  ;;  %v316_v27 = vpop.f32.mrf.mxu1 }
  0x9a   : > { %v317_v28 = vadd.f32 %v316_v27, %v226_v24 }
  0x9b   : > { %v326_v29 = vsub.f32 0.0, %v298_v26 }
  0x9c   : > { %v327_v31 = vsub.f32 0.0, %v317_v28 }
  0x9d   : > { %v334_v32 = vmul.f32 1.442695, %v326_v29 }
  0x9e   : > { %v336_v33 = vmul.f32 1.442695, %v327_v31  ;;  %v302_v34 = vpop.f32.mrf.mxu2 }
  0x9f   : > { %548 = vpow2.f32 %v334_v32  ;;  %v303_v35 = vadd.f32 %v302_v34, %v236_v30  ;;  %v321_v36 = vpop.f32.mrf.mxu3 }
  0xa0   : > { %550 = vpow2.f32 %v336_v33  ;;  %v322_v38 = vadd.f32 %v321_v36, %v236_v30  ;;  %v299_v39 = vpop.f32.mrf.mxu0 }
  0xa1   : > { %v330_v40 = vsub.f32 0.0, %v303_v35  ;;  %v300_v41 = vadd.f32 %v299_v39, %v231_v37  ;;  %v318_v42 = vpop.f32.mrf.mxu1 }
  0xa2   : > { %v331_v43 = vsub.f32 0.0, %v322_v38  ;;  %v319_v44 = vadd.f32 %v318_v42, %v231_v37 }
  0xa3   : > { %v342_v45 = vmul.f32 1.442695, %v330_v40  ;;  %v328_v46 = vsub.f32 0.0, %v300_v41 }
  0xa4   : > { %v344_v47 = vmul.f32 1.442695, %v331_v43  ;;  %v329_v48 = vsub.f32 0.0, %v319_v44 }
  0xa5   : > { %v549_v49 = vpop.eup %548  ;;  %552 = vpow2.f32 %v342_v45  ;;  %v338_v50 = vmul.f32 1.442695, %v328_v46 }
  0xa6   : > { %v551_v51 = vpop.eup %550  ;;  %v350_v52 = vadd.f32 1.0, %v549_v49  ;;  %554 = vpow2.f32 %v344_v47  ;;  %v340_v54 = vmul.f32 1.442695, %v329_v48  ;;  %v304_v55 = vpop.f32.mrf.mxu2 }
  0xa7   : > { %v351_v56 = vadd.f32 1.0, %v551_v51  ;;  %556 = vpow2.f32 %v338_v50  ;;  %v305_v57 = vadd.f32 %v304_v55, %v241_v53  ;;  %v323_v58 = vpop.f32.mrf.mxu3 }
  0xa8   : > { %558 = vrcp.f32 %v350_v52  ;;  %v324_v59 = vadd.f32 %v323_v58, %v241_v53 }
  0xa9   : > { %560 = vrcp.f32 %v351_v56  ;;  %v332_v60 = vsub.f32 0.0, %v305_v57 }
  0xaa   : > { %562 = vpow2.f32 %v340_v54  ;;  %v333_v61 = vsub.f32 0.0, %v324_v59 }
  0xab   : > { %v553_v62 = vpop.eup %552  ;;  %v346_v63 = vmul.f32 1.442695, %v332_v60 }
  0xac   : > { %v555_v0 = vpop.eup %554  ;;  %v354_v1 = vadd.f32 1.0, %v553_v62  ;;  %v348_v4 = vmul.f32 1.442695, %v333_v61 }
  0xad   : > { %v557_v2 = vpop.eup %556  ;;  %v355_v3 = vadd.f32 1.0, %v555_v0  ;;  %564 = vpow2.f32 %v346_v63 }
  0xae   : > { %v559_v5 = vpop.eup %558  ;;  %566 = vrcp.f32 %v354_v1  ;;  %v352_v6 = vadd.f32 1.0, %v557_v2 }
  0xaf   : > { %v561_v7 = vpop.eup %560  ;;  %v366_v8 = vmul.f32 %v559_v5, %v298_v26  ;;  %568 = vrcp.f32 %v355_v3 }
  0xb0   : > { %v563_v9 = vpop.eup %562  ;;  %v367_v10 = vmul.f32 %v561_v7, %v317_v28  ;;  %570 = vrcp.f32 %v352_v6 }
  0xb1   : > { %v353_v11 = vadd.f32 1.0, %v563_v9  ;;  %572 = vpow2.f32 %v348_v4 }
  0xb2   : > { %v374_v12 = vpack.c.bf16 %v367_v10, %v366_v8 }
  0xb3   : > { %v565_v13 = vpop.eup %564  ;;  %574 = vrcp.f32 %v353_v11 }
  0xb4   : > { %v567_v14 = vpop.eup %566  ;;  %378 = vst [vmem:[%s208_s7] sm:$0xff] %v374_v12  ;;  %v356_v15 = vadd.f32 1.0, %v565_v13 }
  0xb5   : > { %v569_v16 = vpop.eup %568  ;;  %v370_v17 = vmul.f32 %v567_v14, %v303_v35 }
  0xb6   : > { %v571_v18 = vpop.eup %570  ;;  %v371_v19 = vmul.f32 %v569_v16, %v322_v38  ;;  %576 = vrcp.f32 %v356_v15 }
  0xb7   : > { %v573_v20 = vpop.eup %572  ;;  %v368_v22 = vmul.f32 %v571_v18, %v300_v41 }
  0xb8   : > { %v376_v21 = vpack.c.bf16 %v371_v19, %v370_v17  ;;  %v357_v23 = vadd.f32 1.0, %v573_v20 }
  0xb9   : > { %v575_v24 = vpop.eup %574 }
  0xba   : > { %380 = vst [vmem:[%s208_s7 + $0x10] sm:$0xff] %v376_v21  ;;  %v369_v25 = vmul.f32 %v575_v24, %v319_v44  ;;  %578 = vrcp.f32 %v357_v23 }
  0xbc   : > { %v577_v26 = vpop.eup %576  ;;  %v375_v27 = vpack.c.bf16 %v369_v25, %v368_v22 }
  0xbd   : > { %v372_v28 = vmul.f32 %v577_v26, %v305_v57 }
  0xbe   : > { %379 = vst [vmem:[%s208_s7 + $0x8] sm:$0xff] %v375_v27 }
  0xc0   : > { %v579_v29 = vpop.eup %578 }
  0xc1   : > { %v373_v30 = vmul.f32 %v579_v29, %v324_v59 }
  0xc3   : > { %v377_v31 = vpack.c.bf16 %v373_v30, %v372_v28 }
  0xc5   : > { %381 = vst [vmem:[%s208_s7 + $0x18] sm:$0xff] %v377_v31 }
  0xc6 PF: > { %s13_s14 = sadd.s32 1, %s602_s14   ;;  %s688_s12 = smov %s598_s13 }
  0xc7   : > { %p10_p5 = scmp.ge.s32.totalorder %s13_s14, 4   ;;  %s689_s13 = smov %s691_s15 }
  0xc9   :  { %12 = sbr.rel (!%p10_p5) target bundleno = 2 (0x2), region = 62 }

// kernel: custom_efficientnet_forward.5
= control target key start
LH: loop header
LB: loop body
LE: loop exit
PB: predicated region body
PF: predicated region fallthrough
CT: control target
= control target key end

     0   :  { %s1334_s24 = smov 0   ;;  %s1336_s25 = smov 0   ;;  %s1731_s0 = inlined_call_operand.vmem [shape: bf16[2,32,256], index: 0, kind: input, shape index: {}]   ;;  %s1732_s1 = inlined_call_operand.vmem [shape: bf16[64,32], index: 1, kind: input, shape index: {}]   ;;  %s1733_s2 = inlined_call_operand.vmem [shape: f32[64,1], index: 2, kind: input, shape index: {}]   ;;  %s1734_s3 = inlined_call_operand.vmem [shape: f32[64,9], index: 3, kind: input, shape index: {}]   ;;  %s1735_s4 = inlined_call_operand.vmem [shape: f32[64,1], index: 4, kind: input, shape index: {}]   ;;  %s1736_s5 = inlined_call_operand.vmem [shape: f32[9,256], index: 5, kind: input, shape index: {}]   ;;  %s1737_s6 = inlined_call_operand.vmem [shape: bf16[2,64,256], index: 6, kind: output, shape index: {0}]   ;;  %s1738_s7 = inlined_call_operand.vmem [shape: f32[2,64,1], index: 7, kind: output, shape index: {1}]  }
   0x1   :  { %s1338_s26 = smov 0   ;;  %s1340_s27 = smov 0  }
   0x2   :  { %s1342_s28 = smov 0  }
   0x3 LB: > { %s27_s29 = sadd.s32 1, %s1267_s26  ;;  %s30_s30 = sadd.s32 1, %s1271_s27  ;;  %s1275_s28 = sphi %s1342_s28, %s18_s28   ;;  %s1271_s27 = sphi %s1340_s27, %s1742_s27   ;;  %s1267_s26 = sphi %s1338_s26, %s1741_s26   ;;  %s1263_s25 = sphi %s1336_s25, %s1740_s25   ;;  %s1259_s24 = sphi %s1334_s24, %s1739_s24  }
   0x4   : > { %p28_p0 = scmp.ge.s32.totalorder %s27_s29, 4  ;;  %p1077_p1 = scmp.ge.s32.totalorder %s1275_s28, 1 }
   0x5   : > { %p300_p2 = scmp.lt.s32.totalorder %s1275_s28, 9 }
   0x6   : > { %s1744_s29 = smov (%p28_p0, %s27_s29), 0  ;;  %s1746_s30 = smov (!%p28_p0, %s30_s30), %s1271_s27 }
   0x7   : > { %p301_p3 = pnand %p1077_p1, %p300_p2  ;;  %p32_p4 = scmp.ge.s32.totalorder %s1746_s30, 2 }
   0x8   : > { %p366_p5 = scmp.lt.s32.totalorder (!%p301_p3), %s1263_s25, 1  ;;  %s1080_s8 = sshll.u32 (!%p301_p3), %s1259_s24, 1 }
   0x9   : > { %s1748_s30 = smov (%p32_p4, %s1746_s30), 0  ;;  %304 = sbr.rel (%p301_p3) target bundleno = 537 (0x219), region = 44 }
   0xa   : > { %p372_p6 = scmp.lt.s32.totalorder (!%p301_p3), %s1080_s8, 7  ;;  %s1286_s14 = smov (!%p301_p3), 17  }
   0xb   : > { %s1287_s15 = smov (!%p301_p3), 113   ;;  %s1289_s17 = smov (!%p301_p3), 15  }
   0xc   : > { %s1291_s18 = smov (!%p301_p3), 112  }
   0xe   : > { %v1277_v0 = vmov 0   ;;  %s1750_s25 = smov (!%p366_p5, %s1263_s25), 1  ;;  %v1278_v1 = vmov 2   ;;  %s1752_s8 = smov (!%p372_p6, %s1080_s8), 7  ;;  %vm460_vm0 = vcmask 261120   ;;  %v1279_v18 = vmov 1  }
   0xf   : > { %1182 = vset.pattern.permute.xlu0 %v1277_v0  ;;  %1183 = vset.pattern.permute.xlu1 %v1277_v0  ;;  %s1119_s9 = sshll.u32 %s1750_s25, 5  ;;  %s1375_s13 = sshll.u32 %s1752_s8, 3  ;;  %v1280_v19 = vmov 3   ;;  %v1281_v21 = vmov 4   ;;  %v1282_v22 = vmov 6   ;;  %v1283_v23 = vmov 5  }
  0x10   : > { %1187 = vset.pattern.permute.xlu2 %v1278_v1  ;;  %s370_s12 = scalar_lea.vmem %s1731_s0, %s1119_s9  ;;  %s381_s16 = scalar_lea.vmem %s1733_s2, %s1375_s13  ;;  %v1284_v25 = vmov 7   ;;  %v1419_v48 = vld [vmem:[%s1736_s5] sm:$0xff]  ;;  %v1424_v49 = vld [vmem:[%s1736_s5 + $0x8] sm:$0xff]  ;;  %vm882_vm9 = vcmask 7168  }
  0x11   : > { %v1109_v2 = vld [vmem:[%s370_s12 + $0x10] sm:$0xf]  ;;  %v1124_v3 = vld [vmem:[%s370_s12 + $0x14] sm:$0xf0]  ;;  %v1123_v4 = vld [vmem:[%s370_s12 + $0x14] sm:$0xf]  ;;  %s1385_s19 = scalar_lea.vmem %s1734_s3, %s1375_s13 }
  0x12   : > { %v1110_v5 = vor.u32 %v1124_v3, %v1109_v2  ;;  %v1111_v6 = vld [vmem:[%s370_s12 + $0x18] sm:$0xf0]  ;;  %v423_v7 = vld [vmem:[%s381_s16] sm:$0xff]  ;;  %s1081_s20 = sshll.u32 %s1752_s8, 2  ;;  %v1389_v9 = vld [vmem:[%s1385_s19 + $0x8] sm:$0xff]  ;;  %v1427_v52 = vperm.slane %v1419_v48, 4 }
  0x13   : > { %v1114_v8 = vor.u32 %v1123_v4, %v1111_v6  ;;  %427 = vperm.xlu0 %1182, %v423_v7   ;;  %v1101_v10 = vld [vmem:[%s370_s12] sm:$0xf]  ;;  %v1122_v11 = vld [vmem:[%s370_s12 + $0x4] sm:$0xf0]  ;;  %v1121_v13 = vld [vmem:[%s370_s12 + $0x4] sm:$0xf]  ;;  %s375_s23 = scalar_lea.vmem %s1732_s1, %s1081_s20  ;;  %550 = vperm.xlu1 %1183, %v1389_v9  }
  0x14   : > { %470 = vmatpush.bf16.msra.mxu0 %v1110_v5  ;;  %v1102_v12 = vor.u32 %v1122_v11, %v1101_v10  ;;  %v1103_v14 = vld [vmem:[%s370_s12 + $0x8] sm:$0xf0]  ;;  %620 = vperm.xlu2 %1187, %v1389_v9   ;;  %v1120_v16 = vld [vmem:[%s375_s23] sm:$0xff]  ;;  %v1430_v54 = vperm.slane %v1424_v49, 4  ;;  %s1285_s12 = smov 1   ;;  %v1290_v5 = vmov 8   ;;  %s393_s23 = scalar_lea.vmem %s1735_s4, %s1375_s13 }
  0x15   : > { %484 = vmatpush.bf16.msra.mxu1 %v1114_v8  ;;  %v1106_v15 = vor.u32 %v1121_v13, %v1103_v14  ;;  %v424_v17 = vld [vmem:[%s381_s16 + $0x8] sm:$0xff]  ;;  %v1399_v20 = vld [vmem:[%s1385_s19] sm:$0xff]  ;;  %s1288_s16 = smov 16   ;;  %s1292_s19 = smov 127  }
  0x16   : > { %s1293_s20 = smov 111   ;;  %s1089_s11 = sshll.u32 %s1752_s8, 1 }
  0x18   : > { %471 = vmatpush.bf16.msra.mxu0 %v1102_v12 }
  0x19   : > { %485 = vmatpush.bf16.msra.mxu1 %v1106_v15 }
  0x1b   : > { %1115 = vmatmul.msk.bf16.vlgmr.msra.gmra.mxu0 %vm460_vm0, %v1120_v16  ;;  %432 = vperm.xlu0 %1182, %v424_v17  }
  0x1c   : > { %1116 = vmatmul.msk.bf16.vlgmr.msra.gmra.mxu1 %vm460_vm0, %v1120_v16  ;;  %1185 = vset.pattern.permute.xlu1 %v1279_v18 }
  0x1d   : > { %585 = vperm.xlu1 %1185, %v1389_v9   ;;  %1189 = vset.pattern.permute.xlu2 %v1280_v19 }
  0x1e   : > { %655 = vperm.xlu2 %1189, %v1389_v9  }
  0x23   : > { %545 = vperm.xlu0 %1182, %v1399_v20  }
  0x25   : > { %1186 = vset.pattern.permute.xlu1 %v1278_v1 }
  0x26   : > { %616 = vperm.xlu1 %1186, %v1399_v20   ;;  %1192 = vset.pattern.permute.xlu2 %v1283_v23 }
  0x27   : > { %708 = vperm.xlu2 %1192, %v1399_v20  }
  0x2b   : > { %1184 = vset.pattern.permute.xlu0 %v1279_v18 }
  0x2c   : > { %581 = vperm.xlu0 %1184, %v1399_v20  }
  0x2e   : > { %1188 = vset.pattern.permute.xlu1 %v1280_v19  ;;  %v829_v19 = vld [vmem:[%s393_s23 + $0x8] sm:$0xff] }
  0x2f   : > { %651 = vperm.xlu1 %1188, %v1399_v20   ;;  %1197 = vset.pattern.permute.xlu2 %v1284_v25 }
  0x34   : > { %1190 = vset.pattern.permute.xlu0 %v1281_v21 }
  0x35   : > { %673 = vperm.xlu0 %1190, %v1399_v20  }
  0x37   : > { %1191 = vset.pattern.permute.xlu1 %v1281_v21 }
  0x38   : > { %677 = vperm.xlu1 %1191, %v1389_v9  }
  0x3d   : > { %1193 = vset.pattern.permute.xlu0 %v1283_v23  ;;  %v530_v23 = vlaneseq }
  0x3e   : > { %712 = vperm.xlu0 %1193, %v1389_v9  }
  0x40   : > { %1195 = vset.pattern.permute.xlu1 %v1282_v22 }
  0x41   : > { %747 = vperm.xlu1 %1195, %v1389_v9  }
  0x46   : > { %1194 = vset.pattern.permute.xlu0 %v1282_v22 }
  0x47   : > { %743 = vperm.xlu0 %1194, %v1399_v20  }
  0x49   : > { %1196 = vset.pattern.permute.xlu1 %v1284_v25  ;;  %v1508_v25 = vand.u32 127, %v530_v23 }
  0x4a   : > { %778 = vperm.xlu1 %1196, %v1399_v20  }
  0x4b   : > { %vm532_vm1 = vcmp.lt.s32.totalorder %v1508_v25, 17  ;;  %vm604_vm2 = vcmp.lt.s32.totalorder %v1508_v25, 15  ;;  %vm569_vm3 = vcmp.lt.s32.totalorder %v1508_v25, 16  ;;  %vm639_vm4 = vcmp.lt.s32.totalorder %v1508_v25, 1 }
  0x4c   : > { %vm731_vm5 = vcmp.lt.s32.totalorder %v1508_v25, 113  ;;  %vm696_vm6 = vcmp.lt.s32.totalorder %v1508_v25, 127  ;;  %vm766_vm7 = vcmp.lt.s32.totalorder %v1508_v25, 112  ;;  %vm801_vm8 = vcmp.lt.s32.totalorder %v1508_v25, 111 }
  0x4f   : > { %1198 = vset.pattern.permute.xlu0 %v1290_v5 }
  0x52   : > { %1199 = vset.pattern.permute.xlu1 %v1290_v5 }
  0x6e   : > { %v1469_v11 = vpop.permute.xlu2 %620 }
  0x78   : > { %v1475_v13 = vpop.permute.xlu2 %655 }
  0x81   : > { %v1486_v15 = vpop.permute.xlu2 %708 }
  0x85   : > { %v428_v24 = vpop.permute.xlu0 %427  ;;  %v1460_v8 = vpop.permute.xlu1 %550 }
  0x8d   : > { %v433_v26 = vpop.permute.xlu0 %432 }
  0x8f   : > { %v1464_v10 = vpop.permute.xlu1 %585 }
  0x95   : > { %v1412_v34 = vpop.permute.xlu0 %545 }
  0x98   : > { %v473_v27 = vpop.f32.mrf.mxu0  ;;  %v1473_v12 = vpop.permute.xlu1 %616 }
  0x99   : > { %v474_v28 = vadd.f32 %v473_v27, %v428_v24  ;;  %v487_v29 = vpop.f32.mrf.mxu1 }
  0x9a   : > { %v488_v30 = vadd.f32 %v487_v29, %v428_v24 }
  0x9b   : > { %v492_v31 = vsub.f32 0.0, %v474_v28 }
  0x9c   : > { %v493_v32 = vsub.f32 0.0, %v488_v30 }
  0x9d   : > { %v496_v33 = vmul.f32 1.442695, %v492_v31 }
  0x9e   : > { %v498_v35 = vmul.f32 1.442695, %v493_v32  ;;  %v1414_v45 = vpop.permute.xlu0 %581 }
  0x9f   : > { %1205 = vpow2.f32 %v496_v33  ;;  %v537_v33 = vperm.slane %v1419_v48, 0 }
  0xa0   : > { %1207 = vpow2.f32 %v498_v35  ;;  %v475_v36 = vpop.f32.mrf.mxu0  ;;  %v609_v35 = vperm.slane %v1419_v48, 2 }
  0xa1   : > { %v476_v37 = vadd.f32 %v475_v36, %v433_v26  ;;  %v489_v38 = vpop.f32.mrf.mxu1  ;;  %v1481_v14 = vpop.permute.xlu1 %651  ;;  %v610_v36 = vperm.slane %v1424_v49, 2 }
  0xa2   : > { %v490_v42 = vadd.f32 %v489_v38, %v433_v26  ;;  %v574_v38 = vperm.slane %v1419_v48, 1 }
  0xa3   : > { %v494_v39 = vsub.f32 0.0, %v476_v37 }
  0xa4   : > { %v495_v47 = vsub.f32 0.0, %v490_v42 }
  0xa5   : > { %v1206_v40 = vpop.eup %1205  ;;  %v500_v41 = vmul.f32 1.442695, %v494_v39  ;;  %v575_v39 = vperm.slane %v1424_v49, 1 }
  0xa6   : > { %v1208_v43 = vpop.eup %1207  ;;  %v504_v44 = vadd.f32 1.0, %v1206_v40  ;;  %v502_v51 = vmul.f32 1.442695, %v495_v47 }
  0xa7   : > { %v505_v46 = vadd.f32 1.0, %v1208_v43  ;;  %1209 = vpow2.f32 %v500_v41  ;;  %v674_v58 = vpop.permute.xlu0 %673  ;;  %v644_v43 = vperm.slane %v1419_v48, 3 }
  0xa8   : > { %1211 = vrcp.f32 %v504_v44  ;;  %v645_v44 = vperm.slane %v1424_v49, 3 }
  0xa9   : > { %1213 = vrcp.f32 %v505_v46 }
  0xaa   : > { %1215 = vpow2.f32 %v502_v51  ;;  %v1488_v16 = vpop.permute.xlu1 %677 }
  0xad   : > { %v1210_v50 = vpop.eup %1209 }
  0xae   : > { %v1212_v53 = vpop.eup %1211  ;;  %v506_v60 = vadd.f32 1.0, %v1210_v50 }
  0xaf   : > { %v1214_v55 = vpop.eup %1213  ;;  %v512_v56 = vmul.f32 %v1212_v53, %v474_v28 }
  0xb0   : > { %v513_v57 = vmul.f32 %v1214_v55, %v488_v30  ;;  %1217 = vrcp.f32 %v506_v60  ;;  %v1216_v1 = vpop.eup %1215  ;;  %v1502_v21 = vpop.permute.xlu0 %712 }
  0xb1   : > { %631 = vrot.lane.b32.xlu0 %v512_v56, %s1285_s12  ;;  %522 = vrot.lane.b32.xlu1 %v512_v56, %s1286_s14  ;;  %v668_v59 = vmul.f32 %v1427_v52, %v512_v56  ;;  %v507_v2 = vadd.f32 1.0, %v1216_v1 }
  0xb2   : > { %526 = vrot.lane.b32.xlu2 %v513_v57, %s1286_s14  ;;  %v669_v61 = vmul.f32 %v1430_v54, %v513_v57 }
  0xb3   : > { %v1437_v62 = vmul.f32 %v674_v58, %v668_v59  ;;  %1219 = vrcp.f32 %v507_v2  ;;  %v1497_v18 = vpop.permute.xlu1 %747 }
  0xb4   : > { %v1439_v63 = vmul.f32 %v674_v58, %v669_v61 }
  0xb6   : > { %v1218_v3 = vpop.eup %1217 }
  0xb7   : > { %v1444_v4 = vmul.f32 %v1218_v3, %v476_v37  ;;  %v828_v37 = vld [vmem:[%s393_s23] sm:$0xff] }
  0xb9   : > { %727 = vrot.lane.b32.xlu0 %v513_v57, %s1287_s15  ;;  %565 = vrot.lane.b32.xlu1 %v513_v57, %s1288_s16  ;;  %v1220_v6 = vpop.eup %1219  ;;  %v1511_v26 = vpop.permute.xlu0 %743 }
  0xba   : > { %561 = vrot.lane.b32.xlu2 %v512_v56, %s1288_s16  ;;  %v1449_v7 = vmul.f32 %v1220_v6, %v490_v42 }
  0xbc   : > { %v1504_v22 = vpop.permute.xlu1 %778 }
  0xc1   : > { %563 = vrot.lane.b32.xlu0 %v1444_v4, %s1288_s16  ;;  %723 = vrot.lane.b32.xlu1 %v512_v56, %s1287_s15 }
  0xc2   : > { %596 = vrot.lane.b32.xlu2 %v512_v56, %s1289_s17 }
  0xc9   : > { %602 = vrot.lane.b32.xlu0 %v1449_v7, %s1289_s17  ;;  %758 = vrot.lane.b32.xlu1 %v512_v56, %s1291_s18 }
  0xca   : > { %600 = vrot.lane.b32.xlu2 %v513_v57, %s1289_s17 }
  0xd1   : > { %637 = vrot.lane.b32.xlu0 %v1449_v7, %s1285_s12  ;;  %762 = vrot.lane.b32.xlu1 %v513_v57, %s1291_s18 }
  0xd2   : > { %635 = vrot.lane.b32.xlu2 %v513_v57, %s1285_s12 }
  0xd9   : > { %694 = vrot.lane.b32.xlu0 %v1449_v7, %s1292_s19  ;;  %524 = vrot.lane.b32.xlu1 %v1444_v4, %s1286_s14 }
  0xda   : > { %688 = vrot.lane.b32.xlu2 %v512_v56, %s1292_s19 }
  0xe1   : > { %799 = vrot.lane.b32.xlu0 %v1449_v7, %s1293_s20  ;;  %598 = vrot.lane.b32.xlu1 %v1444_v4, %s1289_s17 }
  0xe2   : > { %692 = vrot.lane.b32.xlu2 %v513_v57, %s1292_s19 }
  0xe9   : > { %813 = vperm.xlu0 %1198, %v1399_v20   ;;  %633 = vrot.lane.b32.xlu1 %v1444_v4, %s1285_s12  ;;  %s1090_s12 = sshll.u32 %s1750_s25, 4 }
  0xea   : > { %793 = vrot.lane.b32.xlu2 %v512_v56, %s1293_s20 }
  0xf1   : > { %690 = vrot.lane.b32.xlu1 %v1444_v4, %s1292_s19  ;;  %1202 = vset.pattern.permute.xlu0 %v1277_v0  ;;  %s1093_s19 = sshll.u32 %s1750_s25, 3 }
  0xf2   : > { %797 = vrot.lane.b32.xlu2 %v513_v57, %s1293_s20 }
  0xf9   : > { %729 = vrot.lane.b32.xlu1 %v1449_v7, %s1287_s15 }
  0xfa   : > { %528 = vrot.lane.b32.xlu2 %v1449_v7, %s1286_s14  ;;  %s402_s14 = sadd.s32 %s1090_s12, %s1089_s11 }
 0x101   : > { %795 = vrot.lane.b32.xlu1 %v1444_v4, %s1293_s20  ;;  %s412_s20 = sadd.s32 %s1093_s19, %s1752_s8 }
 0x102   : > { %567 = vrot.lane.b32.xlu2 %v1449_v7, %s1288_s16  ;;  %s1094_s21 = sshll.u32 %s412_s20, 3 }
 0x103   : > { %s414_s13 = scalar_lea.vmem %s1738_s7, %s1094_s21 }
 0x109   : > { %817 = vperm.xlu1 %1199, %v1389_v9  }
 0x10a   : > { %725 = vrot.lane.b32.xlu2 %v1444_v4, %s1287_s15  ;;  %s1091_s15 = sshll.u32 %s402_s14, 2 }
 0x10c   : > { %v527_v17 = vpop.permute.xlu2 %526 }
 0x111   : > { %1201 = vset.pattern.permute.xlu1 %v1277_v0 }
 0x112   : > { %760 = vrot.lane.b32.xlu2 %v1444_v4, %s1291_s18  ;;  %837 = vperm.xlu1 %1201, %v829_v19  }
 0x114   : > { %v562_v20 = vpop.permute.xlu2 %561 }
 0x11a   : > { %764 = vrot.lane.b32.xlu2 %v1449_v7, %s1291_s18  ;;  %s404_s18 = scalar_lea.vmem %s1737_s6, %s1091_s15 }
 0x11c   : > { %v597_v24 = vpop.permute.xlu2 %596 }
 0x122   : > { %782 = vperm.xlu2 %1197, %v1389_v9   ;;  %v538_v9 = vperm.slane %v1424_v49, 0 }
 0x123   : > { %v523_v27 = vpop.permute.xlu1 %522  ;;  %v632_v46 = vpop.permute.xlu0 %631 }
 0x124   : > { %v533_v28 = vsel %vm532_vm1, %v523_v27, %v527_v17  ;;  %v535_v29 = vsel %vm532_vm1, %v527_v17, %v523_v27  ;;  %v601_v30 = vpop.permute.xlu2 %600 }
 0x125   : > { %v605_v31 = vsel %vm604_vm2, %v597_v24, %v601_v30  ;;  %v607_v32 = vsel %vm604_vm2, %v601_v30, %v597_v24  ;;  %v539_v40 = vmul.f32 %v537_v33, %v535_v29  ;;  %v540_v41 = vmul.f32 %v538_v9, %v533_v28 }
 0x126   : > { %v611_v47 = vmul.f32 %v609_v35, %v607_v32  ;;  %v612_v50 = vmul.f32 %v610_v36, %v605_v31 }
 0x127   : > { %v553_v59 = vmul.f32 %v1412_v34, %v539_v40  ;;  %v554_v60 = vmul.f32 %v1412_v34, %v540_v41  ;;  %v701_v40 = vperm.slane %v1419_v48, 5 }
 0x128   : > { %v623_v5 = vmul.f32 %v1473_v12, %v611_v47  ;;  %v624_v6 = vmul.f32 %v1473_v12, %v612_v50  ;;  %v736_v12 = vperm.slane %v1419_v48, 6 }
 0x12a   : > { %1200 = vset.pattern.permute.xlu2 %v1277_v0 }
 0x12b   : > { %832 = vperm.xlu2 %1200, %v828_v37   ;;  %v566_v42 = vpop.permute.xlu1 %565  ;;  %v728_v32 = vpop.permute.xlu0 %727  ;;  %v737_v37 = vperm.slane %v1424_v49, 6 }
 0x12c   : > { %v570_v51 = vsel %vm569_vm3, %v562_v20, %v566_v42  ;;  %v572_v0 = vsel %vm569_vm3, %v566_v42, %v562_v20  ;;  %v636_v53 = vpop.permute.xlu2 %635 }
 0x12d   : > { %v576_v55 = vmul.f32 %v574_v38, %v572_v0  ;;  %v577_v56 = vmul.f32 %v575_v39, %v570_v51  ;;  %v640_v57 = vsel %vm639_vm4, %v632_v46, %v636_v53  ;;  %v642_v58 = vsel %vm639_vm4, %v636_v53, %v632_v46 }
 0x12e   : > { %v646_v2 = vmul.f32 %v644_v43, %v642_v58  ;;  %v647_v3 = vmul.f32 %v645_v44, %v640_v57  ;;  %v771_v57 = vperm.slane %v1419_v48, 7  ;;  %v772_v58 = vperm.slane %v1424_v49, 7 }
 0x12f   : > { %v588_v61 = vmul.f32 %v1414_v45, %v576_v55  ;;  %v589_v1 = vmul.f32 %v1414_v45, %v577_v56 }
 0x130   : > { %v658_v34 = vmul.f32 %v1481_v14, %v646_v2  ;;  %v659_v24 = vmul.f32 %v1481_v14, %v647_v3  ;;  %v702_v14 = vperm.slane %v1424_v49, 5 }
 0x131   : > { %v592_v17 = vadd.f32 %v588_v61, %v553_v59  ;;  %v593_v19 = vadd.f32 %v589_v1, %v554_v60 }
 0x133   : > { %v627_v20 = vadd.f32 %v623_v5, %v592_v17  ;;  %v628_v23 = vadd.f32 %v624_v6, %v593_v19  ;;  %v724_v27 = vpop.permute.xlu1 %723  ;;  %v564_v19 = vpop.permute.xlu0 %563 }
 0x134   : > { %v689_v45 = vpop.permute.xlu2 %688  ;;  %v732_v41 = vsel %vm731_vm5, %v724_v27, %v728_v32 }
 0x135   : > { %v662_v28 = vadd.f32 %v658_v34, %v627_v20  ;;  %v663_v29 = vadd.f32 %v659_v24, %v628_v23  ;;  %v738_v50 = vmul.f32 %v736_v12, %v732_v41 }
 0x137   : > { %v684_v30 = vadd.f32 %v1437_v62, %v662_v28  ;;  %v685_v31 = vadd.f32 %v1439_v63, %v663_v29  ;;  %v734_v62 = vsel %vm731_vm5, %v728_v32, %v724_v27  ;;  %v750_v59 = vmul.f32 %v1511_v26, %v738_v50 }
 0x138   : > { %v739_v51 = vmul.f32 %v737_v37, %v734_v62 }
 0x13a   : > { %v751_v60 = vmul.f32 %v1511_v26, %v739_v51 }
 0x13b   : > { %v759_v63 = vpop.permute.xlu1 %758  ;;  %v603_v29 = vpop.permute.xlu0 %602 }
 0x13c   : > { %v693_v42 = vpop.permute.xlu2 %692 }
 0x13d   : > { %v697_v46 = vsel %vm696_vm6, %v689_v45, %v693_v42  ;;  %v699_v47 = vsel %vm696_vm6, %v693_v42, %v689_v45 }
 0x13e   : > { %v703_v0 = vmul.f32 %v701_v40, %v697_v46  ;;  %v704_v53 = vmul.f32 %v702_v14, %v699_v47 }
 0x140   : > { %v715_v55 = vmul.f32 %v1486_v15, %v703_v0  ;;  %v716_v56 = vmul.f32 %v1486_v15, %v704_v53 }
 0x142   : > { %v719_v61 = vadd.f32 %v715_v55, %v684_v30  ;;  %v720_v1 = vadd.f32 %v716_v56, %v685_v31 }
 0x143   : > { %v763_v2 = vpop.permute.xlu1 %762  ;;  %v638_v32 = vpop.permute.xlu0 %637 }
 0x144   : > { %v767_v3 = vsel %vm766_vm7, %v759_v63, %v763_v2  ;;  %v769_v5 = vsel %vm766_vm7, %v763_v2, %v759_v63  ;;  %v1601_v15 = vpop.permute.xlu2 %793  ;;  %v754_v6 = vadd.f32 %v750_v59, %v719_v61  ;;  %v755_v17 = vadd.f32 %v751_v60, %v720_v1 }
 0x145   : > { %v773_v20 = vmul.f32 %v771_v57, %v767_v3  ;;  %v774_v26 = vmul.f32 %v772_v58, %v769_v5 }
 0x147   : > { %v785_v23 = vmul.f32 %v1504_v22, %v773_v20  ;;  %v786_v34 = vmul.f32 %v1504_v22, %v774_v26 }
 0x149   : > { %v1609_v24 = vadd.f32 %v785_v23, %v754_v6  ;;  %v1611_v27 = vadd.f32 %v786_v34, %v755_v17 }
 0x14b   : > { %v525_v45 = vpop.permute.xlu1 %524  ;;  %v695_v6 = vpop.permute.xlu0 %694 }
 0x14c   : > { %v1613_v28 = vpop.permute.xlu2 %797 }
 0x153   : > { %v599_v30 = vpop.permute.xlu1 %598 }
 0x154   : > { %v529_v31 = vpop.permute.xlu2 %528  ;;  %v606_v22 = vsel %vm604_vm2, %v599_v30, %v603_v29  ;;  %v608_v63 = vsel %vm604_vm2, %v603_v29, %v599_v30 }
 0x155   : > { %v534_v41 = vsel %vm532_vm1, %v525_v45, %v529_v31  ;;  %v536_v62 = vsel %vm532_vm1, %v529_v31, %v525_v45  ;;  %v613_v56 = vmul.f32 %v609_v35, %v608_v63 }
 0x156   : > { %v541_v46 = vmul.f32 %v537_v33, %v536_v62  ;;  %v542_v47 = vmul.f32 %v538_v9, %v534_v41  ;;  %v614_v33 = vmul.f32 %v610_v36, %v606_v22 }
 0x157   : > { %v625_v3 = vmul.f32 %v1469_v11, %v613_v56  ;;  %v1203_v56 = vld [vmem:[%s1736_s5 + $0x10] ss:$0 sm:$0xff] }
 0x158   : > { %v555_v1 = vmul.f32 %v1460_v8, %v541_v46  ;;  %v556_v2 = vmul.f32 %v1460_v8, %v542_v47  ;;  %v800_v46 = vpop.permute.xlu0 %799 }
 0x15b   : > { %v634_v42 = vpop.permute.xlu1 %633 }
 0x15c   : > { %v641_v50 = vsel %vm639_vm4, %v634_v42, %v638_v32  ;;  %v643_v51 = vsel %vm639_vm4, %v638_v32, %v634_v42  ;;  %v568_v0 = vpop.permute.xlu2 %567 }
 0x15d   : > { %v571_v53 = vsel %vm569_vm3, %v564_v19, %v568_v0  ;;  %v573_v55 = vsel %vm569_vm3, %v568_v0, %v564_v19  ;;  %v648_v60 = vmul.f32 %v644_v43, %v643_v51  ;;  %v649_v61 = vmul.f32 %v645_v44, %v641_v50 }
 0x15e   : > { %v578_v9 = vmul.f32 %v574_v38, %v573_v55  ;;  %v579_v59 = vmul.f32 %v575_v39, %v571_v53  ;;  %v670_v38 = vmul.f32 %v1427_v52, %v1444_v4  ;;  %v671_v39 = vmul.f32 %v1430_v54, %v1449_v7 }
 0x15f   : > { %v626_v43 = vmul.f32 %v1469_v11, %v614_v33  ;;  %v660_v17 = vmul.f32 %v1475_v13, %v648_v60  ;;  %v661_v8 = vmul.f32 %v1475_v13, %v649_v61  ;;  %v804_v33 = vsel %vm801_vm8, %v1613_v28, %v1601_v15 }
 0x160   : > { %v590_v35 = vmul.f32 %v1464_v10, %v578_v9  ;;  %v591_v36 = vmul.f32 %v1464_v10, %v579_v59  ;;  %v682_v34 = vmul.f32 %v1488_v16, %v670_v38  ;;  %v683_v13 = vmul.f32 %v1488_v16, %v671_v39 }
 0x162   : > { %v594_v5 = vadd.f32 %v590_v35, %v555_v1  ;;  %v595_v44 = vadd.f32 %v591_v36, %v556_v2  ;;  %v814_v1 = vpop.permute.xlu0 %813 }
 0x163   : > { %v691_v19 = vpop.permute.xlu1 %690 }
 0x164   : > { %v629_v20 = vadd.f32 %v625_v3, %v594_v5  ;;  %v630_v10 = vadd.f32 %v626_v43, %v595_v44  ;;  %v698_v4 = vsel %vm696_vm6, %v691_v19, %v695_v6  ;;  %v700_v7 = vsel %vm696_vm6, %v695_v6, %v691_v19  ;;  %v726_v26 = vpop.permute.xlu2 %725 }
 0x165   : > { %v705_v11 = vmul.f32 %v701_v40, %v698_v4  ;;  %v706_v23 = vmul.f32 %v702_v14, %v700_v7 }
 0x166   : > { %v664_v45 = vadd.f32 %v660_v17, %v629_v20  ;;  %v665_v29 = vadd.f32 %v661_v8, %v630_v10 }
 0x167   : > { %v717_v30 = vmul.f32 %v1502_v21, %v705_v11  ;;  %v718_v31 = vmul.f32 %v1502_v21, %v706_v23 }
 0x168   : > { %v686_v32 = vadd.f32 %v682_v34, %v664_v45  ;;  %v687_v41 = vadd.f32 %v683_v13, %v665_v29 }
 0x16a   : > { %v721_v62 = vadd.f32 %v717_v30, %v686_v32  ;;  %v722_v22 = vadd.f32 %v718_v31, %v687_v41 }
 0x16b   : > { %v730_v63 = vpop.permute.xlu1 %729 }
 0x16c   : > { %v761_v42 = vpop.permute.xlu2 %760  ;;  %v733_v40 = vsel %vm731_vm5, %v726_v26, %v730_v63  ;;  %v735_v14 = vsel %vm731_vm5, %v730_v63, %v726_v26 }
 0x16d   : > { %v740_v50 = vmul.f32 %v736_v12, %v733_v40  ;;  %v741_v21 = vmul.f32 %v737_v37, %v735_v14  ;;  %v1204_v12 = vld [vmem:[%s1736_s5 + $0x18] ss:$0 sm:$0xff]  ;;  %v802_v37 = vsel %vm801_vm8, %v1601_v15, %v1613_v28 }
 0x16e   : > { %v808_v39 = vmul.f32 %v1203_v56, %v802_v37  ;;  %v809_v3 = vmul.f32 %v1204_v12, %v804_v33 }
 0x16f   : > { %v752_v53 = vmul.f32 %v1497_v18, %v740_v50  ;;  %v753_v55 = vmul.f32 %v1497_v18, %v741_v21 }
 0x170   : > { %v820_v48 = vmul.f32 %v814_v1, %v808_v39 }
 0x171   : > { %v756_v2 = vadd.f32 %v752_v53, %v721_v62  ;;  %v757_v35 = vadd.f32 %v753_v55, %v722_v22 }
 0x172   : > { %v824_v8 = vadd.f32 %v820_v48, %v1609_v24 }
 0x173   : > { %v796_v16 = vpop.permute.xlu1 %795 }
 0x174   : > { %v765_v47 = vpop.permute.xlu2 %764  ;;  %v803_v59 = vsel %vm801_vm8, %v796_v16, %v800_v46  ;;  %v805_v60 = vsel %vm801_vm8, %v800_v46, %v796_v16 }
 0x175   : > { %v768_v51 = vsel %vm766_vm7, %v761_v42, %v765_v47  ;;  %v770_v0 = vsel %vm766_vm7, %v765_v47, %v761_v42  ;;  %v810_v43 = vmul.f32 %v1203_v56, %v803_v59  ;;  %v811_v5 = vmul.f32 %v1204_v12, %v805_v60 }
 0x176   : > { %v775_v25 = vmul.f32 %v771_v57, %v768_v51  ;;  %v776_v18 = vmul.f32 %v772_v58, %v770_v0  ;;  %v821_v57 = vmul.f32 %v814_v1, %v809_v3 }
 0x178   : > { %v825_v19 = vadd.f32 %v821_v57, %v1611_v27 }
 0x17b   : > { %v818_v9 = vpop.permute.xlu1 %817 }
 0x17c   : > { %v783_v61 = vpop.permute.xlu2 %782  ;;  %v822_v44 = vmul.f32 %v818_v9, %v810_v43  ;;  %v823_v49 = vmul.f32 %v818_v9, %v811_v5 }
 0x17d   : > { %v787_v36 = vmul.f32 %v783_v61, %v775_v25  ;;  %v788_v38 = vmul.f32 %v783_v61, %v776_v18 }
 0x17f   : > { %v791_v15 = vadd.f32 %v787_v36, %v756_v2  ;;  %v792_v28 = vadd.f32 %v788_v38, %v757_v35 }
 0x181   : > { %v826_v58 = vadd.f32 %v822_v44, %v791_v15  ;;  %v827_v6 = vadd.f32 %v823_v49, %v792_v28 }
 0x184   : > { %v838_v17 = vpop.permute.xlu1 %837 }
 0x185   : > { %v842_v20 = vadd.f32 %v838_v17, %v826_v58  ;;  %v843_v10 = vadd.f32 %v838_v17, %v827_v6  ;;  %v833_v4 = vpop.permute.xlu2 %832 }
 0x186   : > { %v840_v7 = vadd.f32 %v833_v4, %v824_v8  ;;  %v841_v26 = vadd.f32 %v833_v4, %v825_v19 }
 0x187   : > { %v846_v11 = vsub.f32 0.0, %v842_v20  ;;  %v847_v23 = vsub.f32 0.0, %v843_v10 }
 0x188   : > { %v844_v34 = vsub.f32 0.0, %v840_v7  ;;  %v845_v13 = vsub.f32 0.0, %v841_v26 }
 0x189   : > { %v852_v45 = vmul.f32 1.442695, %v846_v11  ;;  %v854_v29 = vmul.f32 1.442695, %v847_v23 }
 0x18a   : > { %v848_v30 = vmul.f32 1.442695, %v844_v34  ;;  %v850_v31 = vmul.f32 1.442695, %v845_v13 }
 0x18b   : > { %1221 = vpow2.f32 %v852_v45 }
 0x18c   : > { %1223 = vpow2.f32 %v854_v29 }
 0x18d   : > { %1225 = vpow2.f32 %v848_v30 }
 0x18e   : > { %1227 = vpow2.f32 %v850_v31 }
 0x191   : > { %v1222_v24 = vpop.eup %1221 }
 0x192   : > { %v1224_v27 = vpop.eup %1223  ;;  %v858_v32 = vadd.f32 1.0, %v1222_v24 }
 0x193   : > { %v1226_v41 = vpop.eup %1225  ;;  %v859_v62 = vadd.f32 1.0, %v1224_v27 }
 0x194   : > { %v1228_v22 = vpop.eup %1227  ;;  %1229 = vrcp.f32 %v858_v32  ;;  %v856_v63 = vadd.f32 1.0, %v1226_v41 }
 0x195   : > { %1231 = vrcp.f32 %v859_v62  ;;  %v857_v42 = vadd.f32 1.0, %v1228_v22 }
 0x196   : > { %1233 = vrcp.f32 %v856_v63 }
 0x197   : > { %1235 = vrcp.f32 %v857_v42 }
 0x19a   : > { %v1230_v40 = vpop.eup %1229 }
 0x19b   : > { %v1232_v14 = vpop.eup %1231  ;;  %v866_v46 = vmul.f32 %v1230_v40, %v842_v20 }
 0x19c   : > { %v1234_v16 = vpop.eup %1233  ;;  %v867_v47 = vmul.f32 %v1232_v14, %v843_v10 }
 0x19d   : > { %v1236_v50 = vpop.eup %1235  ;;  %v864_v21 = vmul.f32 %v1234_v16, %v840_v7  ;;  %v874_v51 = vmul.f32 %v866_v46, %v1427_v52 }
 0x19e   : > { %v869_v0 = vpack.c.bf16 %v867_v47, %v866_v46  ;;  %v865_v53 = vmul.f32 %v1236_v50, %v841_v26  ;;  %v875_v55 = vmul.f32 %v867_v47, %v1430_v54 }
 0x19f   : > { %v872_v56 = vmul.f32 %v864_v21, %v1427_v52 }
 0x1a0   : > { %871 = vst [vmem:[%s404_s18 + $0x8] sm:$0xff] %v869_v0  ;;  %v868_v12 = vpack.c.bf16 %v865_v53, %v864_v21  ;;  %v879_v37 = vadd.f32 %v875_v55, %v874_v51  ;;  %v873_v33 = vmul.f32 %v865_v53, %v1430_v54 }
 0x1a2   : > { %870 = vst [vmem:[%s404_s18] sm:$0xff] %v868_v12  ;;  %880 = vadd.xlane.f32.xlu0 %v879_v37  ;;  %v876_v25 = vadd.f32 %v873_v33, %v872_v56 }
 0x1a4   : > { %877 = vadd.xlane.f32.xlu2 %v876_v25 }
 0x215   : > { %v881_v18 = vpop.xlane.xlu0 %880 }
 0x216   : > { %884 = vst.msk [vmem:[%s414_s13 + $0x8] sm:$0xff] %vm882_vm9, %v881_v18 }
 0x217   : > { %v878_v52 = vpop.xlane.xlu2 %877 }
 0x218   : > { %883 = vst.msk [vmem:[%s414_s13] sm:$0xff] %vm882_vm9, %v878_v52 }
 0x219 PF: > { %s18_s28 = sadd.s32 1, %s1275_s28   ;;  %s1739_s24 = smov %s1267_s26 }
 0x21a   : > { %p15_p7 = scmp.ge.s32.totalorder %s18_s28, 10   ;;  %s1740_s25 = smov %s1271_s27 }
 0x21b   : > { %s1741_s26 = smov %s1744_s29  ;;  %s1742_s27 = smov %s1748_s30 }
 0x21c   :  { %17 = sbr.rel (!%p15_p7) target bundleno = 3 (0x3), region = 98 }

// kernel: custom_efficientnet_forward.6
= control target key start
LH: loop header
LB: loop body
LE: loop exit
PB: predicated region body
PF: predicated region fallthrough
CT: control target
= control target key end

     0   :  { %s1116_s30 = smov 0   ;;  %s1118_s10 = smov 0   ;;  %s1271_s0 = inlined_call_operand.vmem [shape: bf16[2,64,256], index: 0, kind: input, shape index: {}]   ;;  %s1272_s1 = inlined_call_operand.vmem [shape: f32[2,64,1], index: 1, kind: input, shape index: {}]   ;;  %s1273_s2 = inlined_call_operand.vmem [shape: f32[16,64], index: 2, kind: input, shape index: {}]   ;;  %s1274_s3 = inlined_call_operand.vmem [shape: f32[16,1], index: 3, kind: input, shape index: {}]   ;;  %s1275_s4 = inlined_call_operand.vmem [shape: f32[64,16], index: 4, kind: input, shape index: {}]   ;;  %s1276_s5 = inlined_call_operand.vmem [shape: f32[64,1], index: 5, kind: input, shape index: {}]   ;;  %s1277_s6 = inlined_call_operand.vmem [shape: bf16[32,64], index: 6, kind: input, shape index: {}]   ;;  %s1278_s7 = inlined_call_operand.vmem [shape: f32[32,1], index: 7, kind: input, shape index: {}]   ;;  %s1279_s8 = inlined_call_operand.vmem [shape: bf16[2,32,256], index: 8, kind: input, shape index: {}, may-alias: {8,9}]   ;;  %s1280_s9 = inlined_call_operand.vmem [shape: bf16[2,32,256], index: 9, kind: output, shape index: {}, may-alias: {8,9}]  }
   0x1   :  { %s1120_s11 = smov 0  }
   0x2 LB: > { %s31_s12 = sadd.s32 1, %s1059_s10  ;;  %p932_p0 = scmp.ge.s32.totalorder %s1063_s11, 1  ;;  %s1063_s11 = sphi %s1120_s11, %s19_s11   ;;  %s1059_s10 = sphi %s1118_s10, %s1282_s10   ;;  %s1055_s30 = sphi %s1116_s30, %s1281_s30  }
   0x3   : > { %p33_p1 = scmp.ge.s32.totalorder %s31_s12, 2  ;;  %p335_p2 = scmp.lt.s32.totalorder %s1063_s11, 3 }
   0x5   : > { %s1284_s12 = smov (%p33_p1, %s31_s12), 0  ;;  %p336_p3 = pnand %p932_p0, %p335_p2 }
   0x6   : > { %p394_p4 = scmp.lt.s32.totalorder (!%p336_p3), %s1055_s30, 1 }
   0x7   : > { %339 = sbr.rel (%p336_p3) target bundleno = 679 (0x2a7), region = 56 }
   0xc   : > { %s1286_s30 = smov (!%p394_p4, %s1055_s30), 1  ;;  %v445_v16 = vld [vmem:[%s1273_s2] sm:$0xff]  ;;  %vm449_vm0 = vcmask 523264   ;;  %v446_v17 = vld [vmem:[%s1273_s2 + $0x8] sm:$0xff]  ;;  %v493_v36 = vld [vmem:[%s1275_s4 + $0x10] sm:$0xff]  ;;  %vm507_vm1 = vcmask 130048  }
   0xd   : > { %s965_s13 = sshll.u32 %s1286_s30, 6  ;;  %v447_v18 = vld [vmem:[%s1274_s3] sm:$0xff]  ;;  %v448_v23 = vld [vmem:[%s1274_s3 + $0x8] sm:$0xff]  ;;  %v494_v38 = vld [vmem:[%s1275_s4 + $0x18] sm:$0xff]  ;;  %v1065_v44 = vmov 0   ;;  %s967_s23 = sshll.u32 %s1286_s30, 5 }
   0xe   : > { %s407_s16 = scalar_lea.vmem %s1272_s1, %s965_s13  ;;  %v491_v37 = vld [vmem:[%s1275_s4] sm:$0xff]  ;;  %v492_v39 = vld [vmem:[%s1275_s4 + $0x8] sm:$0xff]  ;;  %v497_v42 = vld [vmem:[%s1275_s4 + $0x30] sm:$0xff]  ;;  %1000 = vset.pattern.permute.xlu2 %v1065_v44  ;;  %999 = vset.pattern.permute.xlu1 %v1065_v44  ;;  %s1229_s19 = scalar_lea.vmem %s1271_s0, %s965_s13 }
   0xf   : > { %v436_v0 = vld [vmem:[%s407_s16 + $0x38] sm:$0xff]  ;;  %v435_v1 = vld [vmem:[%s407_s16 + $0x30] sm:$0xff]  ;;  %v434_v2 = vld [vmem:[%s407_s16 + $0x28] sm:$0xff]  ;;  %998 = vset.pattern.permute.xlu0 %v1065_v44  ;;  %s416_s26 = scalar_lea.vmem %s1279_s8, %s967_s23  ;;  %s1256_s29 = scalar_lea.vmem %s1280_s9, %s967_s23 }
  0x10   : > { %v444_v3 = vmul.f32 0.00390625, %v436_v0  ;;  %v443_v4 = vmul.f32 0.00390625, %v435_v1  ;;  %v433_v5 = vld [vmem:[%s407_s16 + $0x20] sm:$0xff]  ;;  %v442_v6 = vmul.f32 0.00390625, %v434_v2  ;;  %v432_v7 = vld [vmem:[%s407_s16 + $0x18] sm:$0xff]  ;;  %v431_v9 = vld [vmem:[%s407_s16 + $0x10] sm:$0xff] }
  0x11   : > { %v441_v8 = vmul.f32 0.00390625, %v433_v5  ;;  %v440_v10 = vmul.f32 0.00390625, %v432_v7  ;;  %v430_v11 = vld [vmem:[%s407_s16 + $0x8] sm:$0xff]  ;;  %v439_v12 = vmul.f32 0.00390625, %v431_v9  ;;  %v429_v13 = vld [vmem:[%s407_s16] sm:$0xff]  ;;  %v498_v43 = vld [vmem:[%s1275_s4 + $0x38] sm:$0xff] }
  0x12   : > { %464 = vmatpush.msra.mxu0 %v444_v3  ;;  %v438_v14 = vmul.f32 0.00390625, %v430_v11  ;;  %v437_v15 = vmul.f32 0.00390625, %v429_v13  ;;  %v495_v40 = vld [vmem:[%s1275_s4 + $0x20] sm:$0xff]  ;;  %v496_v41 = vld [vmem:[%s1275_s4 + $0x28] sm:$0xff]  ;;  %v501_v45 = vld [vmem:[%s1276_s5 + $0x10] sm:$0xff] }
  0x13   : > { %v502_v50 = vld [vmem:[%s1276_s5 + $0x18] sm:$0xff]  ;;  %v503_v58 = vld [vmem:[%s1276_s5 + $0x20] sm:$0xff]  ;;  %v500_v61 = vld [vmem:[%s1276_s5 + $0x8] sm:$0xff] }
  0x14   : > { %465 = vmatpush.msra.mxu0 %v443_v4  ;;  %v504_v5 = vld [vmem:[%s1276_s5 + $0x28] sm:$0xff] }
  0x16   : > { %466 = vmatpush.msra.mxu0 %v442_v6 }
  0x18   : > { %467 = vmatpush.msra.mxu0 %v441_v8 }
  0x1a   : > { %468 = vmatpush.msra.mxu0 %v440_v10 }
  0x1c   : > { %469 = vmatpush.msra.mxu0 %v439_v12 }
  0x1e   : > { %470 = vmatpush.msra.mxu0 %v438_v14 }
  0x20   : > { %471 = vmatpush.msra.mxu0 %v437_v15  ;;  %v505_v15 = vld [vmem:[%s1276_s5 + $0x30] sm:$0xff] }
  0x21   : > { %941 = vmatmul.msk.f32.vlgmr.msra.gmra.mxu0 %vm449_vm0, %v445_v16 }
  0x29   : > { %942 = vmatmul.msk.f32.gmra.mxu0 %vm449_vm0, %v446_v17 }
  0x9e   : > { %v473_v19 = vpop.f32.mrf.mxu0 }
  0x9f   : > { %v474_v20 = vadd.f32 %v473_v19, %v447_v18  ;;  %v499_v19 = vld [vmem:[%s1276_s5] sm:$0xff] }
  0xa1   : > { %v479_v21 = vsub.f32 0.0, %v474_v20 }
  0xa3   : > { %v481_v22 = vmul.f32 1.442695, %v479_v21 }
  0xa5   : > { %1001 = vpow2.f32 %v481_v22 }
  0xa6   : > { %v476_v24 = vpop.f32.mrf.mxu0 }
  0xa7   : > { %v477_v25 = vadd.f32 %v476_v24, %v448_v23  ;;  %v506_v24 = vld [vmem:[%s1276_s5 + $0x38] sm:$0xff] }
  0xa9   : > { %v480_v26 = vsub.f32 0.0, %v477_v25 }
  0xab   : > { %v483_v27 = vmul.f32 1.442695, %v480_v26  ;;  %v1002_v28 = vpop.eup %1001 }
  0xac   : > { %v485_v29 = vadd.f32 1.0, %v1002_v28 }
  0xad   : > { %1003 = vpow2.f32 %v483_v27  ;;  %v705_v27 = vld [vmem:[%s1278_s7] sm:$0xff] }
  0xae   : > { %1005 = vrcp.f32 %v485_v29 }
  0xb3   : > { %v1004_v30 = vpop.eup %1003 }
  0xb4   : > { %v486_v31 = vadd.f32 1.0, %v1004_v30  ;;  %v1006_v32 = vpop.eup %1005 }
  0xb5   : > { %v489_v35 = vmul.f32 %v1006_v32, %v474_v20 }
  0xb6   : > { %1007 = vrcp.f32 %v486_v31 }
  0xbc   : > { %v1008_v33 = vpop.eup %1007 }
  0xbd   : > { %v490_v34 = vmul.f32 %v1008_v33, %v477_v25 }
  0xbf   : > { %546 = vmatpush.msrb.mxu0 %v490_v34  ;;  %971 = vmatpush.msra.mxu1 %v490_v34 }
  0xc1   : > { %547 = vmatpush.msrb.mxu0 %v489_v35  ;;  %972 = vmatpush.msra.mxu1 %v489_v35 }
  0xc2   : > { %945 = vmatmul.msk.f32.vlgmr.msra.gmra.mxu1 %vm507_vm1, %v493_v36  ;;  %943 = vmatmul.msk.f32.vlgmr.msrb.gmra.mxu0 %vm507_vm1, %v491_v37 }
  0xca   : > { %946 = vmatmul.msk.f32.gmra.mxu1 %vm507_vm1, %v494_v38  ;;  %944 = vmatmul.msk.f32.gmra.mxu0 %vm507_vm1, %v492_v39  ;;  %v708_v38 = vld [vmem:[%s1278_s7 + $0x18] sm:$0xff] }
  0xd2   : > { %947 = vmatmul.msk.f32.gmra.mxu1 %vm507_vm1, %v495_v40 }
  0xda   : > { %948 = vmatmul.msk.f32.gmra.mxu1 %vm507_vm1, %v496_v41 }
  0xe2   : > { %949 = vmatmul.msk.f32.gmra.mxu1 %vm507_vm1, %v497_v42 }
  0xea   : > { %950 = vmatmul.msk.f32.gmra.mxu1 %vm507_vm1, %v498_v43 }
 0x13f   : > { %v555_v46 = vpop.f32.mrf.mxu1  ;;  %v549_v52 = vpop.f32.mrf.mxu0 }
 0x140   : > { %v556_v47 = vadd.f32 %v555_v46, %v501_v45  ;;  %v550_v26 = vadd.f32 %v549_v52, %v499_v19  ;;  %v707_v45 = vld [vmem:[%s1278_s7 + $0x10] sm:$0xff] }
 0x141   : > { %v619_v52 = vld [vmem:[%s1229_s19 + $0x30] sm:$0xff] }
 0x142   : > { %v575_v48 = vsub.f32 0.0, %v556_v47  ;;  %v573_v31 = vsub.f32 0.0, %v550_v26 }
 0x144   : > { %v585_v49 = vmul.f32 1.442695, %v575_v48  ;;  %v581_v37 = vmul.f32 1.442695, %v573_v31  ;;  %v706_v48 = vld [vmem:[%s1278_s7 + $0x8] sm:$0xff] }
 0x146   : > { %1009 = vpow2.f32 %v585_v49 }
 0x147   : > { %v558_v51 = vpop.f32.mrf.mxu1  ;;  %v552_v62 = vpop.f32.mrf.mxu0 }
 0x148   : > { %v559_v53 = vadd.f32 %v558_v51, %v502_v50  ;;  %v553_v2 = vadd.f32 %v552_v62, %v500_v61 }
 0x14a   : > { %v576_v54 = vsub.f32 0.0, %v559_v53  ;;  %v574_v8 = vsub.f32 0.0, %v553_v2  ;;  %v620_v53 = vld [vmem:[%s1229_s19 + $0x38] sm:$0xff] }
 0x14c   : > { %v1010_v55 = vpop.eup %1009  ;;  %v587_v56 = vmul.f32 1.442695, %v576_v54  ;;  %v583_v12 = vmul.f32 1.442695, %v574_v8  ;;  %v618_v54 = vld [vmem:[%s1229_s19 + $0x28] sm:$0xff] }
 0x14d   : > { %v599_v57 = vadd.f32 1.0, %v1010_v55  ;;  %v617_v55 = vld [vmem:[%s1229_s19 + $0x20] sm:$0xff]  ;;  %v631_v61 = vunpack.c.l.bf16 %v618_v54  ;;  %v632_v62 = vunpack.c.h.bf16 %v618_v54  ;;  %v785_v54 = vld [vmem:[%s416_s26 + $0x10] sm:$0xff] }
 0x14e   : > { %1011 = vpow2.f32 %v587_v56  ;;  %v633_v56 = vunpack.c.l.bf16 %v619_v52 }
 0x14f   : > { %1013 = vrcp.f32 %v599_v57  ;;  %v561_v59 = vpop.f32.mrf.mxu1  ;;  %v634_v57 = vunpack.c.h.bf16 %v619_v52 }
 0x150   : > { %v562_v60 = vadd.f32 %v561_v59, %v503_v58  ;;  %v635_v58 = vunpack.c.l.bf16 %v620_v53  ;;  %v636_v59 = vunpack.c.h.bf16 %v620_v53  ;;  %v784_v53 = vld [vmem:[%s416_s26 + $0x8] sm:$0xff] }
 0x152   : > { %v577_v63 = vsub.f32 0.0, %v562_v60  ;;  %v616_v60 = vld [vmem:[%s1229_s19 + $0x18] sm:$0xff] }
 0x153   : > { %v627_v8 = vunpack.c.l.bf16 %v616_v60 }
 0x154   : > { %v1012_v0 = vpop.eup %1011  ;;  %v589_v1 = vmul.f32 1.442695, %v577_v63  ;;  %v629_v63 = vunpack.c.l.bf16 %v617_v55 }
 0x155   : > { %v1014_v3 = vpop.eup %1013  ;;  %v600_v4 = vadd.f32 1.0, %v1012_v0  ;;  %v630_v0 = vunpack.c.h.bf16 %v617_v55  ;;  %v786_v55 = vld [vmem:[%s416_s26 + $0x18] sm:$0xff] }
 0x156   : > { %1015 = vpow2.f32 %v589_v1  ;;  %649 = vperm.xlu2 %1000, %v1014_v3  }
 0x157   : > { %1017 = vrcp.f32 %v600_v4  ;;  %v564_v6 = vpop.f32.mrf.mxu1 }
 0x158   : > { %v565_v7 = vadd.f32 %v564_v6, %v504_v5 }
 0x15a   : > { %v578_v9 = vsub.f32 0.0, %v565_v7  ;;  %v615_v7 = vld [vmem:[%s1229_s19 + $0x10] sm:$0xff] }
 0x15c   : > { %v1016_v10 = vpop.eup %1015  ;;  %v591_v11 = vmul.f32 1.442695, %v578_v9  ;;  %v628_v9 = vunpack.c.h.bf16 %v616_v60 }
 0x15d   : > { %v1018_v13 = vpop.eup %1017  ;;  %v601_v14 = vadd.f32 1.0, %v1016_v10 }
 0x15e   : > { %1019 = vpow2.f32 %v591_v11  ;;  %654 = vperm.xlu2 %1000, %v1018_v13  }
 0x15f   : > { %1021 = vrcp.f32 %v601_v14  ;;  %v567_v16 = vpop.f32.mrf.mxu1 }
 0x160   : > { %1023 = vpow2.f32 %v583_v12  ;;  %v568_v17 = vadd.f32 %v567_v16, %v505_v15  ;;  %v613_v15 = vld [vmem:[%s1229_s19] sm:$0xff]  ;;  %v625_v16 = vunpack.c.l.bf16 %v615_v7 }
 0x162   : > { %v579_v18 = vsub.f32 0.0, %v568_v17  ;;  %v626_v17 = vunpack.c.h.bf16 %v615_v7 }
 0x164   : > { %v1020_v20 = vpop.eup %1019  ;;  %v593_v21 = vmul.f32 1.442695, %v579_v18 }
 0x165   : > { %v1022_v22 = vpop.eup %1021  ;;  %v602_v23 = vadd.f32 1.0, %v1020_v20 }
 0x166   : > { %v1024_v25 = vpop.eup %1023  ;;  %1025 = vpow2.f32 %v593_v21  ;;  %659 = vperm.xlu1 %999, %v1022_v22   ;;  %711 = vperm.xlu2 %1000, %v705_v27   ;;  %v614_v22 = vld [vmem:[%s1229_s19 + $0x8] sm:$0xff] }
 0x167   : > { %1027 = vrcp.f32 %v602_v23  ;;  %v570_v28 = vpop.f32.mrf.mxu1  ;;  %v598_v30 = vadd.f32 1.0, %v1024_v25  ;;  %v621_v23 = vunpack.c.l.bf16 %v613_v15  ;;  %v624_v31 = vunpack.c.h.bf16 %v614_v22 }
 0x168   : > { %v571_v29 = vadd.f32 %v570_v28, %v506_v24  ;;  %v622_v24 = vunpack.c.h.bf16 %v613_v15  ;;  %v794_v15 = vunpack.c.h.bf16 %v786_v55 }
 0x169   : > { %1029 = vrcp.f32 %v598_v30  ;;  %v623_v30 = vunpack.c.l.bf16 %v614_v22 }
 0x16a   : > { %v580_v32 = vsub.f32 0.0, %v571_v29 }
 0x16c   : > { %v1026_v33 = vpop.eup %1025  ;;  %v595_v34 = vmul.f32 1.442695, %v580_v32 }
 0x16d   : > { %v1028_v35 = vpop.eup %1027  ;;  %v603_v36 = vadd.f32 1.0, %v1026_v33 }
 0x16e   : > { %1031 = vpow2.f32 %v595_v34  ;;  %664 = vperm.xlu1 %999, %v1028_v35   ;;  %726 = vperm.xlu2 %1000, %v708_v38  }
 0x16f   : > { %1033 = vrcp.f32 %v603_v36  ;;  %v1030_v39 = vpop.eup %1029 }
 0x170   : > { %1035 = vpow2.f32 %v581_v37 }
 0x174   : > { %v1032_v40 = vpop.eup %1031 }
 0x175   : > { %v1034_v41 = vpop.eup %1033  ;;  %v604_v42 = vadd.f32 1.0, %v1032_v40 }
 0x176   : > { %669 = vperm.xlu0 %998, %v1034_v41   ;;  %644 = vperm.xlu1 %999, %v1030_v39   ;;  %v1036_v43 = vpop.eup %1035  ;;  %v969_v41 = vld [vmem:[%s1277_s6] sm:$0xff] }
 0x177   : > { %1037 = vrcp.f32 %v604_v42  ;;  %v597_v44 = vadd.f32 1.0, %v1036_v43  ;;  %v970_v42 = vld [vmem:[%s1277_s6 + $0x8] sm:$0xff]  ;;  %v783_v43 = vld [vmem:[%s416_s26] sm:$0xff] }
 0x179   : > { %1039 = vrcp.f32 %v597_v44 }
 0x17d   : > { %v1038_v46 = vpop.eup %1037 }
 0x17e   : > { %674 = vperm.xlu0 %998, %v1038_v46   ;;  %721 = vperm.xlu1 %999, %v707_v45   ;;  %v787_v45 = vunpack.c.l.bf16 %v783_v43  ;;  %v788_v46 = vunpack.c.h.bf16 %v783_v43 }
 0x17f   : > { %v1040_v47 = vpop.eup %1039 }
 0x186   : > { %639 = vperm.xlu0 %998, %v1040_v47  }
 0x18e   : > { %716 = vperm.xlu0 %998, %v706_v48  }
 0x1b0   : > { %v650_v51 = vpop.permute.xlu2 %649 }
 0x1b1   : > { %v681_v28 = vmul.f32 %v650_v51, %v625_v16  ;;  %v682_v29 = vmul.f32 %v650_v51, %v626_v17 }
 0x1b8   : > { %v655_v10 = vpop.permute.xlu2 %654 }
 0x1b9   : > { %v683_v20 = vmul.f32 %v655_v10, %v627_v8  ;;  %v684_v21 = vmul.f32 %v655_v10, %v628_v9 }
 0x1bb   : > { %v695_v34 = vpack.c.bf16 %v683_v20, %v681_v28  ;;  %v696_v35 = vpack.c.bf16 %v684_v21, %v682_v29 }
 0x1c0   : > { %v712_v44 = vpop.permute.xlu2 %711 }
 0x1d8   : > { %v660_v49 = vpop.permute.xlu1 %659 }
 0x1d9   : > { %v685_v18 = vmul.f32 %v660_v49, %v629_v63  ;;  %v686_v19 = vmul.f32 %v660_v49, %v630_v0 }
 0x1e0   : > { %v665_v1 = vpop.permute.xlu1 %664 }
 0x1e1   : > { %v687_v11 = vmul.f32 %v665_v1, %v631_v61  ;;  %v688_v12 = vmul.f32 %v665_v1, %v632_v62 }
 0x1e3   : > { %v697_v25 = vpack.c.bf16 %v687_v11, %v685_v18  ;;  %v698_v26 = vpack.c.bf16 %v688_v12, %v686_v19 }
 0x1e8   : > { %v670_v50 = vpop.permute.xlu0 %669  ;;  %v645_v36 = vpop.permute.xlu1 %644 }
 0x1e9   : > { %v689_v3 = vmul.f32 %v670_v50, %v633_v56  ;;  %v690_v4 = vmul.f32 %v670_v50, %v634_v57  ;;  %v679_v37 = vmul.f32 %v645_v36, %v623_v30  ;;  %v680_v38 = vmul.f32 %v645_v36, %v624_v31 }
 0x1f0   : > { %v675_v2 = vpop.permute.xlu0 %674 }
 0x1f1   : > { %v691_v5 = vmul.f32 %v675_v2, %v635_v58  ;;  %v692_v6 = vmul.f32 %v675_v2, %v636_v59  ;;  %v789_v58 = vunpack.c.l.bf16 %v784_v53  ;;  %v790_v59 = vunpack.c.h.bf16 %v784_v53 }
 0x1f3   : > { %v699_v13 = vpack.c.bf16 %v691_v5, %v689_v3  ;;  %v700_v14 = vpack.c.bf16 %v692_v6, %v690_v4  ;;  %v722_v3 = vpop.permute.xlu1 %721  ;;  %v791_v4 = vunpack.c.l.bf16 %v785_v54  ;;  %v792_v5 = vunpack.c.h.bf16 %v785_v54 }
 0x1f5   : > { %749 = vmatpush.bf16.msra.mxu2 %v699_v13  ;;  %768 = vmatpush.bf16.msra.mxu3 %v700_v14  ;;  %v727_v13 = vpop.permute.xlu2 %726  ;;  %v793_v14 = vunpack.c.l.bf16 %v786_v55 }
 0x1f8   : > { %v640_v27 = vpop.permute.xlu0 %639 }
 0x1f9   : > { %750 = vmatpush.bf16.msra.mxu2 %v697_v25  ;;  %769 = vmatpush.bf16.msra.mxu3 %v698_v26  ;;  %v677_v32 = vmul.f32 %v640_v27, %v621_v23  ;;  %v678_v33 = vmul.f32 %v640_v27, %v622_v24 }
 0x1fb   : > { %v693_v39 = vpack.c.bf16 %v679_v37, %v677_v32  ;;  %v694_v40 = vpack.c.bf16 %v680_v38, %v678_v33 }
 0x1fd   : > { %751 = vmatpush.bf16.msra.mxu2 %v695_v34  ;;  %770 = vmatpush.bf16.msra.mxu3 %v696_v35 }
 0x200   : > { %v717_v57 = vpop.permute.xlu0 %716 }
 0x201   : > { %752 = vmatpush.bf16.msra.mxu2 %v693_v39  ;;  %771 = vmatpush.bf16.msra.mxu3 %v694_v40 }
 0x204   : > { %959 = vmatmul.msk.bf16.vlgmr.msra.gmra.mxu2 %vm449_vm0, %v969_v41  ;;  %961 = vmatmul.msk.bf16.vlgmr.msra.gmra.mxu3 %vm449_vm0, %v969_v41 }
 0x214   : > { %960 = vmatmul.msk.bf16.gmra.mxu2 %vm449_vm0, %v970_v42  ;;  %962 = vmatmul.msk.bf16.gmra.mxu3 %vm449_vm0, %v970_v42 }
 0x287   : > { %v754_v47 = vpop.f32.mrf.mxu2  ;;  %v773_v48 = vpop.f32.mrf.mxu3 }
 0x288   : > { %v755_v49 = vadd.f32 %v754_v47, %v712_v44  ;;  %v774_v50 = vadd.f32 %v773_v48, %v712_v44 }
 0x28a   : > { %v795_v51 = vadd.f32 %v787_v45, %v755_v49  ;;  %v796_v52 = vadd.f32 %v788_v46, %v774_v50 }
 0x28c   : > { %v803_v56 = vpack.c.bf16 %v796_v52, %v795_v51 }
 0x28e   : > { %807 = vst [vmem:[%s1256_s29] sm:$0xff] %v803_v56 }
 0x28f   : > { %v756_v60 = vpop.f32.mrf.mxu2  ;;  %v775_v61 = vpop.f32.mrf.mxu3 }
 0x290   : > { %v757_v62 = vadd.f32 %v756_v60, %v717_v57  ;;  %v776_v63 = vadd.f32 %v775_v61, %v717_v57 }
 0x292   : > { %v797_v0 = vadd.f32 %v789_v58, %v757_v62  ;;  %v798_v1 = vadd.f32 %v790_v59, %v776_v63 }
 0x294   : > { %v804_v2 = vpack.c.bf16 %v798_v1, %v797_v0 }
 0x296   : > { %808 = vst [vmem:[%s1256_s29 + $0x8] sm:$0xff] %v804_v2 }
 0x297   : > { %v759_v6 = vpop.f32.mrf.mxu2  ;;  %v778_v7 = vpop.f32.mrf.mxu3 }
 0x298   : > { %v760_v8 = vadd.f32 %v759_v6, %v722_v3  ;;  %v779_v9 = vadd.f32 %v778_v7, %v722_v3 }
 0x29a   : > { %v799_v10 = vadd.f32 %v791_v4, %v760_v8  ;;  %v800_v11 = vadd.f32 %v792_v5, %v779_v9 }
 0x29c   : > { %v805_v12 = vpack.c.bf16 %v800_v11, %v799_v10 }
 0x29e   : > { %809 = vst [vmem:[%s1256_s29 + $0x10] sm:$0xff] %v805_v12 }
 0x29f   : > { %v761_v16 = vpop.f32.mrf.mxu2  ;;  %v780_v17 = vpop.f32.mrf.mxu3 }
 0x2a0   : > { %v762_v18 = vadd.f32 %v761_v16, %v727_v13  ;;  %v781_v19 = vadd.f32 %v780_v17, %v727_v13 }
 0x2a2   : > { %v801_v20 = vadd.f32 %v793_v14, %v762_v18  ;;  %v802_v21 = vadd.f32 %v794_v15, %v781_v19 }
 0x2a4   : > { %v806_v22 = vpack.c.bf16 %v802_v21, %v801_v20 }
 0x2a6   : > { %810 = vst [vmem:[%s1256_s29 + $0x18] sm:$0xff] %v806_v22 }
 0x2a7 PF: > { %s19_s11 = sadd.s32 1, %s1063_s11   ;;  %s1281_s30 = smov %s1059_s10 }
 0x2a8   : > { %p16_p5 = scmp.ge.s32.totalorder %s19_s11, 4   ;;  %s1282_s10 = smov %s1284_s12 }
 0x2aa   :  { %18 = sbr.rel (!%p16_p5) target bundleno = 2 (0x2), region = 92 }

// kernel: custom_efficientnet_forward.7
= control target key start
LH: loop header
LB: loop body
LE: loop exit
PB: predicated region body
PF: predicated region fallthrough
CT: control target
= control target key end

     0   :  { %s1719_s13 = smov 0   ;;  %s1721_s14 = smov 0   ;;  %s2191_s0 = inlined_call_operand.vmem [shape: bf16[2,32,256], index: 0, kind: input, shape index: {}]   ;;  %s2192_s1 = inlined_call_operand.vmem [shape: f32[1,256], index: 1, kind: input, shape index: {}]   ;;  %s2193_s2 = inlined_call_operand.vmem [shape: bf16[128,32], index: 2, kind: input, shape index: {}]   ;;  %s2194_s3 = inlined_call_operand.vmem [shape: f32[128,1], index: 3, kind: input, shape index: {}]   ;;  %s2195_s4 = inlined_call_operand.vmem [shape: f32[11,128], index: 4, kind: input, shape index: {}]   ;;  %s2196_s5 = inlined_call_operand.vmem [shape: f32[11,1], index: 5, kind: input, shape index: {}]   ;;  %s2197_s6 = inlined_call_operand.vmem [shape: f32[64,11], index: 6, kind: input, shape index: {}]   ;;  %s2198_s7 = inlined_call_operand.vmem [shape: f32[64,1], index: 7, kind: input, shape index: {}]   ;;  %s2199_s8 = inlined_call_operand.vmem [shape: f32[11,64], index: 8, kind: input, shape index: {}]   ;;  %s2200_s9 = inlined_call_operand.vmem [shape: f32[11,1], index: 9, kind: input, shape index: {}]   ;;  %s2201_s10 = inlined_call_operand.vmem [shape: f32[2,11,1], index: 10, kind: output, shape index: {}]  }
   0x1   :  { %s1723_s15 = smov 0  }
   0x2 LB: > { %s32_s16 = sadd.s32 1, %s1656_s14  ;;  %p1375_p0 = scmp.ge.s32.totalorder %s1660_s15, 1  ;;  %s1660_s15 = sphi %s1723_s15, %s20_s15   ;;  %s1656_s14 = sphi %s1721_s14, %s2203_s14   ;;  %s1652_s13 = sphi %s1719_s13, %s2202_s13  }
   0x3   : > { %p34_p1 = scmp.ge.s32.totalorder %s32_s16, 2  ;;  %p341_p2 = scmp.lt.s32.totalorder %s1660_s15, 3 }
   0x5   : > { %s2205_s16 = smov (%p34_p1, %s32_s16), 0  ;;  %p342_p3 = pnand %p1375_p0, %p341_p2 }
   0x6   : > { %p388_p4 = scmp.lt.s32.totalorder (!%p342_p3), %s1652_s13, 1 }
   0x7   : > { %345 = sbr.rel (%p342_p3) target bundleno = 985 (0x3d9), region = 60 }
   0xc   : > { %v464_v0 = vld [vmem:[%s2194_s3 + $0x78] sm:$0xff]  ;;  %v462_v1 = vld [vmem:[%s2194_s3 + $0x68] sm:$0xff]  ;;  %v1662_v2 = vmov 0   ;;  %s2207_s13 = smov (!%p388_p4, %s1652_s13), 1  ;;  %v463_v7 = vld [vmem:[%s2194_s3 + $0x70] sm:$0xff]  ;;  %vm605_vm0 = vcmask 261120  }
   0xd   : > { %1501 = vset.pattern.permute.xlu0 %v1662_v2  ;;  %1502 = vset.pattern.permute.xlu1 %v1662_v2  ;;  %v460_v3 = vld [vmem:[%s2194_s3 + $0x58] sm:$0xff]  ;;  %s1457_s23 = sshll.u32 %s2207_s13, 5  ;;  %v461_v15 = vld [vmem:[%s2194_s3 + $0x60] sm:$0xff]  ;;  %v459_v17 = vld [vmem:[%s2194_s3 + $0x50] sm:$0xff]  ;;  %vm412_vm1 = vcmask 7168   ;;  %vm1158_vm2 = vcmask 1042432  }
   0xe   : > { %542 = vperm.xlu0 %1501, %v464_v0   ;;  %532 = vperm.xlu1 %1502, %v462_v1   ;;  %s395_s26 = scalar_lea.vmem %s2191_s0, %s1457_s23  ;;  %v1459_v19 = vld [vmem:[%s2193_s2] sm:$0xff]  ;;  %v1465_v20 = vld [vmem:[%s2193_s2 + $0x30] sm:$0xff]  ;;  %v458_v21 = vld [vmem:[%s2194_s3 + $0x48] sm:$0xff]  ;;  %vm1133_vm3 = vcmask 89088   ;;  %vm1215_vm4 = vcmask 523264   ;;  %vm1246_vm5 = vcmask 2048  }
   0xf   : > { %1503 = vset.pattern.permute.xlu2 %v1662_v2  ;;  %v1422_v4 = vld [vmem:[%s395_s26 + $0x10] sm:$0xf]  ;;  %v1470_v5 = vld [vmem:[%s395_s26 + $0x14] sm:$0xf0]  ;;  %v1469_v6 = vld [vmem:[%s395_s26 + $0x14] sm:$0xf] }
  0x10   : > { %522 = vperm.xlu2 %1503, %v460_v3   ;;  %v1423_v8 = vor.u32 %v1470_v5, %v1422_v4  ;;  %v1424_v9 = vld [vmem:[%s395_s26 + $0x18] sm:$0xf0]  ;;  %v1414_v10 = vld [vmem:[%s395_s26] sm:$0xf]  ;;  %v1468_v11 = vld [vmem:[%s395_s26 + $0x4] sm:$0xf0] }
  0x11   : > { %v1427_v12 = vor.u32 %v1469_v6, %v1424_v9  ;;  %v1467_v13 = vld [vmem:[%s395_s26 + $0x4] sm:$0xf]  ;;  %v1416_v14 = vld [vmem:[%s395_s26 + $0x8] sm:$0xf0]  ;;  %v1415_v16 = vor.u32 %v1468_v11, %v1414_v10  ;;  %v456_v23 = vld [vmem:[%s2194_s3 + $0x38] sm:$0xff]  ;;  %s1458_s23 = sshll.u32 %s2207_s13, 4 }
  0x12   : > { %636 = vmatpush.bf16.msra.mxu0 %v1423_v8  ;;  %1471 = vmatpush.bf16.msra.mxu2 %v1423_v8  ;;  %v1419_v18 = vor.u32 %v1467_v13, %v1416_v14  ;;  %v457_v22 = vld [vmem:[%s2194_s3 + $0x40] sm:$0xff]  ;;  %v455_v24 = vld [vmem:[%s2194_s3 + $0x30] sm:$0xff]  ;;  %v454_v25 = vld [vmem:[%s2194_s3 + $0x28] sm:$0xff]  ;;  %s406_s26 = scalar_lea.vmem %s2201_s10, %s1458_s23 }
  0x13   : > { %685 = vmatpush.bf16.msra.mxu1 %v1427_v12  ;;  %1473 = vmatpush.bf16.msra.mxu3 %v1427_v12  ;;  %v453_v26 = vld [vmem:[%s2194_s3 + $0x20] sm:$0xff]  ;;  %v1460_v27 = vld [vmem:[%s2193_s2 + $0x8] sm:$0xff]  ;;  %v1466_v28 = vld [vmem:[%s2193_s2 + $0x38] sm:$0xff] }
  0x14   : > { %v452_v29 = vld [vmem:[%s2194_s3 + $0x18] sm:$0xff]  ;;  %v451_v30 = vld [vmem:[%s2194_s3 + $0x10] sm:$0xff]  ;;  %v450_v31 = vld [vmem:[%s2194_s3 + $0x8] sm:$0xff] }
  0x15   : > { %v449_v32 = vld [vmem:[%s2194_s3] sm:$0xff]  ;;  %v1461_v33 = vld [vmem:[%s2193_s2 + $0x10] sm:$0xff]  ;;  %v1462_v34 = vld [vmem:[%s2193_s2 + $0x18] sm:$0xff] }
  0x16   : > { %537 = vperm.xlu0 %1501, %v463_v7   ;;  %527 = vperm.xlu1 %1502, %v461_v15   ;;  %v1463_v35 = vld [vmem:[%s2193_s2 + $0x20] sm:$0xff]  ;;  %v1464_v36 = vld [vmem:[%s2193_s2 + $0x28] sm:$0xff] }
  0x17   : > { %637 = vmatpush.bf16.msra.mxu0 %v1415_v16  ;;  %1472 = vmatpush.bf16.msra.mxu2 %v1415_v16 }
  0x18   : > { %517 = vperm.xlu2 %1503, %v459_v17   ;;  %686 = vmatpush.bf16.msra.mxu1 %v1419_v18 }
  0x19   : > { %1474 = vmatpush.bf16.msra.mxu3 %v1419_v18 }
  0x1a   : > { %1428 = vmatmul.msk.bf16.vlgmr.msra.gmra.mxu0 %vm605_vm0, %v1459_v19  ;;  %1434 = vmatmul.msk.bf16.vlgmr.msra.gmra.mxu2 %vm605_vm0, %v1465_v20 }
  0x1b   : > { %1436 = vmatmul.msk.bf16.vlgmr.msra.gmra.mxu1 %vm605_vm0, %v1459_v19 }
  0x1c   : > { %1442 = vmatmul.msk.bf16.vlgmr.msra.gmra.mxu3 %vm605_vm0, %v1465_v20 }
  0x1e   : > { %512 = vperm.xlu0 %1501, %v458_v21   ;;  %507 = vperm.xlu1 %1502, %v457_v22  }
  0x20   : > { %502 = vperm.xlu2 %1503, %v456_v23  }
  0x26   : > { %497 = vperm.xlu0 %1501, %v455_v24   ;;  %492 = vperm.xlu1 %1502, %v454_v25  }
  0x28   : > { %487 = vperm.xlu2 %1503, %v453_v26  }
  0x2a   : > { %1429 = vmatmul.msk.bf16.gmra.mxu0 %vm605_vm0, %v1460_v27  ;;  %1435 = vmatmul.msk.bf16.gmra.mxu2 %vm605_vm0, %v1466_v28 }
  0x2b   : > { %1437 = vmatmul.msk.bf16.gmra.mxu1 %vm605_vm0, %v1460_v27 }
  0x2c   : > { %1443 = vmatmul.msk.bf16.gmra.mxu3 %vm605_vm0, %v1466_v28 }
  0x2e   : > { %482 = vperm.xlu0 %1501, %v452_v29   ;;  %477 = vperm.xlu1 %1502, %v451_v30  }
  0x30   : > { %472 = vperm.xlu2 %1503, %v450_v31  }
  0x36   : > { %467 = vperm.xlu0 %1501, %v449_v32  }
  0x3a   : > { %1430 = vmatmul.msk.bf16.gmra.mxu0 %vm605_vm0, %v1461_v33 }
  0x3b   : > { %1438 = vmatmul.msk.bf16.gmra.mxu1 %vm605_vm0, %v1461_v33 }
  0x4a   : > { %1431 = vmatmul.msk.bf16.gmra.mxu0 %vm605_vm0, %v1462_v34 }
  0x4b   : > { %1439 = vmatmul.msk.bf16.gmra.mxu1 %vm605_vm0, %v1462_v34 }
  0x5a   : > { %1432 = vmatmul.msk.bf16.gmra.mxu0 %vm605_vm0, %v1463_v35 }
  0x5b   : > { %1440 = vmatmul.msk.bf16.gmra.mxu1 %vm605_vm0, %v1463_v35 }
  0x6a   : > { %1433 = vmatmul.msk.bf16.gmra.mxu0 %vm605_vm0, %v1464_v36  ;;  %v1831_v37 = vpop.permute.xlu2 %522 }
  0x6b   : > { %1441 = vmatmul.msk.bf16.gmra.mxu1 %vm605_vm0, %v1464_v36 }
  0x72   : > { %v1835_v40 = vpop.permute.xlu2 %517 }
  0x7a   : > { %v1839_v43 = vpop.permute.xlu2 %502 }
  0x80   : > { %v1833_v38 = vpop.permute.xlu0 %542  ;;  %v533_v39 = vpop.permute.xlu1 %532 }
  0x82   : > { %v1845_v46 = vpop.permute.xlu2 %487 }
  0x88   : > { %v1837_v41 = vpop.permute.xlu0 %537  ;;  %v528_v42 = vpop.permute.xlu1 %527 }
  0x8a   : > { %v473_v52 = vpop.permute.xlu2 %472 }
  0x90   : > { %v1841_v44 = vpop.permute.xlu0 %512  ;;  %v1843_v45 = vpop.permute.xlu1 %507 }
  0x97   : > { %v639_v48 = vpop.f32.mrf.mxu0 }
  0x98   : > { %v1847_v47 = vpop.permute.xlu0 %497  ;;  %v688_v49 = vpop.f32.mrf.mxu1 }
  0x99   : > { %v1849_v50 = vpop.permute.xlu1 %492 }
  0x9d   : > { %v669_v51 = vpop.f32.mrf.mxu2 }
  0x9e   : > { %v1851_v53 = vadd.f32 %v669_v51, %v528_v42 }
  0x9f   : > { %v718_v54 = vpop.f32.mrf.mxu3  ;;  %v641_v57 = vpop.f32.mrf.mxu0 }
  0xa0   : > { %v1853_v55 = vadd.f32 %v718_v54, %v528_v42  ;;  %v1855_v56 = vpop.permute.xlu0 %482  ;;  %v752_v58 = vsub.f32 0.0, %v1851_v53  ;;  %v1858_v59 = vadd.f32 %v641_v57, %v473_v52  ;;  %v690_v60 = vpop.f32.mrf.mxu1  ;;  %v936_v57 = vld [vmem:[%s2192_s1] sm:$0x3] }
  0xa1   : > { %v1861_v62 = vadd.f32 %v690_v60, %v473_v52  ;;  %v478_v6 = vpop.permute.xlu1 %477 }
  0xa2   : > { %v753_v61 = vsub.f32 0.0, %v1853_v55  ;;  %v808_v63 = vmul.f32 1.442695, %v752_v58  ;;  %v730_v0 = vsub.f32 0.0, %v1858_v59 }
  0xa3   : > { %v731_v2 = vsub.f32 0.0, %v1861_v62 }
  0xa4   : > { %v810_v1 = vmul.f32 1.442695, %v753_v61  ;;  %1504 = vpow2.f32 %v808_v63  ;;  %v764_v3 = vmul.f32 1.442695, %v730_v0 }
  0xa5   : > { %v766_v4 = vmul.f32 1.442695, %v731_v2  ;;  %v671_v5 = vpop.f32.mrf.mxu2 }
  0xa6   : > { %1506 = vpow2.f32 %v810_v1  ;;  %v1865_v7 = vadd.f32 %v671_v5, %v533_v39 }
  0xa7   : > { %1508 = vpow2.f32 %v764_v3  ;;  %v720_v8 = vpop.f32.mrf.mxu3  ;;  %v644_v11 = vpop.f32.mrf.mxu0  ;;  %v1901_v3 = vperm.slane %v936_v57, 0 }
  0xa8   : > { %1510 = vpow2.f32 %v766_v4  ;;  %v1867_v9 = vadd.f32 %v720_v8, %v533_v39  ;;  %v468_v10 = vpop.permute.xlu0 %467  ;;  %v754_v12 = vsub.f32 0.0, %v1865_v7  ;;  %v1874_v15 = vadd.f32 %v644_v11, %v478_v6  ;;  %v693_v16 = vpop.f32.mrf.mxu1 }
  0xa9   : > { %v1870_v13 = vadd.f32 %v639_v48, %v468_v10  ;;  %v1872_v14 = vadd.f32 %v688_v49, %v468_v10  ;;  %v1877_v18 = vadd.f32 %v693_v16, %v478_v6  ;;  %v1904_v8 = vperm.slane %v936_v57, 1 }
  0xaa   : > { %v755_v17 = vsub.f32 0.0, %v1867_v9  ;;  %v1505_v19 = vpop.eup %1504  ;;  %v812_v20 = vmul.f32 1.442695, %v754_v12  ;;  %v732_v27 = vsub.f32 0.0, %v1874_v15 }
  0xab   : > { %v728_v21 = vsub.f32 0.0, %v1870_v13  ;;  %v848_v23 = vadd.f32 1.0, %v1505_v19  ;;  %v729_v24 = vsub.f32 0.0, %v1872_v14  ;;  %v733_v31 = vsub.f32 0.0, %v1877_v18 }
  0xac   : > { %v1507_v22 = vpop.eup %1506  ;;  %1512 = vpow2.f32 %v812_v20  ;;  %v814_v30 = vmul.f32 1.442695, %v755_v17  ;;  %v768_v49 = vmul.f32 1.442695, %v732_v27 }
  0xad   : > { %v1509_v25 = vpop.eup %1508  ;;  %v849_v26 = vadd.f32 1.0, %v1507_v22  ;;  %1514 = vrcp.f32 %v848_v23  ;;  %v674_v32 = vpop.f32.mrf.mxu2  ;;  %v760_v34 = vmul.f32 1.442695, %v728_v21  ;;  %v762_v39 = vmul.f32 1.442695, %v729_v24 }
  0xae   : > { %v1511_v28 = vpop.eup %1510  ;;  %v826_v29 = vadd.f32 1.0, %v1509_v25  ;;  %v1884_v35 = vadd.f32 %v674_v32, %v1837_v41  ;;  %v770_v61 = vmul.f32 1.442695, %v733_v31 }
  0xaf   : > { %1516 = vrcp.f32 %v849_v26  ;;  %v827_v33 = vadd.f32 1.0, %v1511_v28  ;;  %v723_v36 = vpop.f32.mrf.mxu3  ;;  %v646_v48 = vpop.f32.mrf.mxu0 }
  0xb0   : > { %1518 = vrcp.f32 %v826_v29  ;;  %v1887_v42 = vadd.f32 %v723_v36, %v1837_v41  ;;  %v756_v51 = vsub.f32 0.0, %v1884_v35  ;;  %v1891_v52 = vadd.f32 %v646_v48, %v1855_v56  ;;  %v695_v54 = vpop.f32.mrf.mxu1 }
  0xb1   : > { %1520 = vrcp.f32 %v827_v33  ;;  %v1898_v60 = vadd.f32 %v695_v54, %v1855_v56 }
  0xb2   : > { %1522 = vpow2.f32 %v814_v30  ;;  %v757_v58 = vsub.f32 0.0, %v1887_v42  ;;  %v1513_v41 = vpop.eup %1512  ;;  %v734_v63 = vsub.f32 0.0, %v1891_v52  ;;  %v816_v2 = vmul.f32 1.442695, %v756_v51 }
  0xb3   : > { %1524 = vpow2.f32 %v760_v34  ;;  %v1515_v0 = vpop.eup %1514  ;;  %v850_v1 = vadd.f32 1.0, %v1513_v41  ;;  %v735_v12 = vsub.f32 0.0, %v1898_v60 }
  0xb4   : > { %1526 = vpow2.f32 %v762_v39  ;;  %v912_v5 = vmul.f32 %v1515_v0, %v1851_v53  ;;  %v818_v6 = vmul.f32 1.442695, %v757_v58  ;;  %v772_v11 = vmul.f32 1.442695, %v734_v63 }
  0xb5   : > { %v1517_v4 = vpop.eup %1516  ;;  %1528 = vpow2.f32 %v768_v49  ;;  %v676_v16 = vpop.f32.mrf.mxu2 }
  0xb6   : > { %v1519_v56 = vpop.eup %1518  ;;  %v913_v10 = vmul.f32 %v1517_v4, %v1853_v55  ;;  %1530 = vrcp.f32 %v850_v1  ;;  %v1909_v19 = vadd.f32 %v676_v16, %v1833_v38  ;;  %v966_v23 = vmul.f32 %v1901_v3, %v912_v5 }
  0xb7   : > { %v1521_v17 = vpop.eup %1520  ;;  %1532 = vpow2.f32 %v770_v61  ;;  %v725_v20 = vpop.f32.mrf.mxu3  ;;  %v890_v30 = vmul.f32 %v1519_v56, %v1858_v59 }
  0xb8   : > { %v1523_v21 = vpop.eup %1522  ;;  %1534 = vpow2.f32 %v816_v2  ;;  %v1912_v53 = vadd.f32 %v725_v20, %v1833_v38  ;;  %v649_v22 = vpop.f32.mrf.mxu0  ;;  %v967_v55 = vmul.f32 %v1904_v8, %v913_v10  ;;  %v758_v26 = vsub.f32 0.0, %v1909_v19 }
  0xb9   : > { %v1525_v24 = vpop.eup %1524  ;;  %v851_v25 = vadd.f32 1.0, %v1523_v21  ;;  %1536 = vpow2.f32 %v818_v6  ;;  %v1918_v27 = vadd.f32 %v649_v22, %v1845_v46  ;;  %v698_v28 = vpop.f32.mrf.mxu1  ;;  %v774_v38 = vmul.f32 1.442695, %v735_v12 }
  0xba   : > { %v1527_v29 = vpop.eup %1526  ;;  %v824_v31 = vadd.f32 1.0, %v1525_v24  ;;  %1538 = vpow2.f32 %v772_v11  ;;  %v891_v33 = vmul.f32 %v1521_v17, %v1861_v62  ;;  %v1923_v36 = vadd.f32 %v698_v28, %v1845_v46 }
  0xbb   : > { %v1529_v32 = vpop.eup %1528  ;;  %1540 = vrcp.f32 %v851_v25  ;;  %v825_v34 = vadd.f32 1.0, %v1527_v29  ;;  %v759_v49 = vsub.f32 0.0, %v1912_v53  ;;  %v736_v51 = vsub.f32 0.0, %v1918_v27 }
  0xbc   : > { %v1531_v39 = vpop.eup %1530  ;;  %1542 = vrcp.f32 %v824_v31  ;;  %v828_v48 = vadd.f32 1.0, %v1529_v32  ;;  %v820_v59 = vmul.f32 1.442695, %v758_v26  ;;  %v1010_v57 = vadd.f32 %v967_v55, %v966_v23 }
  0xbd   : > { %v1533_v54 = vpop.eup %1532  ;;  %1544 = vrcp.f32 %v825_v34  ;;  %v914_v41 = vmul.f32 %v1531_v39, %v1865_v7  ;;  %v944_v61 = vmul.f32 %v1901_v3, %v890_v30  ;;  %v737_v0 = vsub.f32 0.0, %v1923_v36 }
  0xbe   : > { %v1535_v58 = vpop.eup %1534  ;;  %1546 = vrcp.f32 %v828_v48  ;;  %v829_v62 = vadd.f32 1.0, %v1533_v54  ;;  %1011 = vadd.xlane.f32.xlu2 %v1010_v57  ;;  %v945_v1 = vmul.f32 %v1904_v8, %v891_v33  ;;  %v822_v5 = vmul.f32 1.442695, %v759_v49 }
  0xbf   : > { %v1537_v46 = vpop.eup %1536  ;;  %v852_v63 = vadd.f32 1.0, %v1535_v58  ;;  %1548 = vpow2.f32 %v774_v38  ;;  %v776_v6 = vmul.f32 1.442695, %v736_v51  ;;  %v968_v22 = vmul.f32 %v1901_v3, %v914_v41 }
  0xc0   : > { %v1539_v2 = vpop.eup %1538  ;;  %1550 = vrcp.f32 %v829_v62  ;;  %v853_v4 = vadd.f32 1.0, %v1537_v46  ;;  %v651_v56 = vpop.f32.mrf.mxu0  ;;  %v1934_v16 = vadd.f32 %v945_v1, %v944_v61  ;;  %v778_v24 = vmul.f32 1.442695, %v737_v0 }
  0xc1   : > { %v1541_v10 = vpop.eup %1540  ;;  %1552 = vrcp.f32 %v852_v63  ;;  %v830_v7 = vadd.f32 1.0, %v1539_v2  ;;  %v1932_v11 = vadd.f32 %v651_v56, %v1849_v50  ;;  %v700_v12 = vpop.f32.mrf.mxu1 }
  0xc2   : > { %v1543_v17 = vpop.eup %1542  ;;  %v915_v20 = vmul.f32 %v1541_v10, %v1867_v9  ;;  %1554 = vrcp.f32 %v853_v4  ;;  %v1938_v21 = vadd.f32 %v700_v12, %v1849_v50 }
  0xc3   : > { %v1545_v23 = vpop.eup %1544  ;;  %v888_v55 = vmul.f32 %v1543_v17, %v1870_v13  ;;  %1556 = vrcp.f32 %v830_v7  ;;  %v738_v25 = vsub.f32 0.0, %v1932_v11 }
  0xc4   : > { %v1547_v26 = vpop.eup %1546  ;;  %v889_v28 = vmul.f32 %v1545_v23, %v1872_v14  ;;  %1558 = vpow2.f32 %v820_v59  ;;  %v739_v29 = vsub.f32 0.0, %v1938_v21  ;;  %v969_v9 = vmul.f32 %v1904_v8, %v915_v20 }
  0xc5   : > { %v1549_v30 = vpop.eup %1548  ;;  %v892_v50 = vmul.f32 %v1547_v26, %v1874_v15  ;;  %1560 = vpow2.f32 %v822_v5  ;;  %v780_v31 = vmul.f32 1.442695, %v738_v25  ;;  %v942_v38 = vmul.f32 %v1901_v3, %v888_v55 }
  0xc6   : > { %v1551_v13 = vpop.eup %1550  ;;  %v831_v32 = vadd.f32 1.0, %v1549_v30  ;;  %1562 = vpow2.f32 %v776_v6  ;;  %v782_v33 = vmul.f32 1.442695, %v739_v29  ;;  %v1013_v34 = vadd.f32 %v969_v9, %v968_v22 }
  0xc7   : > { %v1553_v39 = vpop.eup %1552  ;;  %v893_v14 = vmul.f32 %v1551_v13, %v1877_v18  ;;  %1564 = vpow2.f32 %v778_v24  ;;  %v943_v48 = vmul.f32 %v1904_v8, %v889_v28  ;;  %v946_v62 = vmul.f32 %v1901_v3, %v892_v50 }
  0xc8   : > { %v1555_v49 = vpop.eup %1554  ;;  %v916_v51 = vmul.f32 %v1553_v39, %v1884_v35  ;;  %1566 = vrcp.f32 %v831_v32  ;;  %v654_v15 = vpop.f32.mrf.mxu0  ;;  %1014 = vadd.xlane.f32.xlu0 %v1013_v34 }
  0xc9   : > { %v1557_v54 = vpop.eup %1556  ;;  %v917_v59 = vmul.f32 %v1555_v49, %v1887_v42  ;;  %1568 = vpow2.f32 %v780_v31  ;;  %v703_v57 = vpop.f32.mrf.mxu1  ;;  %v1952_v58 = vadd.f32 %v943_v48, %v942_v38  ;;  %v947_v0 = vmul.f32 %v1904_v8, %v893_v14 }
  0xca   : > { %v1559_v41 = vpop.eup %1558  ;;  %1570 = vpow2.f32 %v782_v33  ;;  %v970_v18 = vmul.f32 %v1901_v3, %v916_v51  ;;  %v894_v46 = vmul.f32 %v1557_v54, %v1891_v52 }
  0xcb   : > { %v1561_v61 = vpop.eup %1560  ;;  %v854_v35 = vadd.f32 1.0, %v1559_v41  ;;  %v971_v63 = vmul.f32 %v1904_v8, %v917_v59  ;;  %v1959_v10 = vadd.f32 %v947_v0, %v946_v62 }
  0xcc   : > { %v1563_v1 = vpop.eup %1562  ;;  %v855_v42 = vadd.f32 1.0, %v1561_v61  ;;  %v948_v52 = vmul.f32 %v1901_v3, %v894_v46 }
  0xcd   : > { %v1565_v2 = vpop.eup %1564  ;;  %1572 = vrcp.f32 %v854_v35  ;;  %v832_v4 = vadd.f32 1.0, %v1563_v1  ;;  %v1016_v5 = vadd.f32 %v971_v63, %v970_v18 }
  0xce   : > { %v1567_v6 = vpop.eup %1566  ;;  %1574 = vrcp.f32 %v855_v42  ;;  %v833_v56 = vadd.f32 1.0, %v1565_v2 }
  0xcf   : > { %v1569_v7 = vpop.eup %1568  ;;  %v895_v12 = vmul.f32 %v1567_v6, %v1898_v60  ;;  %1576 = vrcp.f32 %v832_v4  ;;  %1017 = vadd.xlane.f32.xlu2 %v1016_v5 }
  0xd0   : > { %v1571_v17 = vpop.eup %1570  ;;  %1578 = vrcp.f32 %v833_v56  ;;  %v834_v20 = vadd.f32 1.0, %v1569_v7  ;;  %v656_v22 = vpop.f32.mrf.mxu0 }
  0xd1   : > { %v835_v23 = vadd.f32 1.0, %v1571_v17  ;;  %v705_v55 = vpop.f32.mrf.mxu1  ;;  %v949_v24 = vmul.f32 %v1904_v8, %v895_v12 }
  0xd2   : > { %1580 = vrcp.f32 %v834_v20  ;;  %v1997_v46 = vadd.f32 %v705_v55, %v1839_v43 }
  0xd3   : > { %v1573_v25 = vpop.eup %1572  ;;  %1582 = vrcp.f32 %v835_v23  ;;  %v1964_v26 = vadd.f32 %v949_v24, %v948_v52 }
  0xd4   : > { %v1575_v28 = vpop.eup %1574  ;;  %v918_v60 = vmul.f32 %v1573_v25, %v1909_v19  ;;  %v1975_v19 = vadd.f32 %v654_v15, %v1847_v47  ;;  %v743_v2 = vsub.f32 0.0, %v1997_v46 }
  0xd5   : > { %v1577_v29 = vpop.eup %1576  ;;  %v919_v9 = vmul.f32 %v1575_v28, %v1912_v53 }
  0xd6   : > { %v1579_v30 = vpop.eup %1578  ;;  %v896_v50 = vmul.f32 %v1577_v29, %v1918_v27  ;;  %v972_v31 = vmul.f32 %v1901_v3, %v918_v60  ;;  %v790_v7 = vmul.f32 1.442695, %v743_v2 }
  0xd7   : > { %v897_v38 = vmul.f32 %v1579_v30, %v1923_v36  ;;  %v973_v13 = vmul.f32 %v1904_v8, %v919_v9  ;;  %v1980_v36 = vadd.f32 %v703_v57, %v1847_v47 }
  0xd8   : > { %v1581_v32 = vpop.eup %1580  ;;  %v659_v33 = vpop.f32.mrf.mxu0  ;;  %v950_v34 = vmul.f32 %v1901_v3, %v896_v50 }
  0xd9   : > { %v1583_v39 = vpop.eup %1582  ;;  %v898_v14 = vmul.f32 %v1581_v32, %v1932_v11  ;;  %v1019_v53 = vadd.f32 %v973_v13, %v972_v31  ;;  %v708_v48 = vpop.f32.mrf.mxu1  ;;  %v951_v27 = vmul.f32 %v1904_v8, %v897_v38  ;;  %v740_v11 = vsub.f32 0.0, %v1975_v19 }
  0xda   : > { %v899_v49 = vmul.f32 %v1583_v39, %v1938_v21  ;;  %v741_v15 = vsub.f32 0.0, %v1980_v36  ;;  %v1991_v21 = vadd.f32 %v656_v22, %v1839_v43  ;;  %v2007_v43 = vadd.f32 %v659_v33, %v1843_v45 }
  0xdb   : > { %1020 = vadd.xlane.f32.xlu1 %v1019_v53  ;;  %v1982_v51 = vadd.f32 %v951_v27, %v950_v34  ;;  %v952_v54 = vmul.f32 %v1901_v3, %v898_v14  ;;  %v784_v62 = vmul.f32 1.442695, %v740_v11  ;;  %v2013_v12 = vadd.f32 %v708_v48, %v1843_v45 }
  0xdc   : > { %v953_v59 = vmul.f32 %v1904_v8, %v899_v49  ;;  %v786_v61 = vmul.f32 1.442695, %v741_v15  ;;  %v742_v1 = vsub.f32 0.0, %v1991_v21  ;;  %v744_v24 = vsub.f32 0.0, %v2007_v43 }
  0xdd   : > { %1584 = vpow2.f32 %v784_v62  ;;  %v745_v28 = vsub.f32 0.0, %v2013_v12 }
  0xde   : > { %v1988_v41 = vadd.f32 %v953_v59, %v952_v54  ;;  %1586 = vpow2.f32 %v786_v61  ;;  %v788_v6 = vmul.f32 1.442695, %v742_v1  ;;  %v792_v31 = vmul.f32 1.442695, %v744_v24 }
  0xdf   : > { %v794_v32 = vmul.f32 1.442695, %v745_v28 }
  0xe0   : > { %v661_v18 = vpop.f32.mrf.mxu0 }
  0xe1   : > { %v1994_v47 = vadd.f32 %v661_v18, %v1841_v44  ;;  %v710_v57 = vpop.f32.mrf.mxu1 }
  0xe2   : > { %v2000_v35 = vadd.f32 %v710_v57, %v1841_v44 }
  0xe3   : > { %v746_v63 = vsub.f32 0.0, %v1994_v47  ;;  %v1585_v17 = vpop.eup %1584 }
  0xe4   : > { %v747_v0 = vsub.f32 0.0, %v2000_v35  ;;  %v1587_v22 = vpop.eup %1586  ;;  %v836_v9 = vadd.f32 1.0, %v1585_v17 }
  0xe5   : > { %v796_v42 = vmul.f32 1.442695, %v746_v63 }
  0xe6   : > { %v798_v4 = vmul.f32 1.442695, %v747_v0 }
  0xe7   : > { %1588 = vpow2.f32 %v796_v42 }
  0xe8   : > { %v664_v5 = vpop.f32.mrf.mxu0  ;;  %1590 = vpow2.f32 %v798_v4 }
  0xe9   : > { %v2010_v44 = vadd.f32 %v664_v5, %v1835_v40  ;;  %v713_v56 = vpop.f32.mrf.mxu1  ;;  %1592 = vpow2.f32 %v788_v6 }
  0xea   : > { %v2016_v52 = vadd.f32 %v713_v56, %v1835_v40  ;;  %1594 = vpow2.f32 %v790_v7  ;;  %v837_v40 = vadd.f32 1.0, %v1587_v22 }
  0xeb   : > { %v748_v20 = vsub.f32 0.0, %v2010_v44 }
  0xec   : > { %v749_v23 = vsub.f32 0.0, %v2016_v52 }
  0xed   : > { %v1589_v55 = vpop.eup %1588  ;;  %v800_v25 = vmul.f32 1.442695, %v748_v20 }
  0xee   : > { %v842_v60 = vadd.f32 1.0, %v1589_v55  ;;  %v802_v45 = vmul.f32 1.442695, %v749_v23  ;;  %v1591_v29 = vpop.eup %1590 }
  0xef   : > { %1596 = vpow2.f32 %v800_v25  ;;  %v843_v30 = vadd.f32 1.0, %v1591_v29  ;;  %v1593_v34 = vpop.eup %1592 }
  0xf0   : > { %1598 = vrcp.f32 %v842_v60  ;;  %v666_v50 = vpop.f32.mrf.mxu0  ;;  %v1595_v14 = vpop.eup %1594  ;;  %v838_v15 = vadd.f32 1.0, %v1593_v34 }
  0xf1   : > { %1600 = vpow2.f32 %v802_v45  ;;  %v2023_v38 = vadd.f32 %v666_v50, %v1831_v37  ;;  %v715_v13 = vpop.f32.mrf.mxu1  ;;  %v839_v62 = vadd.f32 1.0, %v1595_v14 }
  0xf2   : > { %1602 = vrcp.f32 %v843_v30  ;;  %v2026_v33 = vadd.f32 %v715_v13, %v1831_v37  ;;  %v1663_v13 = vmov 0.0  }
  0xf3   : > { %1604 = vrcp.f32 %v836_v9  ;;  %v750_v39 = vsub.f32 0.0, %v2023_v38  ;;  %425 = vst.msk [vmem:[#allocation2 + $0x60] sm:$0xff] %vm412_vm1, %v1663_v13 }
  0xf4   : > { %1606 = vrcp.f32 %v837_v40  ;;  %v751_v53 = vsub.f32 0.0, %v2026_v33  ;;  %413 = vst.msk [vmem:[#allocation2] sm:$0xff] %vm412_vm1, %v1663_v13 }
  0xf5   : > { %v1597_v48 = vpop.eup %1596  ;;  %1608 = vpow2.f32 %v792_v31  ;;  %v804_v27 = vmul.f32 1.442695, %v750_v39  ;;  %414 = vst.msk [vmem:[#allocation2 + $0x8] sm:$0xff] %vm412_vm1, %v1663_v13 }
  0xf6   : > { %v1599_v49 = vpop.eup %1598  ;;  %1610 = vpow2.f32 %v794_v32  ;;  %v844_v54 = vadd.f32 1.0, %v1597_v48  ;;  %v806_v59 = vmul.f32 1.442695, %v751_v53  ;;  %415 = vst.msk [vmem:[#allocation2 + $0x10] sm:$0xff] %vm412_vm1, %v1663_v13 }
  0xf7   : > { %v1601_v11 = vpop.eup %1600  ;;  %v906_v37 = vmul.f32 %v1599_v49, %v1994_v47  ;;  %1612 = vpow2.f32 %v804_v27  ;;  %416 = vst.msk [vmem:[#allocation2 + $0x18] sm:$0xff] %vm412_vm1, %v1663_v13 }
  0xf8   : > { %v1603_v18 = vpop.eup %1602  ;;  %1614 = vrcp.f32 %v844_v54  ;;  %v845_v57 = vadd.f32 1.0, %v1601_v11  ;;  %417 = vst.msk [vmem:[#allocation2 + $0x20] sm:$0xff] %vm412_vm1, %v1663_v13 }
  0xf9   : > { %v1605_v61 = vpop.eup %1604  ;;  %v907_v63 = vmul.f32 %v1603_v18, %v2000_v35  ;;  %1616 = vpow2.f32 %v806_v59  ;;  %v960_v0 = vmul.f32 %v1901_v3, %v906_v37  ;;  %418 = vst.msk [vmem:[#allocation2 + $0x28] sm:$0xff] %vm412_vm1, %v1663_v13 }
  0xfa   : > { %v1607_v1 = vpop.eup %1606  ;;  %1618 = vrcp.f32 %v845_v57  ;;  %v900_v5 = vmul.f32 %v1605_v61, %v1975_v19  ;;  %419 = vst.msk [vmem:[#allocation2 + $0x30] sm:$0xff] %vm412_vm1, %v1663_v13 }
  0xfb   : > { %v1609_v42 = vpop.eup %1608  ;;  %1620 = vrcp.f32 %v838_v15  ;;  %v961_v2 = vmul.f32 %v1904_v8, %v907_v63  ;;  %v901_v6 = vmul.f32 %v1607_v1, %v1980_v36  ;;  %420 = vst.msk [vmem:[#allocation2 + $0x38] sm:$0xff] %vm412_vm1, %v1663_v13 }
  0xfc   : > { %v1611_v4 = vpop.eup %1610  ;;  %1622 = vrcp.f32 %v839_v62  ;;  %v840_v20 = vadd.f32 1.0, %v1609_v42  ;;  %v954_v19 = vmul.f32 %v1901_v3, %v900_v5  ;;  %421 = vst.msk [vmem:[#allocation2 + $0x40] sm:$0xff] %vm412_vm1, %v1663_v13 }
  0xfd   : > { %v1613_v47 = vpop.eup %1612  ;;  %v1001_v56 = vadd.f32 %v961_v2, %v960_v0  ;;  %v841_v55 = vadd.f32 1.0, %v1611_v4  ;;  %v955_v36 = vmul.f32 %v1904_v8, %v901_v6  ;;  %422 = vst.msk [vmem:[#allocation2 + $0x48] sm:$0xff] %vm412_vm1, %v1663_v13 }
  0xfe   : > { %v1615_v7 = vpop.eup %1614  ;;  %v846_v17 = vadd.f32 1.0, %v1613_v47  ;;  %423 = vst.msk [vmem:[#allocation2 + $0x50] sm:$0xff] %vm412_vm1, %v1663_v13 }
  0xff   : > { %v1617_v35 = vpop.eup %1616  ;;  %v908_v22 = vmul.f32 %v1615_v7, %v2010_v44  ;;  %1002 = vadd.xlane.f32.xlu0 %v1001_v56  ;;  %v992_v30 = vadd.f32 %v955_v36, %v954_v19  ;;  %424 = vst.msk [vmem:[#allocation2 + $0x58] sm:$0xff] %vm412_vm1, %v1663_v13  ;;  %v924_v36 = vld [vmem:[#allocation2 + $0x20] sm:$0xff] }
 0x100   : > { %v1619_v23 = vpop.eup %1618  ;;  %1624 = vrcp.f32 %v846_v17  ;;  %v847_v24 = vadd.f32 1.0, %v1617_v35  ;;  %426 = vst.msk [vmem:[#allocation2 + $0x68] sm:$0xff] %vm412_vm1, %v1663_v13 }
 0x101   : > { %v1621_v25 = vpop.eup %1620  ;;  %v909_v28 = vmul.f32 %v1619_v23, %v2016_v52  ;;  %v962_v60 = vmul.f32 %v1901_v3, %v908_v22  ;;  %427 = vst.msk [vmem:[#allocation2 + $0x70] sm:$0xff] %vm412_vm1, %v1663_v13  ;;  %v926_v5 = vld [vmem:[#allocation2 + $0x30] sm:$0xff]  ;;  %v923_v22 = vld [vmem:[#allocation2 + $0x18] sm:$0xff] }
 0x102   : > { %v1623_v45 = vpop.eup %1622  ;;  %1626 = vrcp.f32 %v847_v24  ;;  %v902_v44 = vmul.f32 %v1621_v25, %v1991_v21  ;;  %428 = vst.msk [vmem:[#allocation2 + $0x78] sm:$0xff] %vm412_vm1, %v1663_v13 }
 0x103   : > { %1628 = vrcp.f32 %v840_v20  ;;  %v963_v29 = vmul.f32 %v1904_v8, %v909_v28  ;;  %v903_v9 = vmul.f32 %v1623_v45, %v1997_v46  ;;  %v927_v20 = vld [vmem:[#allocation2 + $0x38] sm:$0xff]  ;;  %v928_v19 = vld [vmem:[#allocation2 + $0x40] sm:$0xff] }
 0x104   : > { %1630 = vrcp.f32 %v841_v55  ;;  %v956_v21 = vmul.f32 %v1901_v3, %v902_v44  ;;  %v929_v42 = vld [vmem:[#allocation2 + $0x48] sm:$0xff]  ;;  %v920_v45 = vld [vmem:[#allocation2] sm:$0xff] }
 0x105   : > { %v1004_v40 = vadd.f32 %v963_v29, %v962_v60  ;;  %v957_v46 = vmul.f32 %v1904_v8, %v903_v9  ;;  %v930_v47 = vld [vmem:[#allocation2 + $0x50] sm:$0xff] }
 0x106   : > { %v1625_v50 = vpop.eup %1624  ;;  %v931_v35 = vld [vmem:[#allocation2 + $0x58] sm:$0xff] }
 0x107   : > { %v910_v52 = vmul.f32 %v1625_v50, %v2023_v38  ;;  %1005 = vadd.xlane.f32.xlu2 %v1004_v40  ;;  %993 = vadd.xlane.f32.xlu0 %v992_v30  ;;  %v995_v27 = vadd.f32 %v957_v46, %v956_v21  ;;  %v933_v54 = vld [vmem:[#allocation2 + $0x68] sm:$0xff] }
 0x108   : > { %v1627_v31 = vpop.eup %1626  ;;  %v921_v21 = vld [vmem:[#allocation2 + $0x8] sm:$0xff] }
 0x109   : > { %v1629_v32 = vpop.eup %1628  ;;  %v911_v34 = vmul.f32 %v1627_v31, %v2026_v33  ;;  %v964_v39 = vmul.f32 %v1901_v3, %v910_v52 }
 0x10a   : > { %v1631_v14 = vpop.eup %1630  ;;  %v904_v53 = vmul.f32 %v1629_v32, %v2007_v43 }
 0x10b   : > { %v965_v38 = vmul.f32 %v1904_v8, %v911_v34  ;;  %v905_v33 = vmul.f32 %v1631_v14, %v2013_v12 }
 0x10c   : > { %v958_v49 = vmul.f32 %v1901_v3, %v904_v53  ;;  %v932_v3 = vld [vmem:[#allocation2 + $0x60] sm:$0xff] }
 0x10d   : > { %v1007_v48 = vadd.f32 %v965_v38, %v964_v39  ;;  %v959_v43 = vmul.f32 %v1904_v8, %v905_v33  ;;  %v925_v39 = vld [vmem:[#allocation2 + $0x28] sm:$0xff] }
 0x10f   : > { %1008 = vadd.xlane.f32.xlu1 %v1007_v48  ;;  %996 = vadd.xlane.f32.xlu2 %v995_v27  ;;  %v998_v12 = vadd.f32 %v959_v43, %v958_v49 }
 0x110   : > { %984 = vadd.xlane.f32.xlu0 %v1964_v26 }
 0x117   : > { %999 = vadd.xlane.f32.xlu1 %v998_v12  ;;  %987 = vadd.xlane.f32.xlu2 %v1982_v51  ;;  %v934_v51 = vld [vmem:[#allocation2 + $0x70] sm:$0xff] }
 0x118   : > { %975 = vadd.xlane.f32.xlu0 %v1952_v58  ;;  %v935_v58 = vld [vmem:[#allocation2 + $0x78] sm:$0xff] }
 0x11f   : > { %990 = vadd.xlane.f32.xlu1 %v1988_v41  ;;  %978 = vadd.xlane.f32.xlu2 %v1934_v16 }
 0x127   : > { %981 = vadd.xlane.f32.xlu1 %v1959_v10 }
 0x131   : > { %v1012_v8 = vpop.xlane.xlu2 %1011 }
 0x132   : > { %v1034_v26 = vadd.f32 %v1012_v8, %v932_v3  ;;  %v922_v3 = vld [vmem:[#allocation2 + $0x10] sm:$0xff] }
 0x134   : > { %1051 = vst.msk [vmem:[#allocation2 + $0x60] sm:$0xff] %vm412_vm1, %v1034_v26 }
 0x13b   : > { %v1015_v59 = vpop.xlane.xlu0 %1014  ;;  %v1070_v63 = vld [vmem:[#allocation2 + $0x60] sm:$0xff] }
 0x13c   : > { %v1035_v11 = vadd.f32 %v1015_v59, %v933_v54  ;;  %v1086_v1 = vmul.f32 0.00390625, %v1070_v63  ;;  %v1091_v63 = vld [vmem:[%s2195_s4 + $0x8] sm:$0x7] }
 0x13e   : > { %1052 = vst.msk [vmem:[#allocation2 + $0x68] sm:$0xff] %vm412_vm1, %v1035_v11 }
 0x142   : > { %v1018_v15 = vpop.xlane.xlu2 %1017 }
 0x143   : > { %v1036_v37 = vadd.f32 %v1018_v15, %v934_v51 }
 0x145   : > { %1053 = vst.msk [vmem:[#allocation2 + $0x70] sm:$0xff] %vm412_vm1, %v1036_v37  ;;  %v1071_v62 = vld [vmem:[#allocation2 + $0x68] sm:$0xff] }
 0x146   : > { %v1087_v0 = vmul.f32 0.00390625, %v1071_v62 }
 0x14c   : > { %v1072_v10 = vld [vmem:[#allocation2 + $0x70] sm:$0xff] }
 0x14d   : > { %v1088_v61 = vmul.f32 0.00390625, %v1072_v10 }
 0x14e   : > { %v1021_v41 = vpop.xlane.xlu1 %1020 }
 0x14f   : > { %v1037_v16 = vadd.f32 %v1021_v41, %v935_v58 }
 0x151   : > { %1054 = vst.msk [vmem:[#allocation2 + $0x78] sm:$0xff] %vm412_vm1, %v1037_v16 }
 0x158   : > { %v1073_v18 = vld [vmem:[#allocation2 + $0x78] sm:$0xff] }
 0x159   : > { %v1089_v57 = vmul.f32 0.00390625, %v1073_v18 }
 0x15b   : > { %1094 = vmatpush.msrb.mxu2 %v1089_v57 }
 0x15d   : > { %1095 = vmatpush.msrb.mxu2 %v1088_v61  ;;  %v1090_v61 = vld [vmem:[%s2195_s4] sm:$0xff] }
 0x15f   : > { %1096 = vmatpush.msrb.mxu2 %v1087_v0 }
 0x161   : > { %1097 = vmatpush.msrb.mxu2 %v1086_v1  ;;  %v1093_v1 = vld [vmem:[%s2196_s5 + $0x8] sm:$0x7] }
 0x172   : > { %v1003_v2 = vpop.xlane.xlu0 %1002 }
 0x173   : > { %v1031_v4 = vadd.f32 %v1003_v2, %v929_v42  ;;  %v1092_v42 = vld [vmem:[%s2196_s5] sm:$0xff] }
 0x175   : > { %1048 = vst.msk [vmem:[#allocation2 + $0x48] sm:$0xff] %vm412_vm1, %v1031_v4 }
 0x17a   : > { %v1006_v6 = vpop.xlane.xlu2 %1005  ;;  %v994_v56 = vpop.xlane.xlu0 %993 }
 0x17b   : > { %v1032_v7 = vadd.f32 %v1006_v6, %v930_v47  ;;  %v1028_v17 = vadd.f32 %v994_v56, %v926_v5  ;;  %v1117_v5 = vld [vmem:[%s2197_s6] sm:$0xff]  ;;  %v1118_v6 = vld [vmem:[%s2197_s6 + $0x8] sm:$0xff]  ;;  %v1119_v56 = vld [vmem:[%s2197_s6 + $0x10] sm:$0xff] }
 0x17c   : > { %v1067_v32 = vld [vmem:[#allocation2 + $0x48] sm:$0xff] }
 0x17d   : > { %1049 = vst.msk [vmem:[#allocation2 + $0x50] sm:$0xff] %vm412_vm1, %v1032_v7  ;;  %v1083_v46 = vmul.f32 0.00390625, %v1067_v32  ;;  %v1120_v7 = vld [vmem:[%s2197_s6 + $0x18] sm:$0xff] }
 0x17e   : > { %1045 = vst.msk [vmem:[#allocation2 + $0x30] sm:$0xff] %vm412_vm1, %v1028_v17  ;;  %v1121_v17 = vld [vmem:[%s2197_s6 + $0x20] sm:$0xff] }
 0x182   : > { %v1009_v23 = vpop.xlane.xlu1 %1008  ;;  %v997_v55 = vpop.xlane.xlu2 %996 }
 0x183   : > { %v1033_v24 = vadd.f32 %v1009_v23, %v931_v35  ;;  %v1029_v25 = vadd.f32 %v997_v55, %v927_v20  ;;  %v985_v28 = vpop.xlane.xlu0 %984  ;;  %v1122_v35 = vld [vmem:[%s2197_s6 + $0x28] sm:$0xff]  ;;  %v1123_v20 = vld [vmem:[%s2197_s6 + $0x30] sm:$0xff] }
 0x184   : > { %v1025_v60 = vadd.f32 %v985_v28, %v923_v22  ;;  %v1068_v31 = vld [vmem:[#allocation2 + $0x50] sm:$0xff]  ;;  %v1124_v22 = vld [vmem:[%s2197_s6 + $0x38] sm:$0xff] }
 0x185   : > { %1050 = vst.msk [vmem:[#allocation2 + $0x58] sm:$0xff] %vm412_vm1, %v1033_v24  ;;  %v1084_v34 = vmul.f32 0.00390625, %v1068_v31  ;;  %v1064_v43 = vld [vmem:[#allocation2 + $0x30] sm:$0xff]  ;;  %v1128_v31 = vld [vmem:[%s2198_s7 + $0x18] sm:$0xff] }
 0x186   : > { %1046 = vst.msk [vmem:[#allocation2 + $0x38] sm:$0xff] %vm412_vm1, %v1029_v25  ;;  %v1080_v8 = vmul.f32 0.00390625, %v1064_v43 }
 0x187   : > { %1042 = vst.msk [vmem:[#allocation2 + $0x18] sm:$0xff] %vm412_vm1, %v1025_v60 }
 0x18a   : > { %v1000_v29 = vpop.xlane.xlu1 %999  ;;  %v988_v44 = vpop.xlane.xlu2 %987 }
 0x18b   : > { %v1030_v9 = vadd.f32 %v1000_v29, %v928_v19  ;;  %v1026_v40 = vadd.f32 %v988_v44, %v924_v36  ;;  %v976_v30 = vpop.xlane.xlu0 %975  ;;  %v1131_v36 = vld [vmem:[%s2198_s7 + $0x30] sm:$0xff]  ;;  %v1130_v29 = vld [vmem:[%s2198_s7 + $0x28] sm:$0xff] }
 0x18c   : > { %v1022_v50 = vadd.f32 %v976_v30, %v920_v45  ;;  %v1069_v52 = vld [vmem:[#allocation2 + $0x58] sm:$0xff]  ;;  %v1129_v30 = vld [vmem:[%s2198_s7 + $0x20] sm:$0xff] }
 0x18d   : > { %1047 = vst.msk [vmem:[#allocation2 + $0x40] sm:$0xff] %vm412_vm1, %v1030_v9  ;;  %v1085_v13 = vmul.f32 0.00390625, %v1069_v52  ;;  %v1065_v27 = vld [vmem:[#allocation2 + $0x38] sm:$0xff] }
 0x18e   : > { %1043 = vst.msk [vmem:[#allocation2 + $0x20] sm:$0xff] %vm412_vm1, %v1026_v40  ;;  %v1081_v12 = vmul.f32 0.00390625, %v1065_v27  ;;  %v1061_v15 = vld [vmem:[#allocation2 + $0x18] sm:$0xff] }
 0x18f   : > { %1039 = vst.msk [vmem:[#allocation2] sm:$0xff] %vm412_vm1, %v1022_v50  ;;  %1098 = vmatpush.msrb.mxu2 %v1085_v13  ;;  %v1077_v58 = vmul.f32 0.00390625, %v1061_v15  ;;  %v1132_v45 = vld [vmem:[%s2198_s7 + $0x38] sm:$0xff] }
 0x191   : > { %1099 = vmatpush.msrb.mxu2 %v1084_v34  ;;  %v1127_v34 = vld [vmem:[%s2198_s7 + $0x10] sm:$0xff] }
 0x192   : > { %v991_v14 = vpop.xlane.xlu1 %990  ;;  %v979_v38 = vpop.xlane.xlu2 %978 }
 0x193   : > { %v1027_v53 = vadd.f32 %v991_v14, %v925_v39  ;;  %v1023_v33 = vadd.f32 %v979_v38, %v921_v21  ;;  %1100 = vmatpush.msrb.mxu2 %v1083_v46  ;;  %v1126_v46 = vld [vmem:[%s2198_s7 + $0x8] sm:$0xff] }
 0x194   : > { %v1066_v48 = vld [vmem:[#allocation2 + $0x40] sm:$0xff] }
 0x195   : > { %1044 = vst.msk [vmem:[#allocation2 + $0x28] sm:$0xff] %vm412_vm1, %v1027_v53  ;;  %v1082_v49 = vmul.f32 0.00390625, %v1066_v48  ;;  %v1062_v11 = vld [vmem:[#allocation2 + $0x20] sm:$0xff] }
 0x196   : > { %1040 = vst.msk [vmem:[#allocation2 + $0x8] sm:$0xff] %vm412_vm1, %v1023_v33  ;;  %v1078_v37 = vmul.f32 0.00390625, %v1062_v11  ;;  %v1058_v18 = vld [vmem:[#allocation2] sm:$0xff] }
 0x197   : > { %1101 = vmatpush.msrb.mxu2 %v1082_v49  ;;  %v1074_v57 = vmul.f32 0.00390625, %v1058_v18  ;;  %v1125_v53 = vld [vmem:[%s2198_s7] sm:$0xff] }
 0x199   : > { %1102 = vmatpush.msrb.mxu2 %v1081_v12 }
 0x19a   : > { %v982_v26 = vpop.xlane.xlu1 %981 }
 0x19b   : > { %v1024_v54 = vadd.f32 %v982_v26, %v922_v3  ;;  %1103 = vmatpush.msrb.mxu2 %v1080_v8  ;;  %v1211_v3 = vld [vmem:[%s2199_s8] sm:$0xff]  ;;  %v1212_v8 = vld [vmem:[%s2199_s8 + $0x8] sm:$0x7] }
 0x19c   : > { %v1063_v59 = vld [vmem:[#allocation2 + $0x28] sm:$0xff] }
 0x19d   : > { %1041 = vst.msk [vmem:[#allocation2 + $0x10] sm:$0xff] %vm412_vm1, %v1024_v54  ;;  %v1079_v51 = vmul.f32 0.00390625, %v1063_v59  ;;  %v1059_v16 = vld [vmem:[#allocation2 + $0x8] sm:$0xff]  ;;  %v1213_v54 = vld [vmem:[%s2200_s9] sm:$0xff] }
 0x19e   : > { %v1075_v62 = vmul.f32 0.00390625, %v1059_v16  ;;  %v1214_v59 = vld [vmem:[%s2200_s9 + $0x8] sm:$0x7] }
 0x19f   : > { %1104 = vmatpush.msrb.mxu2 %v1079_v51 }
 0x1a1   : > { %1105 = vmatpush.msrb.mxu2 %v1078_v37 }
 0x1a3   : > { %1106 = vmatpush.msrb.mxu2 %v1077_v58 }
 0x1a4   : > { %v1060_v41 = vld [vmem:[#allocation2 + $0x10] sm:$0xff] }
 0x1a5   : > { %v1076_v10 = vmul.f32 0.00390625, %v1060_v41 }
 0x1a7   : > { %1107 = vmatpush.msrb.mxu2 %v1076_v10 }
 0x1a9   : > { %1108 = vmatpush.msrb.mxu2 %v1075_v62 }
 0x1ab   : > { %1109 = vmatpush.msrb.mxu2 %v1074_v57 }
 0x1ac   : > { %1110 = vmatmul.f32.vlgmr.msrb.gmra.mxu2 %v1090_v61 }
 0x1b4   : > { %1113 = vmatmul.f32.gmra.mxu2 %v1091_v63 }
 0x22f   : > { %v1111_v0 = vpop.f32.mrf.mxu2 }
 0x230   : > { %v1112_v47 = vadd.f32 %v1111_v0, %v1092_v42 }
 0x237   : > { %v1114_v2 = vpop.f32.mrf.mxu2 }
 0x238   : > { %v1115_v4 = vadd.f32 %v1114_v2, %v1093_v1 }
 0x23a   : > { %1444 = vmatpush.msk.msrb.mxu3 %vm1158_vm2, %v1115_v4 }
 0x23c   : > { %1177 = vmatpush.msrb.mxu3 %v1112_v47 }
 0x23d   : > { %1445 = vmatmul.msk.f32.vlgmr.msrb.gmra.mxu3 %vm1133_vm3, %v1117_v5 }
 0x245   : > { %1446 = vmatmul.msk.f32.gmra.mxu3 %vm1133_vm3, %v1118_v6 }
 0x24d   : > { %1447 = vmatmul.msk.f32.gmra.mxu3 %vm1133_vm3, %v1119_v56 }
 0x255   : > { %1448 = vmatmul.msk.f32.gmra.mxu3 %vm1133_vm3, %v1120_v7 }
 0x25d   : > { %1449 = vmatmul.msk.f32.gmra.mxu3 %vm1133_vm3, %v1121_v17 }
 0x265   : > { %1450 = vmatmul.msk.f32.gmra.mxu3 %vm1133_vm3, %v1122_v35 }
 0x26d   : > { %1451 = vmatmul.msk.f32.gmra.mxu3 %vm1133_vm3, %v1123_v20 }
 0x275   : > { %1452 = vmatmul.msk.f32.gmra.mxu3 %vm1133_vm3, %v1124_v22 }
 0x2c0   : > { %v1179_v23 = vpop.f32.mrf.mxu3 }
 0x2c1   : > { %v1180_v27 = vadd.f32 %v1179_v23, %v1125_v53 }
 0x2c3   : > { %v1203_v12 = vmax.f32 %v1180_v27, 0.0 }
 0x2c8   : > { %v1182_v55 = vpop.f32.mrf.mxu3 }
 0x2c9   : > { %v1183_v33 = vadd.f32 %v1182_v55, %v1126_v46 }
 0x2cb   : > { %v1204_v43 = vmax.f32 %v1183_v33, 0.0 }
 0x2d0   : > { %v1185_v24 = vpop.f32.mrf.mxu3 }
 0x2d1   : > { %v1186_v14 = vadd.f32 %v1185_v24, %v1127_v34 }
 0x2d3   : > { %v1205_v49 = vmax.f32 %v1186_v14, 0.0 }
 0x2d8   : > { %v1188_v25 = vpop.f32.mrf.mxu3 }
 0x2d9   : > { %v1189_v39 = vadd.f32 %v1188_v25, %v1128_v31 }
 0x2db   : > { %v1206_v48 = vmax.f32 %v1189_v39, 0.0 }
 0x2e0   : > { %v1191_v28 = vpop.f32.mrf.mxu3 }
 0x2e1   : > { %v1192_v13 = vadd.f32 %v1191_v28, %v1129_v30 }
 0x2e3   : > { %v1207_v38 = vmax.f32 %v1192_v13, 0.0 }
 0x2e8   : > { %v1194_v60 = vpop.f32.mrf.mxu3 }
 0x2e9   : > { %v1195_v50 = vadd.f32 %v1194_v60, %v1130_v29 }
 0x2eb   : > { %v1208_v21 = vmax.f32 %v1195_v50, 0.0 }
 0x2f0   : > { %v1197_v19 = vpop.f32.mrf.mxu3 }
 0x2f1   : > { %v1198_v9 = vadd.f32 %v1197_v19, %v1131_v36 }
 0x2f3   : > { %v1209_v32 = vmax.f32 %v1198_v9, 0.0 }
 0x2f8   : > { %v1200_v44 = vpop.f32.mrf.mxu3 }
 0x2f9   : > { %v1201_v40 = vadd.f32 %v1200_v44, %v1132_v45 }
 0x2fb   : > { %v1210_v52 = vmax.f32 %v1201_v40, 0.0 }
 0x2fd   : > { %1230 = vmatpush.msra.mxu2 %v1210_v52 }
 0x2ff   : > { %1231 = vmatpush.msra.mxu2 %v1209_v32 }
 0x301   : > { %1232 = vmatpush.msra.mxu2 %v1208_v21 }
 0x303   : > { %1233 = vmatpush.msra.mxu2 %v1207_v38 }
 0x305   : > { %1234 = vmatpush.msra.mxu2 %v1206_v48 }
 0x307   : > { %1235 = vmatpush.msra.mxu2 %v1205_v49 }
 0x309   : > { %1236 = vmatpush.msra.mxu2 %v1204_v43 }
 0x30b   : > { %1237 = vmatpush.msra.mxu2 %v1203_v12 }
 0x30c   : > { %1453 = vmatmul.msk.f32.vlgmr.msra.gmra.mxu2 %vm1215_vm4, %v1211_v3 }
 0x314   : > { %1454 = vmatmul.msk.f32.gmra.mxu2 %vm1215_vm4, %v1212_v8 }
 0x38f   : > { %v1239_v26 = vpop.f32.mrf.mxu2 }
 0x390   : > { %v1240_v11 = vadd.f32 %v1239_v26, %v1213_v54 }
 0x392   : > { %v1245_v37 = vsel %vm412_vm1, %v1240_v11, -inf }
 0x397   : > { %v1242_v51 = vpop.f32.mrf.mxu2 }
 0x398   : > { %v1243_v15 = vadd.f32 %v1242_v51, %v1214_v59 }
 0x39a   : > { %v1247_v58 = vsel %vm1246_vm5, %v1243_v15, -inf }
 0x39b   : > { %v1248_v41 = vmax.f32 %v1245_v37, %v1247_v58 }
 0x39d   : > { %v1249_v16 = vrot.slane %v1248_v41, 4 }
 0x39f   : > { %v1250_v10 = vmax.f32 %v1248_v41, %v1249_v16 }
 0x3a1   : > { %v1251_v18 = vrot.slane %v1250_v10, 2 }
 0x3a3   : > { %v1252_v62 = vmax.f32 %v1250_v10, %v1251_v18 }
 0x3a5   : > { %v1253_v57 = vrot.slane %v1252_v62, 1 }
 0x3a7   : > { %v1254_v61 = vmax.f32 %v1252_v62, %v1253_v57 }
 0x3a9   : > { %v1255_v63 = vsub.f32 %v1240_v11, %v1254_v61  ;;  %v1256_v0 = vsub.f32 %v1243_v15, %v1254_v61 }
 0x3ab   : > { %v1257_v1 = vmul.f32 1.442695, %v1255_v63  ;;  %v1259_v42 = vmul.f32 1.442695, %v1256_v0 }
 0x3ad   : > { %1632 = vpow2.f32 %v1257_v1 }
 0x3ae   : > { %1634 = vpow2.f32 %v1259_v42 }
 0x3b3   : > { %v1633_v2 = vpop.eup %1632 }
 0x3b4   : > { %v1635_v4 = vpop.eup %1634  ;;  %v1261_v47 = vsel %vm412_vm1, %v1633_v2, 0.0 }
 0x3b5   : > { %v1262_v5 = vsel %vm1246_vm5, %v1635_v4, 0.0 }
 0x3b6   : > { %v1263_v6 = vadd.f32 %v1262_v5, %v1261_v47 }
 0x3b8   : > { %v1264_v56 = vrot.slane %v1263_v6, 4 }
 0x3ba   : > { %v1265_v7 = vadd.f32 %v1264_v56, %v1263_v6 }
 0x3bc   : > { %v1266_v17 = vrot.slane %v1265_v7, 2 }
 0x3be   : > { %v1267_v35 = vadd.f32 %v1266_v17, %v1265_v7 }
 0x3c0   : > { %v1268_v20 = vrot.slane %v1267_v35, 1 }
 0x3c2   : > { %v1269_v22 = vadd.f32 %v1268_v20, %v1267_v35 }
 0x3c4   : > { %1636 = vrcp.f32 %v1269_v22  ;;  %v1281_v25 = vand.u32 2147483648, %v1269_v22  ;;  %v1279_v60 = vand.u32 2147483647, %v1269_v22  ;;  %vm1275_vm7 = vweird.f32 %v1269_v22 }
 0x3c6   : > { %v1282_v36 = vor.u32 1.1754944e-38, %v1281_v25  ;;  %vm1280_vm9 = vcmp.eq.f32.partialorder %v1279_v60, 8.507059e+37 }
 0x3ca   : > { %v1637_v23 = vpop.eup %1636 }
 0x3cb   : > { %v1271_v55 = vmul.f32 %v1637_v23, %v1269_v22  ;;  %vm1276_vm6 = vweird.f32 %v1637_v23 }
 0x3cc   : > { %vm1277_vm8 = vmor %vm1275_vm7, %vm1276_vm6 }
 0x3cd   : > { %v1272_v24 = vsub.f32 1.0, %v1271_v55 }
 0x3cf   : > { %v1273_v28 = vmul.f32 %v1637_v23, %v1272_v24 }
 0x3d1   : > { %v1274_v19 = vadd.f32 %v1637_v23, %v1273_v28 }
 0x3d3   : > { %v1278_v45 = vsel %vm1277_vm8, %v1637_v23, %v1274_v19 }
 0x3d4   : > { %v1283_v29 = vsel %vm1280_vm9, %v1282_v36, %v1278_v45 }
 0x3d5   : > { %v1284_v44 = vmul.f32 %v1633_v2, %v1283_v29  ;;  %v1285_v9 = vmul.f32 %v1635_v4, %v1283_v29 }
 0x3d7   : > { %1286 = vst.msk [vmem:[%s406_s26] sm:$0xff] %vm412_vm1, %v1284_v44 }
 0x3d8   : > { %1287 = vst.msk [vmem:[%s406_s26 + $0x8] sm:$0x7] %vm1246_vm5, %v1285_v9 }
 0x3d9 PF: > { %s20_s15 = sadd.s32 1, %s1660_s15   ;;  %s2202_s13 = smov %s1656_s14 }
 0x3da   : > { %p17_p5 = scmp.ge.s32.totalorder %s20_s15, 4   ;;  %s2203_s14 = smov %s2205_s16 }
 0x3dc   :  { %19 = sbr.rel (!%p17_p5) target bundleno = 2 (0x2), region = 101 }

</bundles_post_ra>
